<compile_context>
chip_gen: v7x
topology: tpu7x:2x2x1
jax: 0.10.0
libtpu: 0.0.40
codegen_flags: <defaults>
</compile_context>

<pallas_src>
import numpy as np
import jax
import jax.numpy as jnp
from jax import lax
from jax.experimental import pallas as pl
from jax.experimental.pallas import tpu as pltpu


# ------------------------------ Pallas kernel --------------------------------
def make_decoder_call(N, Cin, Cmid, Cout, H, W, Ho, Wo):
    HW = H * W
    HoWo = Ho * Wo

    def kernel(xs_ref, mask_ref, w1_ref, b1_ref, wtp_ref, b2_ref,
               w3_ref, b3_ref, t_ref, out_ref):
        # xs: [x ; x>>W ; x>>H ; x>>HW] stacked on sublanes -> (4*Cin, HW)
        xs = xs_ref[0]

        # ---- stage 1: conv1 (1x1, BN folded) + ReLU on all 4 shifted copies
        #      one matmul: (4*Cmid, 4*Cin) @ (4*Cin, HW)
        h = jnp.dot(w1_ref[...], xs, preferred_element_type=jnp.float32)
        h = jnp.maximum(h + b1_ref[...], 0.0) * mask_ref[...]        # (4*Cmid, HW)

        # ---- stage 2: transposed conv (4 parity phases) + BN + ReLU
        #      one (Cmid, 4*Cmid) @ (4*Cmid, HW) matmul per phase
        phases = []
        for p in range(4):
            v = jnp.dot(wtp_ref[p], h, preferred_element_type=jnp.float32)
            phases.append(jnp.maximum(v + b2_ref[...], 0.0))
        pcat = jnp.concatenate(phases, axis=-1)                      # (Cmid, 4*HW)

        # ---- stage 3: conv2 (1x1, BN folded) + ReLU  (Cout, 4*HW)
        o = jnp.dot(w3_ref[...], pcat, preferred_element_type=jnp.float32)
        o = jnp.maximum(o + b3_ref[...], 0.0)

        # ---- stage 4: phase-blocked -> row-major lanes (exact 0/1 permutation)
        out = jnp.dot(o, t_ref[...], preferred_element_type=jnp.float32)
        out_ref[...] = out.reshape(1, Cout, HoWo)

    def const(shape):
        nd = len(shape)
        return pl.BlockSpec(shape, lambda n: (0,) * nd)

    grid_spec = pltpu.PrefetchScalarGridSpec(
        num_scalar_prefetch=0,
        grid=(N,),
        in_specs=[
            pl.BlockSpec((1, 4 * Cin, HW), lambda n: (n, 0, 0)),   # shifted inputs
            const((4 * Cmid, HW)),        # validity masks
            const((4 * Cmid, 4 * Cin)),   # block-diag conv1 weight (BN folded)
            const((4 * Cmid, 1)),         # conv1/BN1 bias
            const((4, Cmid, 4 * Cmid)),   # per-phase tp-conv channel matrices
            const((Cmid, 1)),             # BN2 bias
            const((Cout, Cmid)),          # conv2 weight (BN folded)
            const((Cout, 1)),             # BN3 bias
            const((4 * HW, HoWo)),        # phase->row-major permutation
        ],
        out_specs=pl.BlockSpec((1, Cout, HoWo), lambda n: (n, 0, 0)),
    )
    return pl.pallas_call(
        kernel,
        out_shape=jax.ShapeDtypeStruct((N, Cout, HoWo), jnp.float32),
        grid_spec=grid_spec,
        compiler_params=pltpu.CompilerParams(dimension_semantics=("parallel",)),
    )


# ------------------------------ parameter init -------------------------------
def init_params(key, in_planes, out_planes):
    cmid = in_planes // 4
    ks = jax.random.split(key, 6)

    def conv_w(k, shape):
        fan_in = float(np.prod(shape[1:]))
        return jax.random.normal(k, shape, jnp.float32) / np.sqrt(fan_in)

    p = {
        'w1': conv_w(ks[0], (cmid, in_planes, 1, 1)),   # Conv2d  (out, in, kh, kw)
        'w2': conv_w(ks[1], (cmid, cmid, 3, 3)),        # ConvTranspose2d (in, out, kh, kw)
        'w3': conv_w(ks[2], (out_planes, cmid, 1, 1)),  # Conv2d  (out, in, kh, kw)
    }
    for i, (name, c) in enumerate([('bn1', cmid), ('bn2', cmid), ('bn3', out_planes)]):
        kg, kb, km, kv = jax.random.split(ks[3 + i], 4)
        p[name] = dict(
            gamma=1.0 + 0.1 * jax.random.normal(kg, (c,), jnp.float32),
            beta=0.1 * jax.random.normal(kb, (c,), jnp.float32),
            mean=0.1 * jax.random.normal(km, (c,), jnp.float32),
            var=1.0 + 0.1 * jax.random.uniform(kv, (c,), jnp.float32),
        )
    return p


# ------------------------------ forward wrappers ------------------------------
def decoder_forward(x_nchw, params, *, kernel_size=3, stride=2, padding=1,
                    out_padding=1):
    assert (kernel_size, stride, padding, out_padding) == (3, 2, 1, 1), \
        "Pallas kernel is specialized to kernel=3, stride=2, pad=1, out_pad=1"
    N, Cin, H, W = map(int, x_nchw.shape)
    Cmid = int(params['w1'].shape[0])
    Cout = int(params['w3'].shape[0])
    Ho, Wo = 2 * H, 2 * W
    HW, HoWo = H * W, Ho * Wo
    eps = 1e-5

    x = x_nchw.astype(jnp.float32)
    # shifted copies of the input (gather form of the stride-2 transposed conv)
    xW = jnp.pad(x[:, :, :, 1:], ((0, 0), (0, 0), (0, 0), (0, 1)))
    xH = jnp.pad(x[:, :, 1:, :], ((0, 0), (0, 0), (0, 1), (0, 0)))
    xHW = jnp.pad(x[:, :, 1:, 1:], ((0, 0), (0, 0), (0, 1), (0, 1)))
    xs = jnp.concatenate([x, xW, xH, xHW], axis=1).reshape(N, 4 * Cin, HW)

    def fold(bn):
        s = bn['gamma'] / jnp.sqrt(bn['var'] + eps)
        return s, bn['beta'] - bn['mean'] * s

    s1, b1 = fold(params['bn1'])
    s2, b2 = fold(params['bn2'])
    s3, b3 = fold(params['bn3'])

    # conv1 (1x1) with BN1 folded, replicated block-diagonally for the 4 copies
    w1f = params['w1'][:, :, 0, 0] * s1[:, None]                     # (Cmid, Cin)
    w1bd = jnp.kron(jnp.eye(4, dtype=jnp.float32), w1f)              # (4Cmid, 4Cin)
    b1t = jnp.tile(b1, 4)[:, None]                                   # (4Cmid, 1)

    # validity masks: shifted h1 must be exactly 0 where the shift leaves the image
    mk = np.ones((4, H, W), np.float32)
    mk[1, :, W - 1] = 0.0
    mk[2, H - 1, :] = 0.0
    mk[3, H - 1, :] = 0.0
    mk[3, :, W - 1] = 0.0
    mask = jnp.asarray(
        np.repeat(mk.reshape(4, 1, HW), Cmid, axis=1).reshape(4 * Cmid, HW))

    # transposed-conv taps with BN2 scale folded, arranged per output parity phase
    # A[ky, kx][co, ci] = w2[ci, co, ky, kx] * s2[co]
    A = jnp.transpose(params['w2'], (2, 3, 1, 0)) * s2[None, None, :, None]
    Z = jnp.zeros((Cmid, Cmid), jnp.float32)
    M0 = jnp.concatenate([A[1, 1], Z,       Z,       Z], axis=1)      # yo even, xo even
    M1 = jnp.concatenate([A[1, 2], A[1, 0], Z,       Z], axis=1)      # yo even, xo odd
    M2 = jnp.concatenate([A[2, 1], Z,       A[0, 1], Z], axis=1)      # yo odd,  xo even
    M3 = jnp.concatenate([A[2, 2], A[2, 0], A[0, 2], A[0, 0]], axis=1)
    wtp = jnp.stack([M0, M1, M2, M3])                                 # (4, Cmid, 4Cmid)
    b2t = b2[:, None]

    w3f = params['w3'][:, :, 0, 0] * s3[:, None]                      # (Cout, Cmid)
    b3t = b3[:, None]

    # phase-blocked -> row-major permutation (exact 0/1 matrix)
    T = np.zeros((4 * HW, HoWo), np.float32)
    for dy in range(2):
        for dx in range(2):
            ph = 2 * dy + dx
            for i in range(H):
                for j in range(W):
                    T[ph * HW + i * W + j, (2 * i + dy) * Wo + (2 * j + dx)] = 1.0

    call = make_decoder_call(N, Cin, Cmid, Cout, H, W, Ho, Wo)
    out_flat = call(xs, mask, w1bd, b1t, wtp, b2t, w3f, b3t, jnp.asarray(T))
    return out_flat.reshape(N, Cout, Ho, Wo)                          # NCHW, no transpose


def decoder_reference(x_nchw, params):
    """Pure-JAX reference (no Pallas) for numerical verification."""
    eps = 1e-5
    hp = lax.Precision.HIGHEST
    x = x_nchw.astype(jnp.float32)

    def bn(v, p):
        s = p['gamma'] / jnp.sqrt(p['var'] + eps)
        return v * s[None, :, None, None] + (p['beta'] - p['mean'] * s)[None, :, None, None]

    h = jnp.einsum('oi,nihw->nohw', params['w1'][:, :, 0, 0], x, precision=hp)
    h = jax.nn.relu(bn(h, params['bn1']))

    # ConvTranspose2d(3, stride=2, padding=1, output_padding=1) as a dilated conv
    K, S, P, OP = 3, 2, 1, 1
    wconv = jnp.transpose(jnp.flip(params['w2'], axis=(2, 3)), (1, 0, 2, 3))
    pad = (K - 1 - P, K - 1 - P + OP)
    h = lax.conv_general_dilated(h, wconv, window_strides=(1, 1),
                                 padding=[pad, pad], lhs_dilation=(S, S),
                                 dimension_numbers=('NCHW', 'OIHW', 'NCHW'),
                                 precision=hp)
    h = jax.nn.relu(bn(h, params['bn2']))

    h = jnp.einsum('oi,nihw->nohw', params['w3'][:, :, 0, 0], h, precision=hp)
    return jax.nn.relu(bn(h, params['bn3']))


# ----------------------------------- main -------------------------------------
if __name__ == "__main__":
    N, IN_PLANES, OUT_PLANES = 2, 16, 8
    H = W = 16

    key = jax.random.PRNGKey(0)
    kx, kp = jax.random.split(key)
    x = jax.random.normal(kx, (N, IN_PLANES, H, W), jnp.float32)
    params = init_params(kp, IN_PLANES, OUT_PLANES)

    out = jax.block_until_ready(decoder_forward(x, params))
    assert out.shape == (N, OUT_PLANES, 2 * H, 2 * W)

    ref = jax.block_until_ready(decoder_reference(x, params))
    np.testing.assert_allclose(np.asarray(out), np.asarray(ref),
                               rtol=2e-3, atol=2e-3)
    print("KERNEL_OK")
</pallas_src>

<mosaic_0001>
module attributes {stable_mosaic.version = 11 : i64} {
  func.func @kernel(%arg0: i32, %arg1: memref<1x64x256xf32, #tpu.memory_space<vmem>>, %arg2: memref<16x256xf32, #tpu.memory_space<vmem>>, %arg3: memref<16x64xf32, #tpu.memory_space<vmem>>, %arg4: memref<16x1xf32, #tpu.memory_space<vmem>>, %arg5: memref<4x4x16xf32, #tpu.memory_space<vmem>>, %arg6: memref<4x1xf32, #tpu.memory_space<vmem>>, %arg7: memref<8x4xf32, #tpu.memory_space<vmem>>, %arg8: memref<8x1xf32, #tpu.memory_space<vmem>>, %arg9: memref<1024x1024xf32, #tpu.memory_space<vmem>>, %arg10: memref<1x8x1024xf32, #tpu.memory_space<vmem>>) attributes {dimension_semantics = [#tpu.dimension_semantics<parallel>], iteration_bounds = array<i64: 2>, scalar_prefetch = 0 : i64, scratch_operands = 0 : i64, tpu.core_type = #tpu.core_type<tc>, window_params = [{transform_indices = @transform_0, window_bounds = array<i64: 1, 64, 256>}, {pipeline_mode = #tpu.pipeline_mode<synchronous>, transform_indices = @transform_1, window_bounds = array<i64: 16, 256>}, {pipeline_mode = #tpu.pipeline_mode<synchronous>, transform_indices = @transform_2, window_bounds = array<i64: 16, 64>}, {pipeline_mode = #tpu.pipeline_mode<synchronous>, transform_indices = @transform_3, window_bounds = array<i64: 16, 1>}, {pipeline_mode = #tpu.pipeline_mode<synchronous>, transform_indices = @transform_4, window_bounds = array<i64: 4, 4, 16>}, {pipeline_mode = #tpu.pipeline_mode<synchronous>, transform_indices = @transform_5, window_bounds = array<i64: 4, 1>}, {pipeline_mode = #tpu.pipeline_mode<synchronous>, transform_indices = @transform_6, window_bounds = array<i64: 8, 4>}, {pipeline_mode = #tpu.pipeline_mode<synchronous>, transform_indices = @transform_7, window_bounds = array<i64: 8, 1>}, {pipeline_mode = #tpu.pipeline_mode<synchronous>, transform_indices = @transform_8, window_bounds = array<i64: 1024, 1024>}, {transform_indices = @transform_9, window_bounds = array<i64: 1, 8, 1024>}]} {
    %c0 = arith.constant 0 : index
    %c0_0 = arith.constant 0 : index
    %c0_1 = arith.constant 0 : index
    %0 = vector.load %arg1[%c0, %c0_0, %c0_1] : memref<1x64x256xf32, #tpu.memory_space<vmem>>, vector<1x64x256xf32>
    %1 = vector.shape_cast %0 : vector<1x64x256xf32> to vector<64x256xf32>
    %c0_2 = arith.constant 0 : index
    %c0_3 = arith.constant 0 : index
    %2 = vector.load %arg3[%c0_2, %c0_3] : memref<16x64xf32, #tpu.memory_space<vmem>>, vector<16x64xf32>
    %cst = arith.constant dense<0.000000e+00> : vector<16x256xf32>
    %3 = tpu.matmul %2, %1, %cst {dimension_numbers = #tpu.dot_dimension_numbers<[1], [0], [0], [1], [0, 0, 1, 1], [], []>} : vector<16x64xf32>, vector<64x256xf32>, vector<16x256xf32> -> vector<16x256xf32>
    %c0_4 = arith.constant 0 : index
    %c0_5 = arith.constant 0 : index
    %4 = vector.load %arg4[%c0_4, %c0_5] : memref<16x1xf32, #tpu.memory_space<vmem>>, vector<16x1xf32>
    %5 = vector.broadcast %4 : vector<16x1xf32> to vector<16x256xf32>
    %6 = arith.addf %3, %5 : vector<16x256xf32>
    %cst_6 = arith.constant 0.000000e+00 : f32
    %7 = vector.broadcast %cst_6 : f32 to vector<16x256xf32>
    %8 = arith.maximumf %6, %7 : vector<16x256xf32>
    %c0_7 = arith.constant 0 : index
    %c0_8 = arith.constant 0 : index
    %9 = vector.load %arg2[%c0_7, %c0_8] : memref<16x256xf32, #tpu.memory_space<vmem>>, vector<16x256xf32>
    %10 = arith.mulf %8, %9 : vector<16x256xf32>
    %c0_9 = arith.constant 0 : index
    %c0_10 = arith.constant 0 : index
    %c0_11 = arith.constant 0 : index
    %11 = vector.load %arg5[%c0_9, %c0_10, %c0_11] : memref<4x4x16xf32, #tpu.memory_space<vmem>>, vector<1x4x16xf32>
    %12 = vector.shape_cast %11 : vector<1x4x16xf32> to vector<4x16xf32>
    %cst_12 = arith.constant dense<0.000000e+00> : vector<4x256xf32>
    %13 = tpu.matmul %12, %10, %cst_12 {dimension_numbers = #tpu.dot_dimension_numbers<[1], [0], [0], [1], [0, 0, 1, 1], [], []>} : vector<4x16xf32>, vector<16x256xf32>, vector<4x256xf32> -> vector<4x256xf32>
    %c0_13 = arith.constant 0 : index
    %c0_14 = arith.constant 0 : index
    %14 = vector.load %arg6[%c0_13, %c0_14] : memref<4x1xf32, #tpu.memory_space<vmem>>, vector<4x1xf32>
    %15 = vector.broadcast %14 : vector<4x1xf32> to vector<4x256xf32>
    %16 = arith.addf %13, %15 : vector<4x256xf32>
    %cst_15 = arith.constant 0.000000e+00 : f32
    %17 = vector.broadcast %cst_15 : f32 to vector<4x256xf32>
    %18 = arith.maximumf %16, %17 : vector<4x256xf32>
    %c1 = arith.constant 1 : index
    %c0_16 = arith.constant 0 : index
    %c0_17 = arith.constant 0 : index
    %19 = vector.load %arg5[%c1, %c0_16, %c0_17] : memref<4x4x16xf32, #tpu.memory_space<vmem>>, vector<1x4x16xf32>
    %20 = vector.shape_cast %19 : vector<1x4x16xf32> to vector<4x16xf32>
    %cst_18 = arith.constant dense<0.000000e+00> : vector<4x256xf32>
    %21 = tpu.matmul %20, %10, %cst_18 {dimension_numbers = #tpu.dot_dimension_numbers<[1], [0], [0], [1], [0, 0, 1, 1], [], []>} : vector<4x16xf32>, vector<16x256xf32>, vector<4x256xf32> -> vector<4x256xf32>
    %c0_19 = arith.constant 0 : index
    %c0_20 = arith.constant 0 : index
    %22 = vector.load %arg6[%c0_19, %c0_20] : memref<4x1xf32, #tpu.memory_space<vmem>>, vector<4x1xf32>
    %23 = vector.broadcast %22 : vector<4x1xf32> to vector<4x256xf32>
    %24 = arith.addf %21, %23 : vector<4x256xf32>
    %cst_21 = arith.constant 0.000000e+00 : f32
    %25 = vector.broadcast %cst_21 : f32 to vector<4x256xf32>
    %26 = arith.maximumf %24, %25 : vector<4x256xf32>
    %c2 = arith.constant 2 : index
    %c0_22 = arith.constant 0 : index
    %c0_23 = arith.constant 0 : index
    %27 = vector.load %arg5[%c2, %c0_22, %c0_23] : memref<4x4x16xf32, #tpu.memory_space<vmem>>, vector<1x4x16xf32>
    %28 = vector.shape_cast %27 : vector<1x4x16xf32> to vector<4x16xf32>
    %cst_24 = arith.constant dense<0.000000e+00> : vector<4x256xf32>
    %29 = tpu.matmul %28, %10, %cst_24 {dimension_numbers = #tpu.dot_dimension_numbers<[1], [0], [0], [1], [0, 0, 1, 1], [], []>} : vector<4x16xf32>, vector<16x256xf32>, vector<4x256xf32> -> vector<4x256xf32>
    %c0_25 = arith.constant 0 : index
    %c0_26 = arith.constant 0 : index
    %30 = vector.load %arg6[%c0_25, %c0_26] : memref<4x1xf32, #tpu.memory_space<vmem>>, vector<4x1xf32>
    %31 = vector.broadcast %30 : vector<4x1xf32> to vector<4x256xf32>
    %32 = arith.addf %29, %31 : vector<4x256xf32>
    %cst_27 = arith.constant 0.000000e+00 : f32
    %33 = vector.broadcast %cst_27 : f32 to vector<4x256xf32>
    %34 = arith.maximumf %32, %33 : vector<4x256xf32>
    %c3 = arith.constant 3 : index
    %c0_28 = arith.constant 0 : index
    %c0_29 = arith.constant 0 : index
    %35 = vector.load %arg5[%c3, %c0_28, %c0_29] : memref<4x4x16xf32, #tpu.memory_space<vmem>>, vector<1x4x16xf32>
    %36 = vector.shape_cast %35 : vector<1x4x16xf32> to vector<4x16xf32>
    %cst_30 = arith.constant dense<0.000000e+00> : vector<4x256xf32>
    %37 = tpu.matmul %36, %10, %cst_30 {dimension_numbers = #tpu.dot_dimension_numbers<[1], [0], [0], [1], [0, 0, 1, 1], [], []>} : vector<4x16xf32>, vector<16x256xf32>, vector<4x256xf32> -> vector<4x256xf32>
    %c0_31 = arith.constant 0 : index
    %c0_32 = arith.constant 0 : index
    %38 = vector.load %arg6[%c0_31, %c0_32] : memref<4x1xf32, #tpu.memory_space<vmem>>, vector<4x1xf32>
    %39 = vector.broadcast %38 : vector<4x1xf32> to vector<4x256xf32>
    %40 = arith.addf %37, %39 : vector<4x256xf32>
    %cst_33 = arith.constant 0.000000e+00 : f32
    %41 = vector.broadcast %cst_33 : f32 to vector<4x256xf32>
    %42 = arith.maximumf %40, %41 : vector<4x256xf32>
    %43 = tpu.concatenate %18, %26, %34, %42 in 1 : vector<4x256xf32>, vector<4x256xf32>, vector<4x256xf32>, vector<4x256xf32> -> vector<4x1024xf32>
    %c0_34 = arith.constant 0 : index
    %c0_35 = arith.constant 0 : index
    %44 = vector.load %arg7[%c0_34, %c0_35] : memref<8x4xf32, #tpu.memory_space<vmem>>, vector<8x4xf32>
    %cst_36 = arith.constant dense<0.000000e+00> : vector<8x1024xf32>
    %45 = tpu.matmul %44, %43, %cst_36 {dimension_numbers = #tpu.dot_dimension_numbers<[1], [0], [0], [1], [0, 0, 1, 1], [], []>} : vector<8x4xf32>, vector<4x1024xf32>, vector<8x1024xf32> -> vector<8x1024xf32>
    %c0_37 = arith.constant 0 : index
    %c0_38 = arith.constant 0 : index
    %46 = vector.load %arg8[%c0_37, %c0_38] : memref<8x1xf32, #tpu.memory_space<vmem>>, vector<8x1xf32>
    %47 = vector.broadcast %46 : vector<8x1xf32> to vector<8x1024xf32>
    %48 = arith.addf %45, %47 : vector<8x1024xf32>
    %cst_39 = arith.constant 0.000000e+00 : f32
    %49 = vector.broadcast %cst_39 : f32 to vector<8x1024xf32>
    %50 = arith.maximumf %48, %49 : vector<8x1024xf32>
    %c0_40 = arith.constant 0 : index
    %c0_41 = arith.constant 0 : index
    %51 = vector.load %arg9[%c0_40, %c0_41] : memref<1024x1024xf32, #tpu.memory_space<vmem>>, vector<1024x1024xf32>
    %cst_42 = arith.constant dense<0.000000e+00> : vector<8x1024xf32>
    %52 = tpu.matmul %50, %51, %cst_42 {dimension_numbers = #tpu.dot_dimension_numbers<[1], [0], [0], [1], [0, 0, 1, 1], [], []>} : vector<8x1024xf32>, vector<1024x1024xf32>, vector<8x1024xf32> -> vector<8x1024xf32>
    %53 = vector.shape_cast %52 : vector<8x1024xf32> to vector<1x8x1024xf32>
    %c0_43 = arith.constant 0 : index
    %c0_44 = arith.constant 0 : index
    %c0_45 = arith.constant 0 : index
    %54 = vector.load %arg10[%c0_43, %c0_44, %c0_45] : memref<1x8x1024xf32, #tpu.memory_space<vmem>>, vector<1x8x1024xf32>
    tpu.vector_store %arg10[%c0_43, %c0_44, %c0_45], %53 {strides = array<i32>} : memref<1x8x1024xf32, #tpu.memory_space<vmem>>, vector<1x8x1024xf32>,
    return
  }
  func.func @transform_0(%arg0: i32) -> (i32, i32, i32) {
    %c0_i32 = arith.constant 0 : i32
    %c0_i32_0 = arith.constant 0 : i32
    %c0_i32_1 = arith.constant 0 : i32
    return %arg0, %c0_i32, %c0_i32_0 : i32, i32, i32
  }
  func.func @transform_1(%arg0: i32) -> (i32, i32) {
    %c0_i32 = arith.constant 0 : i32
    %c0_i32_0 = arith.constant 0 : i32
    %c0_i32_1 = arith.constant 0 : i32
    return %c0_i32, %c0_i32_0 : i32, i32
  }
  func.func @transform_2(%arg0: i32) -> (i32, i32) {
    %c0_i32 = arith.constant 0 : i32
    %c0_i32_0 = arith.constant 0 : i32
    %c0_i32_1 = arith.constant 0 : i32
    return %c0_i32, %c0_i32_0 : i32, i32
  }
  func.func @transform_3(%arg0: i32) -> (i32, i32) {
    %c0_i32 = arith.constant 0 : i32
    %c0_i32_0 = arith.constant 0 : i32
    %c0_i32_1 = arith.constant 0 : i32
    return %c0_i32, %c0_i32_0 : i32, i32
  }
  func.func @transform_4(%arg0: i32) -> (i32, i32, i32) {
    %c0_i32 = arith.constant 0 : i32
    %c0_i32_0 = arith.constant 0 : i32
    %c0_i32_1 = arith.constant 0 : i32
    %c0_i32_2 = arith.constant 0 : i32
    return %c0_i32, %c0_i32_0, %c0_i32_1 : i32, i32, i32
  }
  func.func @transform_5(%arg0: i32) -> (i32, i32) {
    %c0_i32 = arith.constant 0 : i32
    %c0_i32_0 = arith.constant 0 : i32
    %c0_i32_1 = arith.constant 0 : i32
    return %c0_i32, %c0_i32_0 : i32, i32
  }
  func.func @transform_6(%arg0: i32) -> (i32, i32) {
    %c0_i32 = arith.constant 0 : i32
    %c0_i32_0 = arith.constant 0 : i32
    %c0_i32_1 = arith.constant 0 : i32
    return %c0_i32, %c0_i32_0 : i32, i32
  }
  func.func @transform_7(%arg0: i32) -> (i32, i32) {
    %c0_i32 = arith.constant 0 : i32
    %c0_i32_0 = arith.constant 0 : i32
    %c0_i32_1 = arith.constant 0 : i32
    return %c0_i32, %c0_i32_0 : i32, i32
  }
  func.func @transform_8(%arg0: i32) -> (i32, i32) {
    %c0_i32 = arith.constant 0 : i32
    %c0_i32_0 = arith.constant 0 : i32
    %c0_i32_1 = arith.constant 0 : i32
    return %c0_i32, %c0_i32_0 : i32, i32
  }
  func.func @transform_9(%arg0: i32) -> (i32, i32, i32) {
    %c0_i32 = arith.constant 0 : i32
    %c0_i32_0 = arith.constant 0 : i32
    %c0_i32_1 = arith.constant 0 : i32
    return %arg0, %c0_i32, %c0_i32_0 : i32, i32, i32
  }
}

</mosaic_0001>

<bundles_post_ra>
// kernel: tpu_custom_call.1
= control target key start
LH: loop header
LB: loop body
LE: loop exit
PB: predicated region body
PF: predicated region fallthrough
CT: control target
= control target key end

     0   :  { %s5406_s0 = inlined_call_operand.hbm [shape: f32[2,64,256], index: 0, kind: input, shape index: {}]   ;;  %s5407_s1 = inlined_call_operand.hbm [shape: f32[16,256], index: 1, kind: input, shape index: {}]   ;;  %s5408_s2 = inlined_call_operand.hbm [shape: f32[16,64], index: 2, kind: input, shape index: {}]   ;;  %s5409_s3 = inlined_call_operand.vmem [shape: f32[16,1], index: 3, kind: input, shape index: {}]   ;;  %s5410_s4 = inlined_call_operand.hbm [shape: f32[4,4,16], index: 4, kind: input, shape index: {}]   ;;  %s5411_s5 = inlined_call_operand.vmem [shape: f32[4,1], index: 5, kind: input, shape index: {}]   ;;  %s5412_s6 = inlined_call_operand.vmem [shape: f32[8,4], index: 6, kind: input, shape index: {}]   ;;  %s5413_s7 = inlined_call_operand.vmem [shape: f32[8,1], index: 7, kind: input, shape index: {}]   ;;  %s5414_s8 = inlined_call_operand.hbm [shape: f32[1024,1024], index: 8, kind: input, shape index: {}]   ;;  %s5415_s9 = inlined_call_operand.hbm [shape: f32[2,8,1024], index: 9, kind: output, shape index: {}]  }
   0x1   :  { %5424 = sst [smem:[#allocation18_spill]] %s5407_s1 }
   0x2   :  { %14 = vsyncpa [#allocation3], 0 }
   0x3   :  { %16 = vsyncpa [#allocation3 + $0x1], 0 }
   0x4   :  { %17 = vsyncpa [#allocation6], 0 }
   0x5   :  { %18 = vsyncpa [#allocation9], 0 }
   0x6   :  { %19 = vsyncpa [#allocation4], 0 }
   0x7   :  { %21 = vsyncpa [#allocation4 + $0x1], 0  ;;  %s4975_s30 = smov 0   ;;  %s4977_s10 = smov 0  }
   0x8   :  { %s4979_s11 = smov 0   ;;  %s4981_s12 = smov 0  }
   0x9 LB: > { %5425 = sst [smem:[#allocation16_spill]] %s4896_s30  ;;  %s4996_s13 = sadd.s32 4294967295, %s4908_s12   ;;  %s4908_s12 = sphi %s4981_s12, %s5452_s12   ;;  %s4904_s11 = sphi %s4979_s11, %s5451_s11   ;;  %s4900_s10 = sphi %s4977_s10, %s5450_s10   ;;  %s4896_s30 = sphi %s4975_s30, %s5449_s30  }
   0xa   : > { %s3472_s14 = sadd.s32 4294967294, %s4908_s12   ;;  %p47_p0 = scmp.ne.s32.totalorder %s4900_s10, %s4896_s30 }
   0xb   : > { %p5416_p1 = scmp.eq.s32.totalorder %s4996_s13, 0  ;;  %p245_p3 = scmp.eq.s32.totalorder %s3472_s14, 1 }
   0xc   : > { %p3473_p5 = scmp.ge.s32.totalorder %s4908_s12, 1  ;;  %p252_p7 = scmp.lt.s32.totalorder %s4908_s12, 3 }
   0xd   : > { %p5005_p4 = por %p5416_p1, %p47_p0  ;;  %p5010_p6 = por %p245_p3, %p47_p0 }
   0xe   : > { %p5015_p8 = pnand %p3473_p5, %p252_p7  ;;  %s4910_s18 = smov [#allocation5]  }
   0xf   : > { %s5426_s15 = scalar_select %p5005_p4, 1, 0 }
  0x10   : > { %s5427_s16 = scalar_select %p5010_p6, 1, 0 }
  0x11   : > { %s5429_s17 = scalar_select %p5015_p8, 1, 0 }
  0x12   : > { %5428 = sst [smem:[#allocation17_spill]] %s5427_s16  ;;  %s264_s19 = sshll.u32 %s4910_s18, 4  ;;  %s5019_s19 = int_to_ptr.vmem [resolvable:$true] %s264_s19 }
  0x13   : > { %p4614_p9 = pneg %p5015_p8  ;;  %s4911_s21 = smov [#allocation8]  }
  0x14   : > { %s293_s22 = sshll.u32 %s4911_s21, 4  ;;  %s5431_s1 = sld [smem:[#allocation18_spill]]  ;;  %s5030_s22 = int_to_ptr.vmem [resolvable:$true] %s293_s22 }
  0x15   : > { %p5026_p11 = pnand %p4614_p9, %p5416_p1 }
  0x17   : > { %p5040_p13 = pneg %p5026_p11 }
  0x1a   : > { %s4692_s25 = scalar_lea.hbm %s5431_s1, 512 }
  0x1b   : > { %p4693_p12 = scmp.ne.s32.totalorder %s5431_s1, %s4692_s25  ;;  %p4699_p5 = scmp.lt.u32.totalorder %s4692_s25, %s5431_s1 }
  0x1d   : > { %p4695_p0 = pnand %p5040_p13, %p4693_p12 }
  0x1f   : > { %p4696_p3 = pneg %p4695_p0 }
  0x21   : > { %p4701_p7 = pnand %p4699_p5, %p4696_p3 }
  0x23   : > { %4704 = shalt.err (!%p4701_p7)
}
  0x24   : > { %s4705_s18 = scalar_lea.vmem %s5019_s19, 512  ;;  %p4713_p2 = scmp.lt.s32.totalorder %s5019_s19, %s5019_s19 }
  0x25   : > { %p4706_p9 = scmp.ne.s32.totalorder %s5019_s19, %s4705_s18  ;;  %p4714_p6 = scmp.lt.s32.totalorder %s4705_s18, %s4705_s18 }
  0x27   : > { %p4708_p10 = pnand %p4706_p9, %p5040_p13  ;;  %p4715_p12 = por %p4714_p6, %p4713_p2 }
  0x29   : > { %p4709_p1 = pneg %p4708_p10 }
  0x2b   : > { %p4716_p0 = pnand %p4715_p12, %p4709_p1 }
  0x2d   : > { %4719 = shalt.err (!%p4716_p0)
}
  0x2e   : > { %s5419_s21 = smov 256   ;;  %s5420_s23 = smov 16  }
  0x2f   : > { %4617 = dma.hbm_to_vmem [thread:$0]  (!%p5026_p11), %s5431_s1, 512, %s5019_s19, [#allocation6], %s5419_s21, %s5419_s21, %s5420_s23  }
  0x30   : > { %s4720_s29 = scalar_lea.hbm %s5410_s4, 256 }
  0x31   : > { %p4721_p1 = scmp.ne.s32.totalorder %s5410_s4, %s4720_s29  ;;  %p4727_p10 = scmp.lt.u32.totalorder %s4720_s29, %s5410_s4 }
  0x33   : > { %p4723_p2 = pnand %p4721_p1, %p5040_p13 }
  0x35   : > { %p4724_p6 = pneg %p4723_p2 }
  0x37   : > { %p4729_p3 = pnand %p4727_p10, %p4724_p6 }
  0x39   : > { %4732 = shalt.err (!%p4729_p3)
}
  0x3a   : > { %s4733_s19 = scalar_lea.vmem %s5030_s22, 256  ;;  %p4741_p12 = scmp.lt.s32.totalorder %s5030_s22, %s5030_s22 }
  0x3b   : > { %p4734_p5 = scmp.ne.s32.totalorder %s5030_s22, %s4733_s19  ;;  %p4742_p0 = scmp.lt.s32.totalorder %s4733_s19, %s4733_s19 }
  0x3d   : > { %p4736_p7 = pnand %p4734_p5, %p5040_p13  ;;  %p4743_p1 = por %p4742_p0, %p4741_p12 }
  0x3f   : > { %p4737_p9 = pneg %p4736_p7 }
  0x41   : > { %p4744_p2 = pnand %p4743_p1, %p4737_p9 }
  0x43   : > { %4747 = shalt.err (!%p4744_p2)
}
  0x44   : > { %s5423_s24 = smov 64   ;;  %s4915_s30 = smov 4  }
  0x45   : > { %4623 = dma.hbm_to_vmem [thread:$0]  (!%p5026_p11), %s5410_s4, 256, %s5030_s22, [#allocation9], %s5423_s24, %s5423_s24, %s4915_s30  }
  0x46   : > { %s4916_s26 = smov [#allocation7]   ;;  %s4748_s18 = scalar_lea.hbm %s5408_s2, 256 }
  0x47   : > { %s277_s27 = sshll.u32 %s4916_s26, 4  ;;  %p4749_p6 = scmp.ne.s32.totalorder %s5408_s2, %s4748_s18  ;;  %s278_s27 = int_to_ptr.vmem [resolvable:$true] %s277_s27 }
  0x48   : > { %p4755_p5 = scmp.lt.u32.totalorder %s4748_s18, %s5408_s2 }
  0x49   : > { %p4751_p10 = pnand %p4749_p6, %p5040_p13 }
  0x4b   : > { %p4752_p3 = pneg %p4751_p10 }
  0x4d   : > { %p4757_p7 = pnand %p4755_p5, %p4752_p3 }
  0x4f   : > { %4760 = shalt.err (!%p4757_p7)
}
  0x50   : > { %s4761_s22 = scalar_lea.vmem %s278_s27, 256  ;;  %p4769_p1 = scmp.lt.s32.totalorder %s278_s27, %s278_s27 }
  0x51   : > { %p4762_p9 = scmp.ne.s32.totalorder %s278_s27, %s4761_s22  ;;  %p4770_p2 = scmp.lt.s32.totalorder %s4761_s22, %s4761_s22 }
  0x53   : > { %p4764_p12 = pnand %p4762_p9, %p5040_p13  ;;  %p4771_p4 = por %p4770_p2, %p4769_p1 }
  0x55   : > { %p4765_p0 = pneg %p4764_p12 }
  0x57   : > { %p4772_p8 = pnand %p4771_p4, %p4765_p0 }
  0x59   : > { %4775 = shalt.err (!%p4772_p8)
}
  0x5a   : > { %s4917_s21 = smov 128   ;;  %s4918_s30 = smov 8  }
  0x5b   : > { %4620 = dma.hbm_to_vmem [thread:$0]  (!%p5026_p11), %s5408_s2, 256, %s278_s27, [#allocation6], %s4917_s21, %s4917_s21, %s4918_s30  }
  0x5c   : > { %s4919_s16 = smov [#allocation10]   ;;  %s4776_s14 = scalar_lea.hbm %s5414_s8, 131072 }
  0x5d   : > { %s315_s25 = sshll.u32 %s4919_s16, 4  ;;  %p4777_p4 = scmp.ne.s32.totalorder %s5414_s8, %s4776_s14  ;;  %s316_s25 = int_to_ptr.vmem [resolvable:$true] %s315_s25 }
  0x5e   : > { %p4783_p10 = scmp.lt.u32.totalorder %s4776_s14, %s5414_s8 }
  0x5f   : > { %p4779_p8 = pnand %p4777_p4, %p5040_p13 }
  0x61   : > { %p4780_p6 = pneg %p4779_p8 }
  0x63   : > { %p4785_p3 = pnand %p4783_p10, %p4780_p6 }
  0x65   : > { %4788 = shalt.err (!%p4785_p3)
}
  0x66   : > { %s4789_s27 = scalar_lea.vmem %s316_s25, 131072  ;;  %p4797_p12 = scmp.lt.s32.totalorder %s316_s25, %s316_s25 }
  0x67   : > { %p4790_p5 = scmp.ne.s32.totalorder %s316_s25, %s4789_s27  ;;  %p4798_p0 = scmp.lt.s32.totalorder %s4789_s27, %s4789_s27 }
  0x69   : > { %p4792_p7 = pnand %p4790_p5, %p5040_p13  ;;  %p4799_p1 = por %p4798_p0, %p4797_p12 }
  0x6b   : > { %p4793_p9 = pneg %p4792_p7 }
  0x6d   : > { %p4800_p2 = pnand %p4799_p1, %p4793_p9 }
  0x6f   : > { %4803 = shalt.err (!%p4800_p2)
}
  0x70   : > { %s4920_s21 = smov 1024   ;;  %s5433_s30 = smov 64  }
  0x71   : > { %4626 = dma.hbm_to_vmem [thread:$0]  (!%p5026_p11), %s5414_s8, 131072, %s316_s25, [#allocation9], %s4920_s21, %s4920_s21, %s5433_s30  }
  0x72   : > { %s5127_s28 = sadd.s32 1, %s4908_s12   ;;  %s34_s23 = sadd.s32 1, %s4904_s11 }
  0x73   : > { %s31_s20 = ssub.s32 %s4908_s12, %s5127_s28  ;;  %p41_p4 = scmp.ne.s32.totalorder %s4904_s11, %s4900_s10 }
  0x74   : > { %p32_p13 = scmp.eq.s32.totalorder %s31_s20, 0  ;;  %p42_p8 = scmp.eq.s32.totalorder %s4908_s12, 0 }
  0x75   : > { %p4639_p6 = scmp.lt.s32.totalorder %s4908_s12, 2  ;;  %p5434_p3 = scmp.eq.s32.totalorder %s4996_s13, 1 }
  0x76   : > { %s5137_s16 = scalar_select %p32_p13, %s4904_s11, %s34_s23  }
  0x77   : > { %p43_p10 = por %p42_p8, %p41_p4  ;;  %p5141_p5 = por %p5434_p3, %p41_p4 }
  0x78   : > { %s329_s29 = sand.u32 1, %s4904_s11   ;;  %s3512_s14 = sshll.u32 %s4908_s12, 11 }
  0x79   : > { %s3479_s25 = sshll.u32 %s329_s29, 7  ;;  %s5150_s22 = scalar_lea.hbm %s5406_s0, %s3512_s14 }
  0x7a   : > { %s333_s27 = scalar_lea.vmem [#allocation2], %s3479_s25  ;;  %p5152_p11 = pnand %p4639_p6, %p43_p10 }
  0x7b   : > { %s340_s21 = sshll.u32 %s333_s27, 4  ;;  %s5158_s1 = scalar_lea.sflag [#allocation3], %s329_s29  ;;  %s5156_s21 = int_to_ptr.vmem [resolvable:$true] %s340_s21 }
  0x7c   : > { %s4804_s24 = scalar_lea.hbm %s5150_s22, 2048  ;;  %p4806_p9 = pneg %p5152_p11 }
  0x7d   : > { %p4805_p7 = scmp.ne.s32.totalorder %s5150_s22, %s4804_s24  ;;  %s4809_s14 = scalar_lea.hbm %s5406_s0, 4096 }
  0x7e   : > { %p4810_p1 = scmp.lt.u32.totalorder %s5150_s22, %s5406_s0  ;;  %p4811_p2 = scmp.lt.u32.totalorder %s4809_s14, %s4804_s24 }
  0x7f   : > { %p4807_p12 = pnand %p4806_p9, %p4805_p7  ;;  %p4813_p4 = scmp.lt.u32.totalorder %s4804_s24, %s5150_s22 }
  0x80   : > { %p4812_p13 = por %p4811_p2, %p4810_p1 }
  0x81   : > { %p4808_p0 = pneg %p4807_p12 }
  0x82   : > { %p4814_p8 = por %p4813_p4, %p4812_p13 }
  0x84   : > { %p4815_p6 = pnand %p4814_p8, %p4808_p0 }
  0x86   : > { %4818 = shalt.err (!%p4815_p6)
}
  0x87   : > { %s4819_s29 = scalar_lea.vmem %s5156_s21, 2048  ;;  %s4921_s19 = smov [#allocation2]  }
  0x88   : > { %p4820_p10 = scmp.ne.s32.totalorder %s5156_s21, %s4819_s29  ;;  %s4824_s27 = sshll.u32 %s4921_s19, 4  ;;  %s4825_s27 = int_to_ptr.vmem [resolvable:$false] %s4824_s27 }
  0x89   : > { %s4826_s20 = scalar_lea.vmem %s4825_s27, 4096  ;;  %p4827_p12 = scmp.lt.s32.totalorder %s5156_s21, %s4825_s27 }
  0x8a   : > { %p4822_p3 = pnand %p4820_p10, %p4806_p9  ;;  %p4828_p1 = scmp.lt.s32.totalorder %s4826_s20, %s4819_s29 }
  0x8c   : > { %p4823_p7 = pneg %p4822_p3  ;;  %p4829_p2 = por %p4828_p1, %p4827_p12 }
  0x8e   : > { %p4830_p13 = pnand %p4829_p2, %p4823_p7 }
  0x90   : > { %4833 = shalt.err (!%p4830_p13)
}
  0x91   : > { %s5437_s24 = smov 16   ;;  %s5438_s23 = smov 256  }
  0x92   : > { %4630 = dma.hbm_to_vmem [thread:$0]  (!%p5152_p11), %s5150_s22, 2048, %s5156_s21, %s5158_s1, %s5438_s23, %s5438_s23, %s5437_s24  }
  0x93   : > { %p5439_p9 = scmp.ne.s32.totalorder %s5429_s17, 0 }
  0x94   : > { %s5192_s14 = sand.u32 (!%p5439_p9), 1, %s4900_s10   ;;  %p5440_p0 = scmp.ne.s32.totalorder (!%p5439_p9), %s5426_s15, 0 }
  0x95   : > { %352 = sbr.rel (%p5439_p9) target bundleno = 1525 (0x5f5), region = 56  ;;  %s3483_s25 = sshll.u32 (!%p5439_p9), %s5192_s14, 7 }
  0x96   : > { %s355_s18 = scalar_lea.sflag (!%p5439_p9), [#allocation3], %s5192_s14  ;;  %s5196_s29 = scalar_lea.vmem (!%p5439_p9), [#allocation2], %s3483_s25 }
  0x9c   : > { %4879 = dma.done.wait (%p5440_p0), %s355_s18, 2048  }
  0x9d   : > { %4881 = vsyncadd (%p5440_p0), %s355_s18, 4294965248  ;;  %p5441_p11 = scmp.eq.s32.totalorder %s4996_s13, 0 }
  0x9f   : > { %4883 = dma.done.wait (%p5441_p11), [#allocation6], 768   ;;  %p5442_p4 = pmov %p5441_p11 }
  0xa1   : > { %4885 = vsyncadd (%p5442_p4), [#allocation6], 4294966528  ;;  %p5443_p8 = pmov %p5442_p4 }
  0xa2   : > { %p5444_p6 = pmov %p5442_p4 }
  0xa3   : > { %4887 = dma.done.wait (%p5443_p8), [#allocation9], 131328  }
  0xa4   : > { %4889 = vsyncadd (%p5444_p6), [#allocation9], 4294835968  ;;  %v4922_v0 = vmov 0.0   ;;  %v4923_v1 = vmov 0   ;;  %v410_v2 = vld [vmem:[%s5196_s29 + $0x8] sm:$0xff]  ;;  %v412_v3 = vld [vmem:[%s5196_s29 + $0x18] sm:$0xff] }
  0xa5   : > { %510 = vmatprep.mubr.f32.mxu0 %v4922_v0  ;;  %4690 = vset.pattern.permute.xlu0 %v4923_v1  ;;  %v409_v4 = vld [vmem:[%s5196_s29] sm:$0xff]  ;;  %v3514_v5 = vpack.c.bf16 %v412_v3, %v410_v2  ;;  %v411_v6 = vld [vmem:[%s5196_s29 + $0x10] sm:$0xff]  ;;  %v414_v7 = vld [vmem:[%s5196_s29 + $0x28] sm:$0xff]  ;;  %vm439_vm0 = vcmask 523264   ;;  %vm542_vm1 = vcmask 130048   ;;  %vm864_vm2 = vcmask 1043456  }
  0xa6   : > { %610 = vmatprep.mubr.f32.mxu1 %v4922_v0  ;;  %4691 = vset.pattern.permute.xlu1 %v4923_v1  ;;  %v416_v8 = vld [vmem:[%s5196_s29 + $0x38] sm:$0xff]  ;;  %v3516_v9 = vpack.c.bf16 %v411_v6, %v409_v4  ;;  %v413_v11 = vld [vmem:[%s5196_s29 + $0x20] sm:$0xff]  ;;  %v415_v12 = vld [vmem:[%s5196_s29 + $0x30] sm:$0xff]  ;;  %vm860_vm3 = vcmask 31744   ;;  %s3488_s23 = sshll.u32 %s5192_s14, 6  ;;  %s3513_s18 = sshll.u32 %s4996_s13, 10 }
  0xa7   : > { %v3518_v10 = vpack.c.bf16 %v416_v8, %v414_v7  ;;  %v418_v13 = vld [vmem:[%s5196_s29 + $0x48] sm:$0xff]  ;;  %3515 = vmatprep.subr.bf16.mxu0 %v3514_v5  ;;  %v420_v14 = vld [vmem:[%s5196_s29 + $0x58] sm:$0xff]  ;;  %v3520_v15 = vpack.c.bf16 %v415_v12, %v413_v11  ;;  %v417_v17 = vld [vmem:[%s5196_s29 + $0x40] sm:$0xff]  ;;  %s5345_s25 = scalar_lea.vmem [#allocation11], %s3488_s23  ;;  %s5359_s22 = scalar_lea.hbm %s5415_s9, %s3513_s18 }
  0xa8   : > { %3517 = vmatpush1.bf16.msra.mxu0 %v3516_v9  ;;  %v3522_v16 = vpack.c.bf16 %v420_v14, %v418_v13  ;;  %v419_v18 = vld [vmem:[%s5196_s29 + $0x50] sm:$0xff]  ;;  %v422_v19 = vld [vmem:[%s5196_s29 + $0x68] sm:$0xff]  ;;  %v424_v20 = vld [vmem:[%s5196_s29 + $0x78] sm:$0xff]  ;;  %s3350_s13 = scalar_lea.sflag [#allocation4], %s5192_s14  ;;  %s4924_s30 = smov [#allocation11]  }
  0xa9   : > { %3519 = vmatprep.subr.bf16.mxu0 %v3518_v10  ;;  %v427_v21 = vld [vmem:[%s5409_s3] sm:$0xff]  ;;  %v3524_v22 = vpack.c.bf16 %v419_v18, %v417_v17  ;;  %v428_v23 = vld [vmem:[%s5409_s3 + $0x8] sm:$0xff]  ;;  %v3526_v24 = vpack.c.bf16 %v424_v20, %v422_v19  ;;  %v423_v26 = vld [vmem:[%s5196_s29 + $0x70] sm:$0xff]  ;;  %s4838_s1 = sshll.u32 %s4924_s30, 4  ;;  %s4839_s1 = int_to_ptr.vmem [resolvable:$false] %s4838_s1 }
  0xaa   : > { %431 = vperm.xlu0 %4690, %v427_v21   ;;  %v421_v25 = vld [vmem:[%s5196_s29 + $0x60] sm:$0xff]  ;;  %v426_v29 = vld [vmem:[#allocation7 + $0x8] sm:$0xff]  ;;  %v529_v44 = vld [vmem:[#allocation5 + $0x10] sm:$0xff]  ;;  %s3364_s29 = sshll.u32 %s5345_s25, 4  ;;  %s4840_s19 = scalar_lea.vmem %s4839_s1, 2048  ;;  %s5361_s29 = int_to_ptr.vmem [resolvable:$true] %s3364_s29 }
  0xab   : > { %v3528_v27 = vpack.c.bf16 %v423_v26, %v421_v25  ;;  %v425_v28 = vld [vmem:[#allocation7] sm:$0xff]  ;;  %v528_v46 = vld [vmem:[#allocation5 + $0x8] sm:$0xff]  ;;  %v530_v48 = vld [vmem:[#allocation5 + $0x18] sm:$0xff]  ;;  %s4834_s21 = scalar_lea.vmem %s5361_s29, 1024  ;;  %p4841_p12 = scmp.lt.s32.totalorder %s5361_s29, %s4839_s1 }
  0xac   : > { %3521 = vmatpush1.bf16.msra.mxu0 %v3520_v15  ;;  %v536_v30 = vld [vmem:[%s5411_s5] sm:$0xf]  ;;  %v535_v56 = vld [vmem:[#allocation8] sm:$0xf]  ;;  %v620_v57 = vld [vmem:[#allocation8 + $0x4] sm:$0xf]  ;;  %p4835_p10 = scmp.ne.s32.totalorder %s5361_s29, %s4834_s21  ;;  %p4842_p1 = scmp.lt.s32.totalorder %s4840_s19, %s4834_s21 }
  0xad   : > { %3523 = vmatprep.subr.bf16.mxu0 %v3522_v16  ;;  %539 = vperm.xlu1 %4691, %v536_v30   ;;  %v854_v31 = vld [vmem:[%s5413_s7] sm:$0xff]  ;;  %v698_v58 = vld [vmem:[#allocation8 + $0x8] sm:$0xf]  ;;  %v776_v59 = vld [vmem:[#allocation8 + $0xc] sm:$0xf] }
  0xae   : > { %436 = vperm.xlu0 %4690, %v428_v23   ;;  %v527_v42 = vld [vmem:[#allocation5] sm:$0xff]  ;;  %v1182_v14 = vld [vmem:[#allocation10 + $0x8] sm:$0xff]  ;;  %v1183_v30 = vld [vmem:[#allocation10 + $0x10] sm:$0xff]  ;;  %p4836_p3 = pnand %p4835_p10, %p5141_p5  ;;  %p4843_p2 = por %p4842_p1, %p4841_p12 }
  0xaf   : > { %v5253_v7 = vld [vmem:[%s5412_s6] sm:$0xff]  ;;  %v1190_v15 = vld [vmem:[#allocation10 + $0x48] sm:$0xff] }
  0xb0   : > { %3525 = vmatpush1.bf16.msra.mxu0 %v3524_v22  ;;  %v1181_v17 = vld [vmem:[#allocation10] sm:$0xff]  ;;  %v1198_v19 = vld [vmem:[#allocation10 + $0x88] sm:$0xff]  ;;  %v3546_v23 = vpack.c.bf16 %v1190_v15, %v1182_v14  ;;  %p4837_p7 = pneg %p4836_p3 }
  0xb1   : > { %3527 = vmatprep.subr.bf16.mxu0 %v3526_v24  ;;  %857 = vperm.xlu1 %4691, %v854_v31   ;;  %v1189_v18 = vld [vmem:[#allocation10 + $0x40] sm:$0xff]  ;;  %v1206_v20 = vld [vmem:[#allocation10 + $0xc8] sm:$0xff]  ;;  %v1184_v24 = vld [vmem:[#allocation10 + $0x18] sm:$0xff] }
  0xb2   : > { %v1191_v31 = vld [vmem:[#allocation10 + $0x50] sm:$0xff]  ;;  %v1270_v14 = vld [vmem:[#allocation10 + $0x2c8] sm:$0xff]  ;;  %p4844_p13 = pnand %p4843_p2, %p4837_p7 }
  0xb4   : > { %3529 = vmatpush1.bf16.msra.mxu0 %v3528_v27 }
  0xb7   : > { %3489 = vmatmul.mubr.msk.f32.vlgmr.msra.gmra.mrb[0].mxu0 %vm439_vm0, %v425_v28  ;;  %v1192_v28 = vld [vmem:[#allocation10 + $0x58] sm:$0xff] }
  0xb8   : > { %516 = vmatprep.mubr.f32.mxu0 %v4922_v0 }
  0xbb   : > { %3490 = vmatmul.mubr.msk.f32.gmra.mrb[2].mxu0 %vm439_vm0, %v426_v29  ;;  %v3548_v29 = vpack.c.bf16 %v1189_v18, %v1181_v17  ;;  %v1247_v17 = vld [vmem:[#allocation10 + $0x210] sm:$0xff] }
  0xbc   : > { %1024 = vmatprep.mubr.f32.mxu0 %v4922_v0  ;;  %v1255_v18 = vld [vmem:[#allocation10 + $0x250] sm:$0xff] }
 0x129   : > { %v432_v32 = vpop.permute.xlu0 %431 }
 0x12c   : > { %v540_v60 = vpop.permute.xlu1 %539 }
 0x12d   : > { %v437_v37 = vpop.permute.xlu0 %436 }
 0x18a   : > { %v512_v33 = vpop.f32.mrb[0].mxu0 }
 0x18b   : > { %v513_v34 = vadd.f32 %v512_v33, %v432_v32  ;;  %v514_v35 = vpop.f32.mrb[1].mxu0  ;;  %v3550_v33 = vpack.c.bf16 %v1206_v20, %v1198_v19 }
 0x18c   : > { %v515_v36 = vadd.f32 %v514_v35, %v432_v32  ;;  %v1197_v35 = vld [vmem:[#allocation10 + $0x80] sm:$0xff] }
 0x18d   : > { %v523_v39 = vmax.f32 %v513_v34, 0.0  ;;  %v1200_v34 = vld [vmem:[#allocation10 + $0x98] sm:$0xff] }
 0x18e   : > { %v518_v38 = vpop.f32.mrb[2].mxu0  ;;  %v524_v43 = vmax.f32 %v515_v36, 0.0  ;;  %v1205_v36 = vld [vmem:[#allocation10 + $0xc0] sm:$0xff] }
 0x18f   : > { %v519_v40 = vadd.f32 %v518_v38, %v437_v37  ;;  %v520_v41 = vpop.f32.mrb[3].mxu0  ;;  %v531_v50 = vmul.f32 %v527_v42, %v523_v39  ;;  %v1214_v38 = vld [vmem:[#allocation10 + $0x108] sm:$0xff]  ;;  %v3804_v42 = vpack.c.bf16 %v1191_v31, %v1183_v30  ;;  %v1271_v30 = vld [vmem:[#allocation10 + $0x2d0] sm:$0xff] }
 0x190   : > { %v521_v45 = vadd.f32 %v520_v41, %v437_v37  ;;  %v532_v52 = vmul.f32 %v528_v46, %v524_v43  ;;  %v1208_v37 = vld [vmem:[#allocation10 + $0xd8] sm:$0xff]  ;;  %v1222_v39 = vld [vmem:[#allocation10 + $0x148] sm:$0xff]  ;;  %v3552_v43 = vpack.c.bf16 %v1205_v36, %v1197_v35  ;;  %v1285_v35 = vld [vmem:[#allocation10 + $0x340] sm:$0xff] }
 0x191   : > { %v525_v47 = vmax.f32 %v519_v40, 0.0  ;;  %v3806_v46 = vpack.c.bf16 %v1208_v37, %v1200_v34  ;;  %v1277_v34 = vld [vmem:[#allocation10 + $0x300] sm:$0xff]  ;;  %v1288_v36 = vld [vmem:[#allocation10 + $0x358] sm:$0xff]  ;;  %v1294_v37 = vld [vmem:[#allocation10 + $0x388] sm:$0xff] }
 0x192   : > { %v526_v49 = vmax.f32 %v521_v45, 0.0  ;;  %v1207_v45 = vld [vmem:[#allocation10 + $0xd0] sm:$0xff] }
 0x193   : > { %v533_v51 = vmul.f32 %v529_v44, %v525_v47  ;;  %v1199_v44 = vld [vmem:[#allocation10 + $0x90] sm:$0xff]  ;;  %v3554_v47 = vpack.c.bf16 %v1222_v39, %v1214_v38  ;;  %v1302_v38 = vld [vmem:[#allocation10 + $0x3c8] sm:$0xff] }
 0x194   : > { %v534_v53 = vmul.f32 %v530_v48, %v526_v49  ;;  %v1216_v48 = vld [vmem:[#allocation10 + $0x118] sm:$0xff]  ;;  %v1213_v49 = vld [vmem:[#allocation10 + $0x100] sm:$0xff] }
 0x195   : > { %v3532_v54 = vpack.c.bf16 %v533_v51, %v531_v50  ;;  %v1221_v50 = vld [vmem:[#allocation10 + $0x140] sm:$0xff]  ;;  %v1224_v51 = vld [vmem:[#allocation10 + $0x158] sm:$0xff] }
 0x196   : > { %v3530_v55 = vpack.c.bf16 %v534_v53, %v532_v52  ;;  %v1230_v52 = vld [vmem:[#allocation10 + $0x188] sm:$0xff] }
 0x197   : > { %v1238_v53 = vld [vmem:[#allocation10 + $0x1c8] sm:$0xff] }
 0x198   : > { %3531 = vmatprep.subr.bf16.mxu1 %v3530_v55 }
 0x199   : > { %3533 = vmatpush1.bf16.msra.mxu1 %v3532_v54 }
 0x19a   : > { %3535 = vmatprep.subr.bf16.mxu1 %v3530_v55 }
 0x19c   : > { %3491 = vmatmul.mubr.msk.f32.vlgmr.msra.gmra.mrb[0].mxu1 %vm542_vm1, %v535_v56  ;;  %v1215_v56 = vld [vmem:[#allocation10 + $0x110] sm:$0xff] }
 0x19d   : > { %3537 = vmatpush1.bf16.msra.mxu1 %v3532_v54  ;;  %688 = vmatprep.mubr.f32.mxu1 %v4922_v0 }
 0x19e   : > { %3539 = vmatprep.subr.bf16.mxu1 %v3530_v55 }
 0x1a0   : > { %3492 = vmatmul.mubr.msk.f32.vlgmr.msra.gmra.mrb[2].mxu1 %vm542_vm1, %v620_v57  ;;  %v1223_v57 = vld [vmem:[#allocation10 + $0x150] sm:$0xff] }
 0x1a1   : > { %3541 = vmatpush1.bf16.msra.mxu1 %v3532_v54  ;;  %766 = vmatprep.mubr.f32.mxu1 %v4922_v0 }
 0x1a2   : > { %3543 = vmatprep.subr.bf16.mxu1 %v3530_v55  ;;  %v3556_v55 = vpack.c.bf16 %v1221_v50, %v1213_v49  ;;  %v1318_v49 = vld [vmem:[#allocation10 + $0x448] sm:$0xff] }
 0x1a4   : > { %3493 = vmatmul.mubr.msk.f32.vlgmr.msra.gmra.mrb[4].mxu1 %vm542_vm1, %v698_v58  ;;  %v3810_v58 = vpack.c.bf16 %v1224_v51, %v1216_v48  ;;  %v1310_v48 = vld [vmem:[#allocation10 + $0x408] sm:$0xff] }
 0x1a5   : > { %3545 = vmatpush1.bf16.msra.mxu1 %v3532_v54  ;;  %844 = vmatprep.mubr.f32.mxu1 %v4922_v0  ;;  %v3808_v54 = vpack.c.bf16 %v1207_v45, %v1199_v44  ;;  %v1296_v44 = vld [vmem:[#allocation10 + $0x398] sm:$0xff]  ;;  %v1293_v45 = vld [vmem:[#allocation10 + $0x380] sm:$0xff] }
 0x1a8   : > { %3494 = vmatmul.mubr.msk.f32.vlgmr.msra.gmra.mrb[6].mxu1 %vm542_vm1, %v776_v59  ;;  %v3558_v59 = vpack.c.bf16 %v1238_v53, %v1230_v52  ;;  %v1295_v52 = vld [vmem:[#allocation10 + $0x390] sm:$0xff] }
 0x1a9   : > { %953 = vmatprep.mubr.f32.mxu1 %v4922_v0  ;;  %v1303_v53 = vld [vmem:[#allocation10 + $0x3d0] sm:$0xff] }
 0x26f   : > { %v612_v61 = vpop.f32.mrb[0].mxu1 }
 0x270   : > { %v613_v62 = vadd.f32 %v612_v61, %v540_v60  ;;  %v614_v63 = vpop.f32.mrb[1].mxu1  ;;  %v1229_v61 = vld [vmem:[#allocation10 + $0x180] sm:$0xff] }
 0x271   : > { %v615_v1 = vadd.f32 %v614_v63, %v540_v60  ;;  %v1240_v63 = vld [vmem:[#allocation10 + $0x1d8] sm:$0xff] }
 0x272   : > { %v617_v4 = vmax.f32 %v613_v62, 0.0  ;;  %v1237_v62 = vld [vmem:[#allocation10 + $0x1c0] sm:$0xff] }
 0x273   : > { %v618_v2 = vmax.f32 %v615_v1, 0.0  ;;  %v690_v3 = vpop.f32.mrb[2].mxu1  ;;  %v1246_v1 = vld [vmem:[#allocation10 + $0x208] sm:$0xff] }
 0x274   : > { %v691_v5 = vadd.f32 %v690_v3, %v540_v60  ;;  %v692_v6 = vpop.f32.mrb[3].mxu1  ;;  %v3812_v3 = vpack.c.bf16 %v1223_v57, %v1215_v56  ;;  %v1312_v56 = vld [vmem:[#allocation10 + $0x418] sm:$0xff]  ;;  %v1309_v57 = vld [vmem:[#allocation10 + $0x400] sm:$0xff] }
 0x275   : > { %v693_v8 = vadd.f32 %v692_v6, %v540_v60  ;;  %3495 = vmatprep.subr.msk.mxu1 %vm864_vm2, %v618_v2  ;;  %v1254_v2 = vld [vmem:[#allocation10 + $0x248] sm:$0xff]  ;;  %v1239_v6 = vld [vmem:[#allocation10 + $0x1d0] sm:$0xff] }
 0x276   : > { %3496 = vmatpush1.msk.msra.mxu1 %vm864_vm2, %v617_v4  ;;  %v695_v11 = vmax.f32 %v691_v5, 0.0  ;;  %v3560_v4 = vpack.c.bf16 %v1237_v62, %v1229_v61  ;;  %v1231_v5 = vld [vmem:[#allocation10 + $0x190] sm:$0xff]  ;;  %v1334_v61 = vld [vmem:[#allocation10 + $0x4c8] sm:$0xff]  ;;  %v3832_v62 = vpack.c.bf16 %v1303_v53, %v1295_v52  ;;  %v1392_v52 = vld [vmem:[#allocation10 + $0x698] sm:$0xff] }
 0x277   : > { %v696_v9 = vmax.f32 %v693_v8, 0.0  ;;  %v768_v10 = vpop.f32.mrb[4].mxu1  ;;  %3497 = vmatmul.mubr.msk.f32.vlgmr.msra.gmra.mrb[8].mxu1 %vm860_vm3, %v5253_v7  ;;  %v3562_v8 = vpack.c.bf16 %v1254_v2, %v1246_v1  ;;  %v3816_v15 = vpack.c.bf16 %v1239_v6, %v1231_v5  ;;  %v1311_v1 = vld [vmem:[#allocation10 + $0x410] sm:$0xff]  ;;  %v1328_v5 = vld [vmem:[#allocation10 + $0x498] sm:$0xff]  ;;  %v1325_v6 = vld [vmem:[#allocation10 + $0x480] sm:$0xff] }
 0x278   : > { %v769_v12 = vadd.f32 %v768_v10, %v540_v60  ;;  %v770_v13 = vpop.f32.mrb[5].mxu1  ;;  %1095 = vmatprep.mubr.f32.mxu1 %v4922_v0  ;;  %v1245_v10 = vld [vmem:[#allocation10 + $0x200] sm:$0xff]  ;;  %v1319_v2 = vld [vmem:[#allocation10 + $0x450] sm:$0xff] }
 0x279   : > { %v771_v16 = vadd.f32 %v770_v13, %v540_v60  ;;  %3498 = vmatprep.subr.msk.mxu0 %vm864_vm2, %v696_v9  ;;  %v1248_v9 = vld [vmem:[#allocation10 + $0x218] sm:$0xff]  ;;  %v1262_v13 = vld [vmem:[#allocation10 + $0x288] sm:$0xff]  ;;  %v1389_v53 = vld [vmem:[#allocation10 + $0x680] sm:$0xff] }
 0x27a   : > { %3499 = vmatpush1.msk.msra.mxu0 %vm864_vm2, %v695_v11  ;;  %v773_v25 = vmax.f32 %v769_v12, 0.0  ;;  %v1253_v11 = vld [vmem:[#allocation10 + $0x240] sm:$0xff]  ;;  %v1256_v12 = vld [vmem:[#allocation10 + $0x258] sm:$0xff]  ;;  %v3566_v20 = vpack.c.bf16 %v1270_v14, %v1262_v13  ;;  %v1327_v13 = vld [vmem:[#allocation10 + $0x490] sm:$0xff] }
 0x27b   : > { %v774_v21 = vmax.f32 %v771_v16, 0.0  ;;  %v846_v22 = vpop.f32.mrb[6].mxu1  ;;  %3500 = vmatmul.mubr.msk.f32.vlgmr.msra.gmra.mrb[4].mxu0 %vm860_vm3, %v5253_v7  ;;  %v3564_v16 = vpack.c.bf16 %v1253_v11, %v1245_v10  ;;  %v3818_v19 = vpack.c.bf16 %v1256_v12, %v1248_v9  ;;  %v1342_v9 = vld [vmem:[#allocation10 + $0x508] sm:$0xff]  ;;  %v3836_v11 = vpack.c.bf16 %v1319_v2, %v1311_v1  ;;  %v1335_v14 = vld [vmem:[#allocation10 + $0x4d0] sm:$0xff]  ;;  %v1405_v1 = vld [vmem:[#allocation10 + $0x700] sm:$0xff] }
 0x27c   : > { %v847_v26 = vadd.f32 %v846_v22, %v540_v60  ;;  %v848_v27 = vpop.f32.mrb[7].mxu1  ;;  %1166 = vmatprep.mubr.f32.mxu0 %v4922_v0  ;;  %v3802_v0 = vpack.c.bf16 %v1192_v28, %v1184_v24  ;;  %v1261_v22 = vld [vmem:[#allocation10 + $0x280] sm:$0xff]  ;;  %v1272_v24 = vld [vmem:[#allocation10 + $0x2d8] sm:$0xff]  ;;  %v1350_v10 = vld [vmem:[#allocation10 + $0x548] sm:$0xff] }
 0x27d   : > { %v849_v32 = vadd.f32 %v848_v27, %v540_v60  ;;  %3501 = vmatprep.subr.msk.mxu1 %vm864_vm2, %v774_v21  ;;  %v1232_v60 = vld [vmem:[#allocation10 + $0x198] sm:$0xff]  ;;  %v3820_v27 = vpack.c.bf16 %v1255_v18, %v1247_v17  ;;  %v1341_v18 = vld [vmem:[#allocation10 + $0x500] sm:$0xff] }
 0x27e   : > { %3502 = vmatpush1.msk.msra.mxu1 %vm864_vm2, %v773_v25  ;;  %v851_v41 = vmax.f32 %v847_v26, 0.0  ;;  %v1264_v21 = vld [vmem:[#allocation10 + $0x298] sm:$0xff]  ;;  %v1278_v25 = vld [vmem:[#allocation10 + $0x308] sm:$0xff]  ;;  %v1413_v2 = vld [vmem:[#allocation10 + $0x740] sm:$0xff] }
 0x27f   : > { %v852_v40 = vmax.f32 %v849_v32, 0.0  ;;  %3503 = vmatmul.mubr.msk.f32.vlgmr.msra.gmra.mrb[10].mxu1 %vm860_vm3, %v5253_v7  ;;  %3547 = vmatprep.subr.bf16.mxu1 %v3546_v23  ;;  %v1269_v23 = vld [vmem:[#allocation10 + $0x2c0] sm:$0xff]  ;;  %v1286_v26 = vld [vmem:[#allocation10 + $0x348] sm:$0xff]  ;;  %v3822_v31 = vpack.c.bf16 %v1272_v24, %v1264_v21  ;;  %v1344_v17 = vld [vmem:[#allocation10 + $0x518] sm:$0xff] }
 0x280   : > { %3549 = vmatpush1.bf16.msra.mxu1 %v3548_v29  ;;  %v3568_v28 = vpack.c.bf16 %v1269_v23, %v1261_v22  ;;  %v1263_v29 = vld [vmem:[#allocation10 + $0x290] sm:$0xff]  ;;  %v3570_v32 = vpack.c.bf16 %v1286_v26, %v1278_v25  ;;  %v1358_v21 = vld [vmem:[#allocation10 + $0x588] sm:$0xff]  ;;  %v3840_v23 = vpack.c.bf16 %v1335_v14, %v1327_v13  ;;  %v1424_v13 = vld [vmem:[#allocation10 + $0x798] sm:$0xff] }
 0x281   : > { %3504 = vmatprep.subr.msk.mxu0 %vm864_vm2, %v852_v40  ;;  %3551 = vmatprep.subr.bf16.mxu1 %v3550_v33  ;;  %v1280_v33 = vld [vmem:[#allocation10 + $0x318] sm:$0xff]  ;;  %v3824_v39 = vpack.c.bf16 %v1271_v30, %v1263_v29  ;;  %v3572_v40 = vpack.c.bf16 %v1285_v35, %v1277_v34  ;;  %v1366_v22 = vld [vmem:[#allocation10 + $0x5c8] sm:$0xff]  ;;  %v1343_v25 = vld [vmem:[#allocation10 + $0x510] sm:$0xff] }
 0x282   : > { %3505 = vmatpush1.msk.msra.mxu0 %vm864_vm2, %v851_v41  ;;  %v1287_v41 = vld [vmem:[#allocation10 + $0x350] sm:$0xff]  ;;  %v1360_v29 = vld [vmem:[#allocation10 + $0x598] sm:$0xff]  ;;  %v1357_v30 = vld [vmem:[#allocation10 + $0x580] sm:$0xff] }
 0x283   : > { %3506 = vmatmul.mubr.msk.f32.vlgmr.msra.gmra.mrb[6].mxu0 %vm860_vm3, %v5253_v7  ;;  %3803 = vmatprep.subr.bf16.mxu0 %v3802_v0  ;;  %v3814_v7 = vpack.c.bf16 %v1240_v63, %v1232_v60  ;;  %v1279_v0 = vld [vmem:[#allocation10 + $0x310] sm:$0xff]  ;;  %v1326_v60 = vld [vmem:[#allocation10 + $0x488] sm:$0xff] }
 0x284   : > { %3805 = vmatpush1.bf16.msra.mxu0 %v3804_v42  ;;  %3553 = vmatpush1.bf16.msra.mxu1 %v3552_v43  ;;  %v3826_v42 = vpack.c.bf16 %v1288_v36, %v1280_v33  ;;  %v3574_v43 = vpack.c.bf16 %v1302_v38, %v1294_v37  ;;  %v3828_v50 = vpack.c.bf16 %v1287_v41, %v1279_v0  ;;  %v1351_v26 = vld [vmem:[#allocation10 + $0x550] sm:$0xff]  ;;  %v1374_v33 = vld [vmem:[#allocation10 + $0x608] sm:$0xff]  ;;  %v1376_v0 = vld [vmem:[#allocation10 + $0x618] sm:$0xff] }
 0x285   : > { %3807 = vmatprep.subr.bf16.mxu0 %v3806_v46  ;;  %3555 = vmatprep.subr.bf16.mxu1 %v3554_v47  ;;  %v1301_v46 = vld [vmem:[#allocation10 + $0x3c0] sm:$0xff]  ;;  %v1304_v47 = vld [vmem:[#allocation10 + $0x3d8] sm:$0xff]  ;;  %v1382_v34 = vld [vmem:[#allocation10 + $0x648] sm:$0xff]  ;;  %v3844_v35 = vpack.c.bf16 %v1351_v26, %v1343_v25 }
 0x286   : > { %v3576_v51 = vpack.c.bf16 %v1301_v46, %v1293_v45  ;;  %v1359_v37 = vld [vmem:[#allocation10 + $0x590] sm:$0xff]  ;;  %v1373_v41 = vld [vmem:[#allocation10 + $0x600] sm:$0xff]  ;;  %v1398_v45 = vld [vmem:[#allocation10 + $0x6c8] sm:$0xff] }
 0x287   : > { %v1367_v38 = vld [vmem:[#allocation10 + $0x5d0] sm:$0xff]  ;;  %v1440_v25 = vld [vmem:[#allocation10 + $0x818] sm:$0xff] }
 0x288   : > { %3809 = vmatpush1.bf16.msra.mxu0 %v3808_v54  ;;  %3557 = vmatpush1.bf16.msra.mxu1 %v3556_v55  ;;  %v3830_v54 = vpack.c.bf16 %v1304_v47, %v1296_v44  ;;  %v3578_v55 = vpack.c.bf16 %v1318_v49, %v1310_v48  ;;  %v1390_v44 = vld [vmem:[#allocation10 + $0x688] sm:$0xff]  ;;  %v3848_v46 = vpack.c.bf16 %v1367_v38, %v1359_v37  ;;  %v1375_v48 = vld [vmem:[#allocation10 + $0x610] sm:$0xff] }
 0x289   : > { %3811 = vmatprep.subr.bf16.mxu0 %v3810_v58  ;;  %3559 = vmatprep.subr.bf16.mxu1 %v3558_v59  ;;  %v1317_v58 = vld [vmem:[#allocation10 + $0x440] sm:$0xff]  ;;  %v1320_v59 = vld [vmem:[#allocation10 + $0x458] sm:$0xff]  ;;  %v1383_v49 = vld [vmem:[#allocation10 + $0x650] sm:$0xff] }
 0x28a   : > { %v3580_v63 = vpack.c.bf16 %v1317_v58, %v1309_v57  ;;  %v1414_v57 = vld [vmem:[#allocation10 + $0x748] sm:$0xff]  ;;  %v3852_v58 = vpack.c.bf16 %v1383_v49, %v1375_v48 }
 0x28b   : > { %v1454_v37 = vld [vmem:[#allocation10 + $0x888] sm:$0xff] }
 0x28c   : > { %3813 = vmatpush1.bf16.msra.mxu0 %v3812_v3  ;;  %3561 = vmatpush1.bf16.msra.mxu1 %v3560_v4  ;;  %v3834_v3 = vpack.c.bf16 %v1320_v59, %v1312_v56  ;;  %v3582_v4 = vpack.c.bf16 %v1334_v61, %v1326_v60  ;;  %v1406_v56 = vld [vmem:[#allocation10 + $0x708] sm:$0xff]  ;;  %v1391_v60 = vld [vmem:[#allocation10 + $0x690] sm:$0xff] }
 0x28d   : > { %3815 = vmatprep.subr.bf16.mxu0 %v3814_v7  ;;  %3563 = vmatprep.subr.bf16.mxu1 %v3562_v8  ;;  %v1333_v7 = vld [vmem:[#allocation10 + $0x4c0] sm:$0xff]  ;;  %v1336_v8 = vld [vmem:[#allocation10 + $0x4d8] sm:$0xff] }
 0x28e   : > { %v3584_v12 = vpack.c.bf16 %v1333_v7, %v1325_v6  ;;  %v3604_v6 = vpack.c.bf16 %v1413_v2, %v1405_v1  ;;  %v1477_v1 = vld [vmem:[#allocation10 + $0x940] sm:$0xff] }
 0x290   : > { %3817 = vmatpush1.bf16.msra.mxu0 %v3816_v15  ;;  %3565 = vmatpush1.bf16.msra.mxu1 %v3564_v16  ;;  %v3838_v15 = vpack.c.bf16 %v1336_v8, %v1328_v5  ;;  %v3586_v16 = vpack.c.bf16 %v1350_v10, %v1342_v9  ;;  %v1407_v8 = vld [vmem:[#allocation10 + $0x710] sm:$0xff] }
 0x291   : > { %3819 = vmatprep.subr.bf16.mxu0 %v3818_v19  ;;  %3567 = vmatprep.subr.bf16.mxu1 %v3566_v20  ;;  %v1349_v19 = vld [vmem:[#allocation10 + $0x540] sm:$0xff]  ;;  %v1352_v20 = vld [vmem:[#allocation10 + $0x558] sm:$0xff]  ;;  %v1415_v9 = vld [vmem:[#allocation10 + $0x750] sm:$0xff] }
 0x292   : > { %v3588_v24 = vpack.c.bf16 %v1349_v19, %v1341_v18  ;;  %v3860_v10 = vpack.c.bf16 %v1415_v9, %v1407_v8  ;;  %v1486_v8 = vld [vmem:[#allocation10 + $0x988] sm:$0xff] }
 0x294   : > { %3821 = vmatpush1.bf16.msra.mxu0 %v3820_v27  ;;  %3569 = vmatpush1.bf16.msra.mxu1 %v3568_v28  ;;  %v3842_v27 = vpack.c.bf16 %v1352_v20, %v1344_v17  ;;  %v3590_v28 = vpack.c.bf16 %v1366_v22, %v1358_v21  ;;  %v1429_v17 = vld [vmem:[#allocation10 + $0x7c0] sm:$0xff]  ;;  %v1423_v20 = vld [vmem:[#allocation10 + $0x790] sm:$0xff] }
 0x295   : > { %3823 = vmatprep.subr.bf16.mxu0 %v3822_v31  ;;  %3571 = vmatprep.subr.bf16.mxu1 %v3570_v32  ;;  %v1365_v31 = vld [vmem:[#allocation10 + $0x5c0] sm:$0xff]  ;;  %v1368_v32 = vld [vmem:[#allocation10 + $0x5d8] sm:$0xff]  ;;  %v1431_v21 = vld [vmem:[#allocation10 + $0x7d0] sm:$0xff] }
 0x296   : > { %v3592_v36 = vpack.c.bf16 %v1365_v31, %v1357_v30  ;;  %v3864_v22 = vpack.c.bf16 %v1431_v21, %v1423_v20  ;;  %v1437_v31 = vld [vmem:[#allocation10 + $0x800] sm:$0xff] }
 0x298   : > { %3825 = vmatpush1.bf16.msra.mxu0 %v3824_v39  ;;  %3573 = vmatpush1.bf16.msra.mxu1 %v3572_v40  ;;  %v3846_v39 = vpack.c.bf16 %v1368_v32, %v1360_v29  ;;  %v3594_v40 = vpack.c.bf16 %v1382_v34, %v1374_v33  ;;  %v5273_v29 = vpop.permute.xlu1 %857  ;;  %v1445_v32 = vld [vmem:[#allocation10 + $0x840] sm:$0xff] }
 0x299   : > { %3827 = vmatprep.subr.bf16.mxu0 %v3826_v42  ;;  %3575 = vmatprep.subr.bf16.mxu1 %v3574_v43  ;;  %v1381_v42 = vld [vmem:[#allocation10 + $0x640] sm:$0xff]  ;;  %v1384_v43 = vld [vmem:[#allocation10 + $0x658] sm:$0xff] }
 0x29a   : > { %v3596_v47 = vpack.c.bf16 %v1381_v42, %v1373_v41 }
 0x29c   : > { %3829 = vmatpush1.bf16.msra.mxu0 %v3828_v50  ;;  %3577 = vmatpush1.bf16.msra.mxu1 %v3576_v51  ;;  %v3850_v50 = vpack.c.bf16 %v1384_v43, %v1376_v0  ;;  %v3598_v51 = vpack.c.bf16 %v1398_v45, %v1390_v44  ;;  %v1464_v0 = vld [vmem:[#allocation10 + $0x8d8] sm:$0xff]  ;;  %v3612_v43 = vpack.c.bf16 %v1445_v32, %v1437_v31  ;;  %v1453_v45 = vld [vmem:[#allocation10 + $0x880] sm:$0xff] }
 0x29d   : > { %3831 = vmatprep.subr.bf16.mxu0 %v3830_v54  ;;  %3579 = vmatprep.subr.bf16.mxu1 %v3578_v55  ;;  %v1397_v54 = vld [vmem:[#allocation10 + $0x6c0] sm:$0xff]  ;;  %v1400_v55 = vld [vmem:[#allocation10 + $0x6d8] sm:$0xff] }
 0x29e   : > { %v3600_v59 = vpack.c.bf16 %v1397_v54, %v1389_v53  ;;  %v3854_v61 = vpack.c.bf16 %v1400_v55, %v1392_v52  ;;  %v1455_v52 = vld [vmem:[#allocation10 + $0x890] sm:$0xff]  ;;  %v1470_v54 = vld [vmem:[#allocation10 + $0x908] sm:$0xff]  ;;  %v1501_v32 = vld [vmem:[#allocation10 + $0xa00] sm:$0xff] }
 0x29f   : > { %v1463_v53 = vld [vmem:[#allocation10 + $0x8d0] sm:$0xff] }
 0x2a0   : > { %3833 = vmatpush1.bf16.msra.mxu0 %v3832_v62  ;;  %3581 = vmatpush1.bf16.msra.mxu1 %v3580_v63  ;;  %v1399_v62 = vld [vmem:[#allocation10 + $0x6d0] sm:$0xff]  ;;  %v3602_v63 = vpack.c.bf16 %v1414_v57, %v1406_v56  ;;  %v1478_v56 = vld [vmem:[#allocation10 + $0x948] sm:$0xff]  ;;  %v1472_v57 = vld [vmem:[#allocation10 + $0x918] sm:$0xff] }
 0x2a1   : > { %3835 = vmatprep.subr.bf16.mxu0 %v3834_v3  ;;  %3583 = vmatprep.subr.bf16.mxu1 %v3582_v4  ;;  %v1408_v3 = vld [vmem:[#allocation10 + $0x718] sm:$0xff]  ;;  %v3856_v5 = vpack.c.bf16 %v1399_v62, %v1391_v60  ;;  %v3872_v62 = vpack.c.bf16 %v1463_v53, %v1455_v52  ;;  %v1542_v52 = vld [vmem:[#allocation10 + $0xb48] sm:$0xff] }
 0x2a2   : > { %v1416_v4 = vld [vmem:[#allocation10 + $0x758] sm:$0xff] }
 0x2a3   : > { %v3858_v7 = vpack.c.bf16 %v1416_v4, %v1408_v3  ;;  %v3618_v4 = vpack.c.bf16 %v1478_v56, %v1470_v54  ;;  %v1536_v53 = vld [vmem:[#allocation10 + $0xb18] sm:$0xff] }
 0x2a4   : > { %3837 = vmatpush1.bf16.msra.mxu0 %v3836_v11  ;;  %3585 = vmatpush1.bf16.msra.mxu1 %v3584_v12  ;;  %v1422_v11 = vld [vmem:[#allocation10 + $0x788] sm:$0xff]  ;;  %v1544_v54 = vld [vmem:[#allocation10 + $0xb58] sm:$0xff] }
 0x2a5   : > { %3839 = vmatprep.subr.bf16.mxu0 %v3838_v15  ;;  %3587 = vmatprep.subr.bf16.mxu1 %v3586_v16  ;;  %v1430_v12 = vld [vmem:[#allocation10 + $0x7c8] sm:$0xff]  ;;  %v1432_v15 = vld [vmem:[#allocation10 + $0x7d8] sm:$0xff]  ;;  %v1421_v16 = vld [vmem:[#allocation10 + $0x780] sm:$0xff] }
 0x2a6   : > { %v3606_v14 = vpack.c.bf16 %v1430_v12, %v1422_v11  ;;  %v3862_v18 = vpack.c.bf16 %v1432_v15, %v1424_v13  ;;  %v3608_v19 = vpack.c.bf16 %v1429_v17, %v1421_v16  ;;  %v1488_v11 = vld [vmem:[#allocation10 + $0x998] sm:$0xff]  ;;  %v1485_v16 = vld [vmem:[#allocation10 + $0x980] sm:$0xff] }
 0x2a7   : > { %v1496_v12 = vld [vmem:[#allocation10 + $0x9d8] sm:$0xff]  ;;  %v1493_v17 = vld [vmem:[#allocation10 + $0x9c0] sm:$0xff] }
 0x2a8   : > { %3841 = vmatpush1.bf16.msra.mxu0 %v3840_v23  ;;  %3589 = vmatpush1.bf16.msra.mxu1 %v3588_v24  ;;  %v1438_v23 = vld [vmem:[#allocation10 + $0x808] sm:$0xff]  ;;  %v3878_v21 = vpack.c.bf16 %v1496_v12, %v1488_v11 }
 0x2a9   : > { %3843 = vmatprep.subr.bf16.mxu0 %v3842_v27  ;;  %3591 = vmatprep.subr.bf16.mxu1 %v3590_v28  ;;  %v1446_v24 = vld [vmem:[#allocation10 + $0x848] sm:$0xff]  ;;  %v1448_v27 = vld [vmem:[#allocation10 + $0x858] sm:$0xff] }
 0x2aa   : > { %v3610_v26 = vpack.c.bf16 %v1446_v24, %v1438_v23  ;;  %v3866_v28 = vpack.c.bf16 %v1448_v27, %v1440_v25  ;;  %v1495_v23 = vld [vmem:[#allocation10 + $0x9d0] sm:$0xff]  ;;  %v1502_v24 = vld [vmem:[#allocation10 + $0xa08] sm:$0xff]  ;;  %v1504_v27 = vld [vmem:[#allocation10 + $0xa18] sm:$0xff] }
 0x2ac   : > { %3845 = vmatpush1.bf16.msra.mxu0 %v3844_v35  ;;  %3593 = vmatpush1.bf16.msra.mxu1 %v3592_v36  ;;  %v1439_v35 = vld [vmem:[#allocation10 + $0x810] sm:$0xff] }
 0x2ad   : > { %3847 = vmatprep.subr.bf16.mxu0 %v3846_v39  ;;  %3595 = vmatprep.subr.bf16.mxu1 %v3594_v40  ;;  %v1447_v36 = vld [vmem:[#allocation10 + $0x850] sm:$0xff]  ;;  %v1462_v39 = vld [vmem:[#allocation10 + $0x8c8] sm:$0xff]  ;;  %v1456_v40 = vld [vmem:[#allocation10 + $0x898] sm:$0xff] }
 0x2ae   : > { %v3868_v44 = vpack.c.bf16 %v1447_v36, %v1439_v35  ;;  %v1503_v36 = vld [vmem:[#allocation10 + $0xa10] sm:$0xff] }
 0x2b0   : > { %3849 = vmatpush1.bf16.msra.mxu0 %v3848_v46  ;;  %3597 = vmatpush1.bf16.msra.mxu1 %v3596_v47  ;;  %v1461_v46 = vld [vmem:[#allocation10 + $0x8c0] sm:$0xff] }
 0x2b1   : > { %3851 = vmatprep.subr.bf16.mxu0 %v3850_v50  ;;  %3599 = vmatprep.subr.bf16.mxu1 %v3598_v51  ;;  %v3614_v50 = vpack.c.bf16 %v1462_v39, %v1454_v37  ;;  %v3870_v51 = vpack.c.bf16 %v1464_v0, %v1456_v40  ;;  %v1511_v37 = vld [vmem:[#allocation10 + $0xa50] sm:$0xff]  ;;  %v1526_v39 = vld [vmem:[#allocation10 + $0xac8] sm:$0xff]  ;;  %v1520_v40 = vld [vmem:[#allocation10 + $0xa98] sm:$0xff] }
 0x2b4   : > { %3853 = vmatpush1.bf16.msra.mxu0 %v3852_v58  ;;  %3601 = vmatpush1.bf16.msra.mxu1 %v3600_v59  ;;  %v1480_v58 = vld [vmem:[#allocation10 + $0x958] sm:$0xff] }
 0x2b5   : > { %3855 = vmatprep.subr.bf16.mxu0 %v3854_v61  ;;  %3603 = vmatprep.subr.bf16.mxu1 %v3602_v63  ;;  %v3616_v61 = vpack.c.bf16 %v1461_v46, %v1453_v45  ;;  %v1469_v63 = vld [vmem:[#allocation10 + $0x900] sm:$0xff] }
 0x2b8   : > { %3857 = vmatpush1.bf16.msra.mxu0 %v3856_v5  ;;  %3605 = vmatpush1.bf16.msra.mxu1 %v3604_v6  ;;  %v3874_v5 = vpack.c.bf16 %v1480_v58, %v1472_v57  ;;  %v1471_v6 = vld [vmem:[#allocation10 + $0x910] sm:$0xff]  ;;  %v1533_v57 = vld [vmem:[#allocation10 + $0xb00] sm:$0xff] }
 0x2b9   : > { %3859 = vmatprep.subr.bf16.mxu0 %v3858_v7  ;;  %3607 = vmatprep.subr.bf16.mxu1 %v3606_v14  ;;  %v1479_v7 = vld [vmem:[#allocation10 + $0x950] sm:$0xff]  ;;  %v3620_v14 = vpack.c.bf16 %v1477_v1, %v1469_v63  ;;  %v1541_v58 = vld [vmem:[#allocation10 + $0xb40] sm:$0xff]  ;;  %v1550_v1 = vld [vmem:[#allocation10 + $0xb88] sm:$0xff] }
 0x2ba   : > { %v3876_v15 = vpack.c.bf16 %v1479_v7, %v1471_v6  ;;  %v1543_v63 = vld [vmem:[#allocation10 + $0xb50] sm:$0xff]  ;;  %v3636_v6 = vpack.c.bf16 %v1541_v58, %v1533_v57  ;;  %v1616_v57 = vld [vmem:[#allocation10 + $0xd98] sm:$0xff] }
 0x2bb   : > { %v1624_v58 = vld [vmem:[#allocation10 + $0xdd8] sm:$0xff] }
 0x2bc   : > { %3861 = vmatpush1.bf16.msra.mxu0 %v3860_v10  ;;  %3609 = vmatpush1.bf16.msra.mxu1 %v3608_v19  ;;  %v1494_v10 = vld [vmem:[#allocation10 + $0x9c8] sm:$0xff] }
 0x2bd   : > { %3863 = vmatprep.subr.bf16.mxu0 %v3862_v18  ;;  %3611 = vmatprep.subr.bf16.mxu1 %v3610_v26  ;;  %v3622_v20 = vpack.c.bf16 %v1494_v10, %v1486_v8  ;;  %v1510_v26 = vld [vmem:[#allocation10 + $0xa48] sm:$0xff]  ;;  %v1549_v8 = vld [vmem:[#allocation10 + $0xb80] sm:$0xff] }
 0x2be   : > { %v1557_v10 = vld [vmem:[#allocation10 + $0xbc0] sm:$0xff] }
 0x2c0   : > { %3865 = vmatpush1.bf16.msra.mxu0 %v3864_v22  ;;  %v1487_v22 = vld [vmem:[#allocation10 + $0x990] sm:$0xff] }
 0x2c1   : > { %3867 = vmatprep.subr.bf16.mxu0 %v3866_v28  ;;  %v1512_v28 = vld [vmem:[#allocation10 + $0xa58] sm:$0xff]  ;;  %v3880_v31 = vpack.c.bf16 %v1495_v23, %v1487_v22  ;;  %v1565_v22 = vld [vmem:[#allocation10 + $0xc00] sm:$0xff] }
 0x2c2   : > { %v3882_v35 = vpack.c.bf16 %v1512_v28, %v1504_v27  ;;  %v1573_v23 = vld [vmem:[#allocation10 + $0xc40] sm:$0xff]  ;;  %v1567_v27 = vld [vmem:[#allocation10 + $0xc10] sm:$0xff] }
 0x2c3   : > { %v1575_v28 = vld [vmem:[#allocation10 + $0xc50] sm:$0xff] }
 0x34a   : > { %v955_v30 = vpop.f32.mrb[8].mxu1 }
 0x34b   : > { %v956_v33 = vadd.f32 %v955_v30, %v5273_v29  ;;  %v957_v34 = vpop.f32.mrb[9].mxu1  ;;  %v3624_v30 = vpack.c.bf16 %v1493_v17, %v1485_v16  ;;  %v1574_v16 = vld [vmem:[#allocation10 + $0xc48] sm:$0xff]  ;;  %v1568_v17 = vld [vmem:[#allocation10 + $0xc18] sm:$0xff] }
 0x34c   : > { %v958_v38 = vadd.f32 %v957_v34, %v5273_v29  ;;  %v3626_v34 = vpack.c.bf16 %v1510_v26, %v1502_v24 }
 0x34d   : > { %v5279_v47 = vmax.f32 %v956_v33, 0.0  ;;  %v1509_v33 = vld [vmem:[#allocation10 + $0xa40] sm:$0xff] }
 0x34e   : > { %v5277_v41 = vmax.f32 %v958_v38, 0.0  ;;  %v1026_v42 = vpop.f32.mrb[4].mxu0  ;;  %v1518_v38 = vld [vmem:[#allocation10 + $0xa88] sm:$0xff]  ;;  %v3628_v0 = vpack.c.bf16 %v1509_v33, %v1501_v32  ;;  %v1584_v32 = vld [vmem:[#allocation10 + $0xc98] sm:$0xff] }
 0x34f   : > { %v5282_v48 = vadd.f32 %v1026_v42, %v5273_v29  ;;  %v1028_v49 = vpop.f32.mrb[5].mxu0  ;;  %v3884_v42 = vpack.c.bf16 %v1511_v37, %v1503_v36  ;;  %v3630_v45 = vpack.c.bf16 %v1526_v39, %v1518_v38  ;;  %v1592_v33 = vld [vmem:[#allocation10 + $0xcd8] sm:$0xff]  ;;  %v1581_v36 = vld [vmem:[#allocation10 + $0xc80] sm:$0xff] }
 0x350   : > { %v1029_v55 = vadd.f32 %v1028_v49, %v5273_v29  ;;  %2269 = vmatprep.mubr.f32.mxu1 %v5277_v41  ;;  %2553 = vmatprep.mubr.f32.mxu0 %v5277_v41  ;;  %v1519_v49 = vld [vmem:[#allocation10 + $0xa90] sm:$0xff]  ;;  %v1589_v37 = vld [vmem:[#allocation10 + $0xcc0] sm:$0xff]  ;;  %v3902_v39 = vpack.c.bf16 %v1592_v33, %v1584_v32 }
 0x351   : > { %2270 = vmatmul.mubr.f32.vlgmr.msra.gmra.mrb[12].mxu1 %v5279_v47  ;;  %2554 = vmatmul.mubr.f32.vlgmr.msra.gmra.mrb[8].mxu0 %v5279_v47  ;;  %v1647_v32 = vld [vmem:[#allocation10 + $0xe90] sm:$0xff] }
 0x352   : > { %v5289_v59 = vmax.f32 %v1029_v55, 0.0  ;;  %3613 = vmatpush1.bf16.msra.mxu1 %v3612_v43  ;;  %3869 = vmatpush1.bf16.msra.mxu0 %v3868_v44  ;;  %v1097_v60 = vpop.f32.mrb[10].mxu1  ;;  %v1517_v43 = vld [vmem:[#allocation10 + $0xa80] sm:$0xff]  ;;  %v1655_v33 = vld [vmem:[#allocation10 + $0xed0] sm:$0xff] }
 0x353   : > { %v5292_v2 = vadd.f32 %v1097_v60, %v5273_v29  ;;  %v1099_v3 = vpop.f32.mrb[11].mxu1  ;;  %3615 = vmatprep.subr.bf16.mxu1 %v3614_v50  ;;  %3871 = vmatprep.subr.bf16.mxu0 %v3870_v51  ;;  %v1525_v44 = vld [vmem:[#allocation10 + $0xac0] sm:$0xff]  ;;  %v1527_v50 = vld [vmem:[#allocation10 + $0xad0] sm:$0xff]  ;;  %v1534_v51 = vld [vmem:[#allocation10 + $0xb08] sm:$0xff] }
 0x354   : > { %v5295_v9 = vadd.f32 %v1099_v3, %v5273_v29  ;;  %2340 = vmatprep.mubr.f32.mxu1 %v5289_v59  ;;  %2624 = vmatprep.mubr.f32.mxu0 %v5289_v59  ;;  %v3632_v55 = vpack.c.bf16 %v1525_v44, %v1517_v43  ;;  %v3888_v56 = vpack.c.bf16 %v1527_v50, %v1519_v49  ;;  %v1558_v3 = vld [vmem:[#allocation10 + $0xbc8] sm:$0xff]  ;;  %v1600_v43 = vld [vmem:[#allocation10 + $0xd18] sm:$0xff]  ;;  %v1597_v49 = vld [vmem:[#allocation10 + $0xd00] sm:$0xff] }
 0x355   : > { %v3634_v60 = vpack.c.bf16 %v1542_v52, %v1534_v51  ;;  %v3638_v11 = vpack.c.bf16 %v1558_v3, %v1550_v1  ;;  %v1608_v44 = vld [vmem:[#allocation10 + $0xd58] sm:$0xff]  ;;  %v1605_v50 = vld [vmem:[#allocation10 + $0xd40] sm:$0xff]  ;;  %v3910_v3 = vpack.c.bf16 %v1624_v58, %v1616_v57  ;;  %v1679_v57 = vld [vmem:[#allocation10 + $0xf90] sm:$0xff] }
 0x356   : > { %3617 = vmatpush1.bf16.msra.mxu1 %v3616_v61  ;;  %3873 = vmatpush1.bf16.msra.mxu0 %v3872_v62  ;;  %v1168_v13 = vpop.f32.mrb[6].mxu0  ;;  %v3890_v61 = vpack.c.bf16 %v1544_v54, %v1536_v53  ;;  %v1535_v62 = vld [vmem:[#allocation10 + $0xb10] sm:$0xff]  ;;  %v3906_v52 = vpack.c.bf16 %v1608_v44, %v1600_v43 }
 0x357   : > { %v5300_v18 = vadd.f32 %v1168_v13, %v5273_v29  ;;  %v1170_v19 = vpop.f32.mrb[7].mxu0  ;;  %3619 = vmatprep.subr.bf16.mxu1 %v3618_v4  ;;  %3875 = vmatprep.subr.bf16.mxu0 %v3874_v5  ;;  %v1552_v4 = vld [vmem:[#allocation10 + $0xb98] sm:$0xff]  ;;  %v3892_v7 = vpack.c.bf16 %v1543_v63, %v1535_v62  ;;  %v1551_v13 = vld [vmem:[#allocation10 + $0xb90] sm:$0xff]  ;;  %v1613_v62 = vld [vmem:[#allocation10 + $0xd80] sm:$0xff] }
 0x358   : > { %v5303_v25 = vadd.f32 %v1170_v19, %v5273_v29  ;;  %v1528_v29 = vld [vmem:[#allocation10 + $0xad8] sm:$0xff]  ;;  %v1599_v53 = vld [vmem:[#allocation10 + $0xd10] sm:$0xff]  ;;  %v1621_v63 = vld [vmem:[#allocation10 + $0xdc0] sm:$0xff] }
 0x359   : > { %v3886_v46 = vpack.c.bf16 %v1528_v29, %v1520_v40  ;;  %v1560_v5 = vld [vmem:[#allocation10 + $0xbd8] sm:$0xff]  ;;  %v1583_v40 = vld [vmem:[#allocation10 + $0xc90] sm:$0xff] }
 0x35a   : > { %3621 = vmatpush1.bf16.msra.mxu1 %v3620_v14  ;;  %3877 = vmatpush1.bf16.msra.mxu0 %v3876_v15  ;;  %v3894_v12 = vpack.c.bf16 %v1560_v5, %v1552_v4  ;;  %v1559_v14 = vld [vmem:[#allocation10 + $0xbd0] sm:$0xff]  ;;  %v1566_v15 = vld [vmem:[#allocation10 + $0xc08] sm:$0xff]  ;;  %v1576_v19 = vld [vmem:[#allocation10 + $0xc58] sm:$0xff] }
 0x35b   : > { %3623 = vmatprep.subr.bf16.mxu1 %v3622_v20  ;;  %3879 = vmatprep.subr.bf16.mxu0 %v3878_v21  ;;  %v3640_v20 = vpack.c.bf16 %v1557_v10, %v1549_v8  ;;  %v3896_v21 = vpack.c.bf16 %v1559_v14, %v1551_v13  ;;  %v3642_v24 = vpack.c.bf16 %v1574_v16, %v1566_v15  ;;  %v1591_v29 = vld [vmem:[#allocation10 + $0xcd0] sm:$0xff]  ;;  %v1632_v8 = vld [vmem:[#allocation10 + $0xe18] sm:$0xff]  ;;  %v1629_v13 = vld [vmem:[#allocation10 + $0xe00] sm:$0xff] }
 0x35c   : > { %v3898_v26 = vpack.c.bf16 %v1576_v19, %v1568_v17  ;;  %v1607_v54 = vld [vmem:[#allocation10 + $0xd50] sm:$0xff]  ;;  %v1640_v10 = vld [vmem:[#allocation10 + $0xe58] sm:$0xff]  ;;  %v1637_v14 = vld [vmem:[#allocation10 + $0xe40] sm:$0xff] }
 0x35d   : > { %v1615_v4 = vld [vmem:[#allocation10 + $0xd90] sm:$0xff]  ;;  %v3914_v16 = vpack.c.bf16 %v1640_v10, %v1632_v8 }
 0x35e   : > { %3625 = vmatpush1.bf16.msra.mxu1 %v3624_v30  ;;  %3881 = vmatpush1.bf16.msra.mxu0 %v3880_v31  ;;  %v1582_v30 = vld [vmem:[#allocation10 + $0xc88] sm:$0xff]  ;;  %v1623_v5 = vld [vmem:[#allocation10 + $0xdd0] sm:$0xff] }
 0x35f   : > { %3627 = vmatprep.subr.bf16.mxu1 %v3626_v34  ;;  %3883 = vmatprep.subr.bf16.mxu0 %v3882_v35  ;;  %v1590_v31 = vld [vmem:[#allocation10 + $0xcc8] sm:$0xff]  ;;  %v3644_v34 = vpack.c.bf16 %v1573_v23, %v1565_v22  ;;  %v3900_v35 = vpack.c.bf16 %v1575_v28, %v1567_v27  ;;  %v1631_v17 = vld [vmem:[#allocation10 + $0xe10] sm:$0xff]  ;;  %v1648_v22 = vld [vmem:[#allocation10 + $0xe98] sm:$0xff] }
 0x360   : > { %v3646_v38 = vpack.c.bf16 %v1590_v31, %v1582_v30  ;;  %v1639_v19 = vld [vmem:[#allocation10 + $0xe50] sm:$0xff]  ;;  %v1656_v23 = vld [vmem:[#allocation10 + $0xed8] sm:$0xff]  ;;  %v1645_v27 = vld [vmem:[#allocation10 + $0xe80] sm:$0xff] }
 0x361   : > { %v1653_v28 = vld [vmem:[#allocation10 + $0xec0] sm:$0xff]  ;;  %v3918_v31 = vpack.c.bf16 %v1656_v23, %v1648_v22  ;;  %v1663_v43 = vld [vmem:[#allocation10 + $0xf10] sm:$0xff]  ;;  %v5309_v22 = vmax.f32 %v5295_v9, 0.0 }
 0x362   : > { %3629 = vmatpush1.bf16.msra.mxu1 %v3628_v0  ;;  %3885 = vmatpush1.bf16.msra.mxu0 %v3884_v42  ;;  %v1598_v0 = vld [vmem:[#allocation10 + $0xd08] sm:$0xff]  ;;  %v1671_v44 = vld [vmem:[#allocation10 + $0xf50] sm:$0xff] }
 0x363   : > { %3631 = vmatprep.subr.bf16.mxu1 %v3630_v45  ;;  %3887 = vmatprep.subr.bf16.mxu0 %v3886_v46  ;;  %v1606_v42 = vld [vmem:[#allocation10 + $0xd48] sm:$0xff]  ;;  %v3648_v45 = vpack.c.bf16 %v1589_v37, %v1581_v36  ;;  %v3904_v46 = vpack.c.bf16 %v1591_v29, %v1583_v40  ;;  %v1664_v36 = vld [vmem:[#allocation10 + $0xf18] sm:$0xff]  ;;  %v1661_v40 = vld [vmem:[#allocation10 + $0xf00] sm:$0xff] }
 0x364   : > { %v3650_v51 = vpack.c.bf16 %v1606_v42, %v1598_v0  ;;  %v1672_v37 = vld [vmem:[#allocation10 + $0xf58] sm:$0xff]  ;;  %v1669_v29 = vld [vmem:[#allocation10 + $0xf40] sm:$0xff]  ;;  %v1687_v58 = vld [vmem:[#allocation10 + $0xfd0] sm:$0xff] }
 0x365   : > { %v3922_v42 = vpack.c.bf16 %v1672_v37, %v1664_v36  ;;  %v1695_v8 = vld [vmem:[#allocation10 + $0x1010] sm:$0xff] }
 0x366   : > { %3633 = vmatpush1.bf16.msra.mxu1 %v3632_v55  ;;  %3889 = vmatpush1.bf16.msra.mxu0 %v3888_v56  ;;  %v1614_v55 = vld [vmem:[#allocation10 + $0xd88] sm:$0xff]  ;;  %v1703_v10 = vld [vmem:[#allocation10 + $0x1050] sm:$0xff] }
 0x367   : > { %3635 = vmatprep.subr.bf16.mxu1 %v3634_v60  ;;  %3891 = vmatprep.subr.bf16.mxu0 %v3890_v61  ;;  %v1622_v56 = vld [vmem:[#allocation10 + $0xdc8] sm:$0xff]  ;;  %v3652_v60 = vpack.c.bf16 %v1605_v50, %v1597_v49  ;;  %v3908_v61 = vpack.c.bf16 %v1607_v54, %v1599_v53  ;;  %v1680_v49 = vld [vmem:[#allocation10 + $0xf98] sm:$0xff]  ;;  %v1677_v53 = vld [vmem:[#allocation10 + $0xf80] sm:$0xff] }
 0x368   : > { %v3654_v1 = vpack.c.bf16 %v1622_v56, %v1614_v55  ;;  %v1688_v50 = vld [vmem:[#allocation10 + $0xfd8] sm:$0xff]  ;;  %v1685_v54 = vld [vmem:[#allocation10 + $0xfc0] sm:$0xff]  ;;  %v1735_v37 = vld [vmem:[#allocation10 + $0x1150] sm:$0xff] }
 0x369   : > { %v3926_v56 = vpack.c.bf16 %v1688_v50, %v1680_v49  ;;  %v1751_v50 = vld [vmem:[#allocation10 + $0x11d0] sm:$0xff] }
 0x36a   : > { %3637 = vmatpush1.bf16.msra.mxu1 %v3636_v6  ;;  %3893 = vmatpush1.bf16.msra.mxu0 %v3892_v7  ;;  %v1630_v6 = vld [vmem:[#allocation10 + $0xe08] sm:$0xff] }
 0x36b   : > { %3639 = vmatprep.subr.bf16.mxu1 %v3638_v11  ;;  %3895 = vmatprep.subr.bf16.mxu0 %v3894_v12  ;;  %v1638_v7 = vld [vmem:[#allocation10 + $0xe48] sm:$0xff]  ;;  %v3656_v11 = vpack.c.bf16 %v1621_v63, %v1613_v62  ;;  %v3912_v12 = vpack.c.bf16 %v1623_v5, %v1615_v4  ;;  %v1696_v62 = vld [vmem:[#allocation10 + $0x1018] sm:$0xff] }
 0x36c   : > { %v3658_v15 = vpack.c.bf16 %v1638_v7, %v1630_v6  ;;  %v1704_v63 = vld [vmem:[#allocation10 + $0x1058] sm:$0xff]  ;;  %v1693_v6 = vld [vmem:[#allocation10 + $0x1000] sm:$0xff] }
 0x36d   : > { %v3930_v5 = vpack.c.bf16 %v1704_v63, %v1696_v62  ;;  %v1701_v7 = vld [vmem:[#allocation10 + $0x1040] sm:$0xff]  ;;  %v1767_v63 = vld [vmem:[#allocation10 + $0x1250] sm:$0xff] }
 0x36e   : > { %3641 = vmatpush1.bf16.msra.mxu1 %v3640_v20  ;;  %3897 = vmatpush1.bf16.msra.mxu0 %v3896_v21  ;;  %v1646_v20 = vld [vmem:[#allocation10 + $0xe88] sm:$0xff] }
 0x36f   : > { %3643 = vmatprep.subr.bf16.mxu1 %v3642_v24  ;;  %3899 = vmatprep.subr.bf16.mxu0 %v3898_v26  ;;  %v1654_v21 = vld [vmem:[#allocation10 + $0xec8] sm:$0xff]  ;;  %v3660_v24 = vpack.c.bf16 %v1637_v14, %v1629_v13  ;;  %v3916_v26 = vpack.c.bf16 %v1639_v19, %v1631_v17  ;;  %v1712_v13 = vld [vmem:[#allocation10 + $0x1098] sm:$0xff]  ;;  %v3932_v17 = vpack.c.bf16 %v1703_v10, %v1695_v8  ;;  %v1709_v19 = vld [vmem:[#allocation10 + $0x1080] sm:$0xff] }
 0x370   : > { %v3662_v30 = vpack.c.bf16 %v1654_v21, %v1646_v20  ;;  %v1720_v14 = vld [vmem:[#allocation10 + $0x10d8] sm:$0xff]  ;;  %v1717_v20 = vld [vmem:[#allocation10 + $0x10c0] sm:$0xff]  ;;  %v1711_v21 = vld [vmem:[#allocation10 + $0x1090] sm:$0xff] }
 0x371   : > { %v1773_v10 = vld [vmem:[#allocation10 + $0x1280] sm:$0xff] }
 0x372   : > { %3645 = vmatpush1.bf16.msra.mxu1 %v3644_v34  ;;  %3901 = vmatpush1.bf16.msra.mxu0 %v3900_v35  ;;  %v1662_v34 = vld [vmem:[#allocation10 + $0xf08] sm:$0xff] }
 0x373   : > { %3647 = vmatprep.subr.bf16.mxu1 %v3646_v38  ;;  %3903 = vmatprep.subr.bf16.mxu0 %v3902_v39  ;;  %v1670_v35 = vld [vmem:[#allocation10 + $0xf48] sm:$0xff]  ;;  %v3664_v38 = vpack.c.bf16 %v1653_v28, %v1645_v27  ;;  %v3920_v39 = vpack.c.bf16 %v1655_v33, %v1647_v32  ;;  %v1725_v33 = vld [vmem:[#allocation10 + $0x1100] sm:$0xff] }
 0x374   : > { %v3666_v0 = vpack.c.bf16 %v1670_v35, %v1662_v34  ;;  %v1726_v27 = vld [vmem:[#allocation10 + $0x1108] sm:$0xff]  ;;  %v1733_v34 = vld [vmem:[#allocation10 + $0x1140] sm:$0xff]  ;;  %v1727_v35 = vld [vmem:[#allocation10 + $0x1110] sm:$0xff] }
 0x375   : > { %v1734_v28 = vld [vmem:[#allocation10 + $0x1148] sm:$0xff] }
 0x376   : > { %3649 = vmatpush1.bf16.msra.mxu1 %v3648_v45  ;;  %3905 = vmatpush1.bf16.msra.mxu0 %v3904_v46  ;;  %v1678_v45 = vld [vmem:[#allocation10 + $0xf88] sm:$0xff]  ;;  %v3682_v32 = vpack.c.bf16 %v1734_v28, %v1726_v27  ;;  %v1797_v27 = vld [vmem:[#allocation10 + $0x1340] sm:$0xff]  ;;  %v1791_v28 = vld [vmem:[#allocation10 + $0x1310] sm:$0xff] }
 0x377   : > { %3651 = vmatprep.subr.bf16.mxu1 %v3650_v51  ;;  %3907 = vmatprep.subr.bf16.mxu0 %v3906_v52  ;;  %v1686_v46 = vld [vmem:[#allocation10 + $0xfc8] sm:$0xff]  ;;  %v3668_v51 = vpack.c.bf16 %v1669_v29, %v1661_v40  ;;  %v3924_v52 = vpack.c.bf16 %v1671_v44, %v1663_v43  ;;  %v1744_v40 = vld [vmem:[#allocation10 + $0x1198] sm:$0xff]  ;;  %v1741_v44 = vld [vmem:[#allocation10 + $0x1180] sm:$0xff] }
 0x378   : > { %v3670_v55 = vpack.c.bf16 %v1686_v46, %v1678_v45  ;;  %v1752_v29 = vld [vmem:[#allocation10 + $0x11d8] sm:$0xff]  ;;  %v1749_v45 = vld [vmem:[#allocation10 + $0x11c0] sm:$0xff]  ;;  %v1743_v46 = vld [vmem:[#allocation10 + $0x1190] sm:$0xff] }
 0x379   : > { %v3942_v49 = vpack.c.bf16 %v1752_v29, %v1744_v40  ;;  %v1815_v29 = vld [vmem:[#allocation10 + $0x13d0] sm:$0xff] }
 0x37a   : > { %3653 = vmatpush1.bf16.msra.mxu1 %v3652_v60  ;;  %3909 = vmatpush1.bf16.msra.mxu0 %v3908_v61  ;;  %v1694_v60 = vld [vmem:[#allocation10 + $0x1008] sm:$0xff] }
 0x37b   : > { %3655 = vmatprep.subr.bf16.mxu1 %v3654_v1  ;;  %3911 = vmatprep.subr.bf16.mxu0 %v3910_v3  ;;  %v1702_v61 = vld [vmem:[#allocation10 + $0x1048] sm:$0xff]  ;;  %v3672_v1 = vpack.c.bf16 %v1685_v54, %v1677_v53  ;;  %v3928_v3 = vpack.c.bf16 %v1687_v58, %v1679_v57  ;;  %v1760_v53 = vld [vmem:[#allocation10 + $0x1218] sm:$0xff]  ;;  %v1757_v58 = vld [vmem:[#allocation10 + $0x1200] sm:$0xff] }
 0x37c   : > { %v3674_v4 = vpack.c.bf16 %v1702_v61, %v1694_v60  ;;  %v1768_v54 = vld [vmem:[#allocation10 + $0x1258] sm:$0xff]  ;;  %v1765_v60 = vld [vmem:[#allocation10 + $0x1240] sm:$0xff]  ;;  %v1759_v61 = vld [vmem:[#allocation10 + $0x1210] sm:$0xff] }
 0x37d   : > { %v3946_v62 = vpack.c.bf16 %v1768_v54, %v1760_v53  ;;  %v1831_v54 = vld [vmem:[#allocation10 + $0x1450] sm:$0xff] }
 0x37e   : > { %3657 = vmatpush1.bf16.msra.mxu1 %v3656_v11  ;;  %3913 = vmatpush1.bf16.msra.mxu0 %v3912_v12  ;;  %v1710_v11 = vld [vmem:[#allocation10 + $0x1088] sm:$0xff] }
 0x37f   : > { %3659 = vmatprep.subr.bf16.mxu1 %v3658_v15  ;;  %3915 = vmatprep.subr.bf16.mxu0 %v3914_v16  ;;  %v1718_v12 = vld [vmem:[#allocation10 + $0x10c8] sm:$0xff]  ;;  %v3676_v15 = vpack.c.bf16 %v1701_v7, %v1693_v6  ;;  %v5306_v16 = vmax.f32 %v5282_v48, 0.0  ;;  %v1728_v48 = vld [vmem:[#allocation10 + $0x1118] sm:$0xff]  ;;  %v3692_v6 = vpack.c.bf16 %v1765_v60, %v1757_v58  ;;  %v3948_v7 = vpack.c.bf16 %v1767_v63, %v1759_v61  ;;  %v1837_v63 = vld [vmem:[#allocation10 + $0x1480] sm:$0xff] }
 0x380   : > { %v3678_v23 = vpack.c.bf16 %v1718_v12, %v1710_v11  ;;  %v1781_v11 = vld [vmem:[#allocation10 + $0x12c0] sm:$0xff]  ;;  %v1775_v12 = vld [vmem:[#allocation10 + $0x1290] sm:$0xff]  ;;  %v1848_v58 = vld [vmem:[#allocation10 + $0x14d8] sm:$0xff] }
 0x382   : > { %3661 = vmatpush1.bf16.msra.mxu1 %v3660_v24  ;;  %3917 = vmatpush1.bf16.msra.mxu0 %v3916_v26  ;;  %v3934_v24 = vpack.c.bf16 %v1720_v14, %v1712_v13  ;;  %v1719_v26 = vld [vmem:[#allocation10 + $0x10d0] sm:$0xff] }
 0x383   : > { %3663 = vmatprep.subr.bf16.mxu1 %v3662_v30  ;;  %3919 = vmatprep.subr.bf16.mxu0 %v3918_v31  ;;  %v1736_v30 = vld [vmem:[#allocation10 + $0x1158] sm:$0xff]  ;;  %v3680_v31 = vpack.c.bf16 %v1717_v20, %v1709_v19  ;;  %v3936_v9 = vpack.c.bf16 %v1719_v26, %v1711_v21  ;;  %v1783_v14 = vld [vmem:[#allocation10 + $0x12d0] sm:$0xff]  ;;  %v3696_v21 = vpack.c.bf16 %v1781_v11, %v1773_v10  ;;  %v1789_v26 = vld [vmem:[#allocation10 + $0x1300] sm:$0xff] }
 0x384   : > { %v3938_v36 = vpack.c.bf16 %v1736_v30, %v1728_v48  ;;  %v1792_v19 = vld [vmem:[#allocation10 + $0x1318] sm:$0xff]  ;;  %v1799_v30 = vld [vmem:[#allocation10 + $0x1350] sm:$0xff] }
 0x385   : > { %v1800_v20 = vld [vmem:[#allocation10 + $0x1358] sm:$0xff] }
 0x386   : > { %3665 = vmatpush1.bf16.msra.mxu1 %v3664_v38  ;;  %3921 = vmatpush1.bf16.msra.mxu0 %v3920_v39  ;;  %v1742_v38 = vld [vmem:[#allocation10 + $0x1188] sm:$0xff]  ;;  %v3954_v48 = vpack.c.bf16 %v1800_v20, %v1792_v19  ;;  %v1864_v10 = vld [vmem:[#allocation10 + $0x1558] sm:$0xff]  ;;  %v1863_v20 = vld [vmem:[#allocation10 + $0x1550] sm:$0xff] }
 0x387   : > { %3667 = vmatprep.subr.bf16.mxu1 %v3666_v0  ;;  %3923 = vmatprep.subr.bf16.mxu0 %v3922_v42  ;;  %v1750_v39 = vld [vmem:[#allocation10 + $0x11c8] sm:$0xff]  ;;  %v3684_v0 = vpack.c.bf16 %v1733_v34, %v1725_v33  ;;  %v3940_v42 = vpack.c.bf16 %v1735_v37, %v1727_v35  ;;  %v1816_v33 = vld [vmem:[#allocation10 + $0x13d8] sm:$0xff]  ;;  %v3700_v34 = vpack.c.bf16 %v1797_v27, %v1789_v26  ;;  %v1805_v37 = vld [vmem:[#allocation10 + $0x1380] sm:$0xff] }
 0x388   : > { %v3686_v43 = vpack.c.bf16 %v1750_v39, %v1742_v38  ;;  %v3956_v35 = vpack.c.bf16 %v1799_v30, %v1791_v28  ;;  %v1813_v38 = vld [vmem:[#allocation10 + $0x13c0] sm:$0xff]  ;;  %v1807_v39 = vld [vmem:[#allocation10 + $0x1390] sm:$0xff]  ;;  %v1880_v26 = vld [vmem:[#allocation10 + $0x15d8] sm:$0xff] }
 0x389   : > { %v1869_v30 = vld [vmem:[#allocation10 + $0x1580] sm:$0xff] }
 0x38a   : > { %3669 = vmatpush1.bf16.msra.mxu1 %v3668_v51  ;;  %3925 = vmatpush1.bf16.msra.mxu0 %v3924_v52  ;;  %v1758_v51 = vld [vmem:[#allocation10 + $0x1208] sm:$0xff] }
 0x38b   : > { %3671 = vmatprep.subr.bf16.mxu1 %v3670_v55  ;;  %3927 = vmatprep.subr.bf16.mxu0 %v3926_v56  ;;  %v1766_v52 = vld [vmem:[#allocation10 + $0x1248] sm:$0xff]  ;;  %v3688_v55 = vpack.c.bf16 %v1749_v45, %v1741_v44  ;;  %v3944_v56 = vpack.c.bf16 %v1751_v50, %v1743_v46  ;;  %v1832_v44 = vld [vmem:[#allocation10 + $0x1458] sm:$0xff]  ;;  %v3704_v45 = vpack.c.bf16 %v1813_v38, %v1805_v37  ;;  %v1821_v50 = vld [vmem:[#allocation10 + $0x1400] sm:$0xff] }
 0x38c   : > { %v3690_v57 = vpack.c.bf16 %v1766_v52, %v1758_v51  ;;  %v3960_v46 = vpack.c.bf16 %v1815_v29, %v1807_v39  ;;  %v1829_v51 = vld [vmem:[#allocation10 + $0x1440] sm:$0xff]  ;;  %v1823_v52 = vld [vmem:[#allocation10 + $0x1410] sm:$0xff]  ;;  %v1896_v37 = vld [vmem:[#allocation10 + $0x1658] sm:$0xff] }
 0x38d   : > { %v3708_v60 = vpack.c.bf16 %v1829_v51, %v1821_v50  ;;  %v3964_v61 = vpack.c.bf16 %v1831_v54, %v1823_v52  ;;  %v1885_v29 = vld [vmem:[#allocation10 + $0x1600] sm:$0xff]  ;;  %v1912_v50 = vld [vmem:[#allocation10 + $0x16d8] sm:$0xff] }
 0x38e   : > { %3673 = vmatpush1.bf16.msra.mxu1 %v3672_v1  ;;  %3929 = vmatpush1.bf16.msra.mxu0 %v3928_v3  ;;  %v1774_v1 = vld [vmem:[#allocation10 + $0x1288] sm:$0xff]  ;;  %v1901_v54 = vld [vmem:[#allocation10 + $0x1680] sm:$0xff] }
 0x38f   : > { %3675 = vmatprep.subr.bf16.mxu1 %v3674_v4  ;;  %3931 = vmatprep.subr.bf16.mxu0 %v3930_v5  ;;  %v1782_v3 = vld [vmem:[#allocation10 + $0x12c8] sm:$0xff]  ;;  %v1776_v4 = vld [vmem:[#allocation10 + $0x1298] sm:$0xff] }
 0x390   : > { %v1784_v5 = vld [vmem:[#allocation10 + $0x12d8] sm:$0xff]  ;;  %v3694_v8 = vpack.c.bf16 %v1782_v3, %v1774_v1  ;;  %v1845_v1 = vld [vmem:[#allocation10 + $0x14c0] sm:$0xff]  ;;  %v1839_v3 = vld [vmem:[#allocation10 + $0x1490] sm:$0xff] }
 0x391   : > { %2341 = vmatmul.mubr.f32.vlgmr.msra.gmra.mrb[12].mxu1 %v5306_v16  ;;  %2625 = vmatmul.mubr.f32.vlgmr.msra.gmra.mrb[8].mxu0 %v5306_v16  ;;  %v3950_v13 = vpack.c.bf16 %v1784_v5, %v1776_v4  ;;  %v1847_v5 = vld [vmem:[#allocation10 + $0x14d0] sm:$0xff]  ;;  %v3712_v11 = vpack.c.bf16 %v1845_v1, %v1837_v63  ;;  %v1928_v63 = vld [vmem:[#allocation10 + $0x1758] sm:$0xff] }
 0x392   : > { %3677 = vmatpush1.bf16.msra.mxu1 %v3676_v15  ;;  %2411 = vmatprep.mubr.f32.mxu1 %v5309_v22  ;;  %v1790_v15 = vld [vmem:[#allocation10 + $0x1308] sm:$0xff] }
 0x393   : > { %3933 = vmatpush1.bf16.msra.mxu0 %v3932_v17  ;;  %2695 = vmatprep.mubr.f32.mxu0 %v5309_v22  ;;  %v1798_v17 = vld [vmem:[#allocation10 + $0x1348] sm:$0xff] }
 0x394   : > { %3679 = vmatprep.subr.bf16.mxu1 %v3678_v23  ;;  %3935 = vmatprep.subr.bf16.mxu0 %v3934_v24  ;;  %v3952_v23 = vpack.c.bf16 %v1783_v14, %v1775_v12  ;;  %v3698_v24 = vpack.c.bf16 %v1798_v17, %v1790_v15  ;;  %v3968_v12 = vpack.c.bf16 %v1847_v5, %v1839_v3  ;;  %v1853_v14 = vld [vmem:[#allocation10 + $0x1500] sm:$0xff]  ;;  %v1855_v17 = vld [vmem:[#allocation10 + $0x1510] sm:$0xff] }
 0x395   : > { %v1861_v15 = vld [vmem:[#allocation10 + $0x1540] sm:$0xff]  ;;  %v3972_v28 = vpack.c.bf16 %v1863_v20, %v1855_v17 }
 0x396   : > { %3681 = vmatpush1.bf16.msra.mxu1 %v3680_v31  ;;  %v1806_v31 = vld [vmem:[#allocation10 + $0x1388] sm:$0xff]  ;;  %v3716_v27 = vpack.c.bf16 %v1861_v15, %v1853_v14  ;;  %v1917_v5 = vld [vmem:[#allocation10 + $0x1700] sm:$0xff]  ;;  %v1944_v14 = vld [vmem:[#allocation10 + $0x17d8] sm:$0xff] }
 0x397   : > { %3937 = vmatpush1.bf16.msra.mxu0 %v3936_v9  ;;  %3683 = vmatprep.subr.bf16.mxu1 %v3682_v32  ;;  %v1814_v9 = vld [vmem:[#allocation10 + $0x13c8] sm:$0xff]  ;;  %v1808_v32 = vld [vmem:[#allocation10 + $0x1398] sm:$0xff]  ;;  %v1933_v20 = vld [vmem:[#allocation10 + $0x1780] sm:$0xff] }
 0x398   : > { %3939 = vmatprep.subr.bf16.mxu0 %v3938_v36  ;;  %v3702_v36 = vpack.c.bf16 %v1814_v9, %v1806_v31  ;;  %v3958_v40 = vpack.c.bf16 %v1816_v33, %v1808_v32  ;;  %v1877_v31 = vld [vmem:[#allocation10 + $0x15c0] sm:$0xff]  ;;  %v1871_v9 = vld [vmem:[#allocation10 + $0x1590] sm:$0xff] }
 0x399   : > { %v1879_v33 = vld [vmem:[#allocation10 + $0x15d0] sm:$0xff]  ;;  %v3720_v38 = vpack.c.bf16 %v1877_v31, %v1869_v30  ;;  %v1960_v30 = vld [vmem:[#allocation10 + $0x1858] sm:$0xff] }
 0x39a   : > { %3685 = vmatpush1.bf16.msra.mxu1 %v3684_v0  ;;  %v1822_v0 = vld [vmem:[#allocation10 + $0x1408] sm:$0xff]  ;;  %v3976_v39 = vpack.c.bf16 %v1879_v33, %v1871_v9  ;;  %v1949_v33 = vld [vmem:[#allocation10 + $0x1800] sm:$0xff] }
 0x39b   : > { %3941 = vmatpush1.bf16.msra.mxu0 %v3940_v42  ;;  %3687 = vmatprep.subr.bf16.mxu1 %v3686_v43  ;;  %v1830_v42 = vld [vmem:[#allocation10 + $0x1448] sm:$0xff]  ;;  %v1824_v43 = vld [vmem:[#allocation10 + $0x1418] sm:$0xff] }
 0x39c   : > { %3943 = vmatprep.subr.bf16.mxu0 %v3942_v49  ;;  %v3706_v49 = vpack.c.bf16 %v1830_v42, %v1822_v0  ;;  %v3962_v53 = vpack.c.bf16 %v1832_v44, %v1824_v43  ;;  %v1893_v0 = vld [vmem:[#allocation10 + $0x1640] sm:$0xff]  ;;  %v1887_v42 = vld [vmem:[#allocation10 + $0x1610] sm:$0xff] }
 0x39d   : > { %v1895_v44 = vld [vmem:[#allocation10 + $0x1650] sm:$0xff]  ;;  %v3724_v51 = vpack.c.bf16 %v1893_v0, %v1885_v29  ;;  %v1968_v29 = vld [vmem:[#allocation10 + $0x1898] sm:$0xff] }
 0x39e   : > { %3689 = vmatpush1.bf16.msra.mxu1 %v3688_v55  ;;  %v1838_v55 = vld [vmem:[#allocation10 + $0x1488] sm:$0xff]  ;;  %v3980_v52 = vpack.c.bf16 %v1895_v44, %v1887_v42  ;;  %v1976_v0 = vld [vmem:[#allocation10 + $0x18d8] sm:$0xff]  ;;  %v5316_v42 = vmax.f32 %v5292_v2, 0.0  ;;  %v1965_v44 = vld [vmem:[#allocation10 + $0x1880] sm:$0xff] }
 0x39f   : > { %3945 = vmatpush1.bf16.msra.mxu0 %v3944_v56  ;;  %3691 = vmatprep.subr.bf16.mxu1 %v3690_v57  ;;  %v1846_v56 = vld [vmem:[#allocation10 + $0x14c8] sm:$0xff]  ;;  %v1840_v57 = vld [vmem:[#allocation10 + $0x1498] sm:$0xff] }
 0x3a0   : > { %3947 = vmatprep.subr.bf16.mxu0 %v3946_v62  ;;  %v3710_v62 = vpack.c.bf16 %v1846_v56, %v1838_v55  ;;  %v3966_v4 = vpack.c.bf16 %v1848_v58, %v1840_v57  ;;  %v1909_v55 = vld [vmem:[#allocation10 + $0x16c0] sm:$0xff]  ;;  %v1903_v56 = vld [vmem:[#allocation10 + $0x1690] sm:$0xff]  ;;  %v1992_v2 = vld [vmem:[#allocation10 + $0x1958] sm:$0xff] }
 0x3a1   : > { %v1911_v58 = vld [vmem:[#allocation10 + $0x16d0] sm:$0xff]  ;;  %v3728_v1 = vpack.c.bf16 %v1909_v55, %v1901_v54  ;;  %v3998_v54 = vpack.c.bf16 %v1976_v0, %v1968_v29  ;;  %v1984_v55 = vld [vmem:[#allocation10 + $0x1918] sm:$0xff]  ;;  %v2046_v0 = vld [vmem:[#allocation10 + $0x1b08] sm:$0xff] }
 0x3a2   : > { %3693 = vmatpush1.bf16.msra.mxu1 %v3692_v6  ;;  %v1854_v6 = vld [vmem:[#allocation10 + $0x1508] sm:$0xff]  ;;  %v3984_v3 = vpack.c.bf16 %v1911_v58, %v1903_v56  ;;  %v2039_v29 = vld [vmem:[#allocation10 + $0x1ad0] sm:$0xff] }
 0x3a3   : > { %3949 = vmatpush1.bf16.msra.mxu0 %v3948_v7  ;;  %3695 = vmatprep.subr.bf16.mxu1 %v3694_v8  ;;  %v1862_v7 = vld [vmem:[#allocation10 + $0x1548] sm:$0xff]  ;;  %v1856_v8 = vld [vmem:[#allocation10 + $0x1518] sm:$0xff] }
 0x3a4   : > { %3951 = vmatprep.subr.bf16.mxu0 %v3950_v13  ;;  %v3714_v13 = vpack.c.bf16 %v1862_v7, %v1854_v6  ;;  %v3970_v19 = vpack.c.bf16 %v1864_v10, %v1856_v8  ;;  %v1925_v6 = vld [vmem:[#allocation10 + $0x1740] sm:$0xff]  ;;  %v1919_v7 = vld [vmem:[#allocation10 + $0x1710] sm:$0xff] }
 0x3a5   : > { %v1927_v10 = vld [vmem:[#allocation10 + $0x1750] sm:$0xff]  ;;  %v3732_v15 = vpack.c.bf16 %v1925_v6, %v1917_v5  ;;  %v2008_v5 = vld [vmem:[#allocation10 + $0x19d8] sm:$0xff] }
 0x3a6   : > { %3697 = vmatpush1.bf16.msra.mxu1 %v3696_v21  ;;  %v1870_v21 = vld [vmem:[#allocation10 + $0x1588] sm:$0xff]  ;;  %v3988_v17 = vpack.c.bf16 %v1927_v10, %v1919_v7  ;;  %v1997_v10 = vld [vmem:[#allocation10 + $0x1980] sm:$0xff] }
 0x3a7   : > { %3953 = vmatpush1.bf16.msra.mxu0 %v3952_v23  ;;  %3699 = vmatprep.subr.bf16.mxu1 %v3698_v24  ;;  %v1878_v23 = vld [vmem:[#allocation10 + $0x15c8] sm:$0xff]  ;;  %v1872_v24 = vld [vmem:[#allocation10 + $0x1598] sm:$0xff] }
 0x3a8   : > { %3955 = vmatprep.subr.bf16.mxu0 %v3954_v48  ;;  %v3718_v48 = vpack.c.bf16 %v1878_v23, %v1870_v21  ;;  %v3974_v32 = vpack.c.bf16 %v1880_v26, %v1872_v24  ;;  %v1941_v21 = vld [vmem:[#allocation10 + $0x17c0] sm:$0xff]  ;;  %v1935_v23 = vld [vmem:[#allocation10 + $0x1790] sm:$0xff] }
 0x3a9   : > { %v1943_v26 = vld [vmem:[#allocation10 + $0x17d0] sm:$0xff]  ;;  %v3736_v31 = vpack.c.bf16 %v1941_v21, %v1933_v20  ;;  %v2024_v20 = vld [vmem:[#allocation10 + $0x1a58] sm:$0xff] }
 0x3aa   : > { %3701 = vmatpush1.bf16.msra.mxu1 %v3700_v34  ;;  %v1886_v34 = vld [vmem:[#allocation10 + $0x1608] sm:$0xff]  ;;  %v3992_v9 = vpack.c.bf16 %v1943_v26, %v1935_v23  ;;  %v2013_v26 = vld [vmem:[#allocation10 + $0x1a00] sm:$0xff] }
 0x3ab   : > { %3957 = vmatpush1.bf16.msra.mxu0 %v3956_v35  ;;  %3703 = vmatprep.subr.bf16.mxu1 %v3702_v36  ;;  %v1894_v35 = vld [vmem:[#allocation10 + $0x1648] sm:$0xff]  ;;  %v1888_v36 = vld [vmem:[#allocation10 + $0x1618] sm:$0xff] }
 0x3ac   : > { %3959 = vmatprep.subr.bf16.mxu0 %v3958_v40  ;;  %v3722_v40 = vpack.c.bf16 %v1894_v35, %v1886_v34  ;;  %v3978_v43 = vpack.c.bf16 %v1896_v37, %v1888_v36  ;;  %v1957_v34 = vld [vmem:[#allocation10 + $0x1840] sm:$0xff]  ;;  %v1951_v36 = vld [vmem:[#allocation10 + $0x1810] sm:$0xff] }
 0x3ad   : > { %v1959_v37 = vld [vmem:[#allocation10 + $0x1850] sm:$0xff] }
 0x3ae   : > { %3705 = vmatpush1.bf16.msra.mxu1 %v3704_v45  ;;  %v1902_v45 = vld [vmem:[#allocation10 + $0x1688] sm:$0xff] }
 0x3af   : > { %3961 = vmatpush1.bf16.msra.mxu0 %v3960_v46  ;;  %3707 = vmatprep.subr.bf16.mxu1 %v3706_v49  ;;  %v1910_v46 = vld [vmem:[#allocation10 + $0x16c8] sm:$0xff]  ;;  %v1904_v49 = vld [vmem:[#allocation10 + $0x1698] sm:$0xff] }
 0x3b0   : > { %3963 = vmatprep.subr.bf16.mxu0 %v3962_v53  ;;  %v3726_v53 = vpack.c.bf16 %v1910_v46, %v1902_v45  ;;  %v3982_v57 = vpack.c.bf16 %v1912_v50, %v1904_v49  ;;  %v1973_v45 = vld [vmem:[#allocation10 + $0x18c0] sm:$0xff]  ;;  %v1967_v46 = vld [vmem:[#allocation10 + $0x1890] sm:$0xff] }
 0x3b1   : > { %v1975_v50 = vld [vmem:[#allocation10 + $0x18d0] sm:$0xff]  ;;  %v3744_v56 = vpack.c.bf16 %v1973_v45, %v1965_v44  ;;  %v2048_v44 = vld [vmem:[#allocation10 + $0x1b18] sm:$0xff] }
 0x3b2   : > { %3709 = vmatpush1.bf16.msra.mxu1 %v3708_v60  ;;  %v1918_v60 = vld [vmem:[#allocation10 + $0x1708] sm:$0xff]  ;;  %v2056_v45 = vld [vmem:[#allocation10 + $0x1b58] sm:$0xff] }
 0x3b3   : > { %3965 = vmatpush1.bf16.msra.mxu0 %v3964_v61  ;;  %3711 = vmatprep.subr.bf16.mxu1 %v3710_v62  ;;  %v1926_v61 = vld [vmem:[#allocation10 + $0x1748] sm:$0xff]  ;;  %v1920_v62 = vld [vmem:[#allocation10 + $0x1718] sm:$0xff] }
 0x3b4   : > { %3967 = vmatprep.subr.bf16.mxu0 %v3966_v4  ;;  %v3730_v4 = vpack.c.bf16 %v1926_v61, %v1918_v60  ;;  %v3986_v8 = vpack.c.bf16 %v1928_v63, %v1920_v62  ;;  %v1981_v60 = vld [vmem:[#allocation10 + $0x1900] sm:$0xff]  ;;  %v1983_v62 = vld [vmem:[#allocation10 + $0x1910] sm:$0xff] }
 0x3b5   : > { %v1989_v61 = vld [vmem:[#allocation10 + $0x1940] sm:$0xff]  ;;  %v1991_v63 = vld [vmem:[#allocation10 + $0x1950] sm:$0xff] }
 0x3b6   : > { %3713 = vmatpush1.bf16.msra.mxu1 %v3712_v11  ;;  %v1934_v11 = vld [vmem:[#allocation10 + $0x1788] sm:$0xff]  ;;  %v3748_v6 = vpack.c.bf16 %v1989_v61, %v1981_v60  ;;  %v4004_v7 = vpack.c.bf16 %v1991_v63, %v1983_v62  ;;  %v2072_v60 = vld [vmem:[#allocation10 + $0x1bd8] sm:$0xff]  ;;  %v2061_v63 = vld [vmem:[#allocation10 + $0x1b80] sm:$0xff] }
 0x3b7   : > { %3969 = vmatpush1.bf16.msra.mxu0 %v3968_v12  ;;  %3715 = vmatprep.subr.bf16.mxu1 %v3714_v13  ;;  %v1942_v12 = vld [vmem:[#allocation10 + $0x17c8] sm:$0xff]  ;;  %v1936_v13 = vld [vmem:[#allocation10 + $0x1798] sm:$0xff] }
 0x3b8   : > { %3971 = vmatprep.subr.bf16.mxu0 %v3970_v19  ;;  %v3734_v19 = vpack.c.bf16 %v1942_v12, %v1934_v11  ;;  %v3990_v24 = vpack.c.bf16 %v1944_v14, %v1936_v13  ;;  %v2005_v11 = vld [vmem:[#allocation10 + $0x19c0] sm:$0xff]  ;;  %v1999_v12 = vld [vmem:[#allocation10 + $0x1990] sm:$0xff] }
 0x3b9   : > { %v2007_v14 = vld [vmem:[#allocation10 + $0x19d0] sm:$0xff]  ;;  %v3752_v21 = vpack.c.bf16 %v2005_v11, %v1997_v10  ;;  %v2088_v10 = vld [vmem:[#allocation10 + $0x1c58] sm:$0xff] }
 0x3ba   : > { %3717 = vmatpush1.bf16.msra.mxu1 %v3716_v27  ;;  %v1950_v27 = vld [vmem:[#allocation10 + $0x1808] sm:$0xff]  ;;  %v4008_v23 = vpack.c.bf16 %v2007_v14, %v1999_v12  ;;  %v2077_v14 = vld [vmem:[#allocation10 + $0x1c00] sm:$0xff] }
 0x3bb   : > { %3973 = vmatpush1.bf16.msra.mxu0 %v3972_v28  ;;  %3719 = vmatprep.subr.bf16.mxu1 %v3718_v48  ;;  %v1958_v28 = vld [vmem:[#allocation10 + $0x1848] sm:$0xff]  ;;  %v1952_v48 = vld [vmem:[#allocation10 + $0x1818] sm:$0xff] }
 0x3bc   : > { %3975 = vmatprep.subr.bf16.mxu0 %v3974_v32  ;;  %v3738_v32 = vpack.c.bf16 %v1958_v28, %v1950_v27  ;;  %v3994_v35 = vpack.c.bf16 %v1960_v30, %v1952_v48  ;;  %v2021_v27 = vld [vmem:[#allocation10 + $0x1a40] sm:$0xff]  ;;  %v2015_v28 = vld [vmem:[#allocation10 + $0x1a10] sm:$0xff] }
 0x3bd   : > { %v2023_v30 = vld [vmem:[#allocation10 + $0x1a50] sm:$0xff] }
 0x3be   : > { %3721 = vmatpush1.bf16.msra.mxu1 %v3720_v38  ;;  %v1966_v38 = vld [vmem:[#allocation10 + $0x1888] sm:$0xff] }
 0x3bf   : > { %3977 = vmatpush1.bf16.msra.mxu0 %v3976_v39  ;;  %3723 = vmatprep.subr.bf16.mxu1 %v3722_v40  ;;  %v1974_v39 = vld [vmem:[#allocation10 + $0x18c8] sm:$0xff]  ;;  %v3740_v40 = vpack.c.bf16 %v1957_v34, %v1949_v33  ;;  %v2040_v33 = vld [vmem:[#allocation10 + $0x1ad8] sm:$0xff]  ;;  %v3756_v34 = vpack.c.bf16 %v2021_v27, %v2013_v26 }
 0x3c0   : > { %3979 = vmatprep.subr.bf16.mxu0 %v3978_v43  ;;  %v3996_v43 = vpack.c.bf16 %v1959_v37, %v1951_v36  ;;  %v3742_v49 = vpack.c.bf16 %v1974_v39, %v1966_v38  ;;  %v2029_v37 = vld [vmem:[#allocation10 + $0x1a80] sm:$0xff]  ;;  %v2031_v39 = vld [vmem:[#allocation10 + $0x1a90] sm:$0xff]  ;;  %v2104_v26 = vld [vmem:[#allocation10 + $0x1cd8] sm:$0xff] }
 0x3c1   : > { %v2037_v38 = vld [vmem:[#allocation10 + $0x1ac0] sm:$0xff] }
 0x3c2   : > { %3725 = vmatpush1.bf16.msra.mxu1 %v3724_v51  ;;  %v1982_v51 = vld [vmem:[#allocation10 + $0x1908] sm:$0xff] }
 0x3c3   : > { %3981 = vmatpush1.bf16.msra.mxu0 %v3980_v52  ;;  %3727 = vmatprep.subr.bf16.mxu1 %v3726_v53  ;;  %v1990_v52 = vld [vmem:[#allocation10 + $0x1948] sm:$0xff]  ;;  %v5319_v53 = vmax.f32 %v5303_v25, 0.0  ;;  %v4002_v25 = vpack.c.bf16 %v1992_v2, %v1984_v55  ;;  %v4018_v55 = vpack.c.bf16 %v2056_v45, %v2048_v44  ;;  %v2055_v2 = vld [vmem:[#allocation10 + $0x1b50] sm:$0xff] }
 0x3c4   : > { %3983 = vmatprep.subr.bf16.mxu0 %v3982_v57  ;;  %v4000_v57 = vpack.c.bf16 %v1975_v50, %v1967_v46  ;;  %v3746_v58 = vpack.c.bf16 %v1990_v52, %v1982_v51  ;;  %v3760_v46 = vpack.c.bf16 %v2037_v38, %v2029_v37  ;;  %v2045_v51 = vld [vmem:[#allocation10 + $0x1b00] sm:$0xff]  ;;  %v2120_v37 = vld [vmem:[#allocation10 + $0x1d58] sm:$0xff]  ;;  %v2119_v45 = vld [vmem:[#allocation10 + $0x1d50] sm:$0xff] }
 0x3c5   : > { %v2053_v52 = vld [vmem:[#allocation10 + $0x1b40] sm:$0xff] }
 0x3c6   : > { %3729 = vmatpush1.bf16.msra.mxu1 %v3728_v1  ;;  %v1998_v1 = vld [vmem:[#allocation10 + $0x1988] sm:$0xff]  ;;  %v3764_v61 = vpack.c.bf16 %v2053_v52, %v2045_v51  ;;  %v2136_v51 = vld [vmem:[#allocation10 + $0x1dd8] sm:$0xff] }
 0x3c7   : > { %3985 = vmatpush1.bf16.msra.mxu0 %v3984_v3  ;;  %3731 = vmatprep.subr.bf16.mxu1 %v3730_v4  ;;  %v2006_v3 = vld [vmem:[#allocation10 + $0x19c8] sm:$0xff]  ;;  %v2000_v4 = vld [vmem:[#allocation10 + $0x1998] sm:$0xff] }
 0x3c8   : > { %3987 = vmatprep.subr.bf16.mxu0 %v3986_v8  ;;  %v3750_v8 = vpack.c.bf16 %v2006_v3, %v1998_v1  ;;  %v4006_v13 = vpack.c.bf16 %v2008_v5, %v2000_v4  ;;  %v2069_v1 = vld [vmem:[#allocation10 + $0x1bc0] sm:$0xff]  ;;  %v2063_v3 = vld [vmem:[#allocation10 + $0x1b90] sm:$0xff] }
 0x3c9   : > { %v2071_v5 = vld [vmem:[#allocation10 + $0x1bd0] sm:$0xff]  ;;  %v3768_v11 = vpack.c.bf16 %v2069_v1, %v2061_v63  ;;  %v2152_v63 = vld [vmem:[#allocation10 + $0x1e58] sm:$0xff] }
 0x3ca   : > { %3733 = vmatpush1.bf16.msra.mxu1 %v3732_v15  ;;  %v2014_v15 = vld [vmem:[#allocation10 + $0x1a08] sm:$0xff]  ;;  %v4024_v12 = vpack.c.bf16 %v2071_v5, %v2063_v3  ;;  %v2141_v5 = vld [vmem:[#allocation10 + $0x1e00] sm:$0xff] }
 0x3cb   : > { %3989 = vmatpush1.bf16.msra.mxu0 %v3988_v17  ;;  %3735 = vmatprep.subr.bf16.mxu1 %v3734_v19  ;;  %v2022_v17 = vld [vmem:[#allocation10 + $0x1a48] sm:$0xff]  ;;  %v2016_v19 = vld [vmem:[#allocation10 + $0x1a18] sm:$0xff] }
 0x3cc   : > { %3991 = vmatprep.subr.bf16.mxu0 %v3990_v24  ;;  %v3754_v24 = vpack.c.bf16 %v2022_v17, %v2014_v15  ;;  %v4010_v48 = vpack.c.bf16 %v2024_v20, %v2016_v19  ;;  %v2085_v15 = vld [vmem:[#allocation10 + $0x1c40] sm:$0xff]  ;;  %v2079_v17 = vld [vmem:[#allocation10 + $0x1c10] sm:$0xff] }
 0x3cd   : > { %v2087_v20 = vld [vmem:[#allocation10 + $0x1c50] sm:$0xff]  ;;  %v3772_v27 = vpack.c.bf16 %v2085_v15, %v2077_v14  ;;  %v2168_v14 = vld [vmem:[#allocation10 + $0x1ed8] sm:$0xff] }
 0x3ce   : > { %3737 = vmatpush1.bf16.msra.mxu1 %v3736_v31  ;;  %v2030_v31 = vld [vmem:[#allocation10 + $0x1a88] sm:$0xff] }
 0x3cf   : > { %3993 = vmatpush1.bf16.msra.mxu0 %v3992_v9  ;;  %3739 = vmatprep.subr.bf16.mxu1 %v3738_v32  ;;  %v2038_v9 = vld [vmem:[#allocation10 + $0x1ac8] sm:$0xff]  ;;  %v2032_v32 = vld [vmem:[#allocation10 + $0x1a98] sm:$0xff] }
 0x3d0   : > { %3995 = vmatprep.subr.bf16.mxu0 %v3994_v35  ;;  %v4012_v35 = vpack.c.bf16 %v2023_v30, %v2015_v28  ;;  %v3758_v36 = vpack.c.bf16 %v2038_v9, %v2030_v31  ;;  %v4028_v28 = vpack.c.bf16 %v2087_v20, %v2079_v17  ;;  %v2093_v30 = vld [vmem:[#allocation10 + $0x1c80] sm:$0xff]  ;;  %v2095_v9 = vld [vmem:[#allocation10 + $0x1c90] sm:$0xff] }
 0x3d1   : > { %2412 = vmatmul.mubr.f32.vlgmr.msra.gmra.mrb[12].mxu1 %v5316_v42  ;;  %v2101_v31 = vld [vmem:[#allocation10 + $0x1cc0] sm:$0xff] }
 0x3d2   : > { %2696 = vmatmul.mubr.f32.vlgmr.msra.gmra.mrb[8].mxu0 %v5316_v42  ;;  %3741 = vmatpush1.bf16.msra.mxu1 %v3740_v40  ;;  %v4014_v40 = vpack.c.bf16 %v2040_v33, %v2032_v32  ;;  %v2103_v33 = vld [vmem:[#allocation10 + $0x1cd0] sm:$0xff]  ;;  %v3776_v38 = vpack.c.bf16 %v2101_v31, %v2093_v30  ;;  %v2157_v20 = vld [vmem:[#allocation10 + $0x1e80] sm:$0xff]  ;;  %v2184_v30 = vld [vmem:[#allocation10 + $0x1f58] sm:$0xff] }
 0x3d3   : > { %2482 = vmatprep.mubr.f32.mxu1 %v5319_v53  ;;  %3997 = vmatpush1.bf16.msra.mxu0 %v3996_v43  ;;  %v2054_v43 = vld [vmem:[#allocation10 + $0x1b48] sm:$0xff] }
 0x3d4   : > { %2766 = vmatprep.mubr.f32.mxu0 %v5319_v53  ;;  %3743 = vmatprep.subr.bf16.mxu1 %v3742_v49  ;;  %v4016_v49 = vpack.c.bf16 %v2039_v29, %v2031_v39  ;;  %v3762_v50 = vpack.c.bf16 %v2054_v43, %v2046_v0  ;;  %v4032_v39 = vpack.c.bf16 %v2103_v33, %v2095_v9  ;;  %v2109_v29 = vld [vmem:[#allocation10 + $0x1d00] sm:$0xff]  ;;  %v2111_v43 = vld [vmem:[#allocation10 + $0x1d10] sm:$0xff] }
 0x3d5   : > { %3999 = vmatprep.subr.bf16.mxu0 %v3998_v54  ;;  %v2047_v54 = vld [vmem:[#allocation10 + $0x1b10] sm:$0xff]  ;;  %v2117_v0 = vld [vmem:[#allocation10 + $0x1d40] sm:$0xff] }
 0x3d6   : > { %3745 = vmatpush1.bf16.msra.mxu1 %v3744_v56  ;;  %v2062_v56 = vld [vmem:[#allocation10 + $0x1b88] sm:$0xff]  ;;  %v4020_v62 = vpack.c.bf16 %v2055_v2, %v2047_v54  ;;  %v3780_v52 = vpack.c.bf16 %v2117_v0, %v2109_v29  ;;  %v4036_v54 = vpack.c.bf16 %v2119_v45, %v2111_v43  ;;  %v2125_v2 = vld [vmem:[#allocation10 + $0x1d80] sm:$0xff]  ;;  %v2200_v29 = vld [vmem:[#allocation10 + $0x1fd8] sm:$0xff] }
 0x3d7   : > { %4001 = vmatpush1.bf16.msra.mxu0 %v4000_v57  ;;  %3747 = vmatprep.subr.bf16.mxu1 %v3746_v58  ;;  %v2070_v57 = vld [vmem:[#allocation10 + $0x1bc8] sm:$0xff]  ;;  %v2064_v58 = vld [vmem:[#allocation10 + $0x1b98] sm:$0xff]  ;;  %v2173_v33 = vld [vmem:[#allocation10 + $0x1f00] sm:$0xff] }
 0x3d8   : > { %4003 = vmatprep.subr.bf16.mxu0 %v4002_v25  ;;  %v3766_v25 = vpack.c.bf16 %v2070_v57, %v2062_v56  ;;  %v4022_v4 = vpack.c.bf16 %v2072_v60, %v2064_v58  ;;  %v2133_v56 = vld [vmem:[#allocation10 + $0x1dc0] sm:$0xff]  ;;  %v2127_v57 = vld [vmem:[#allocation10 + $0x1d90] sm:$0xff] }
 0x3d9   : > { %v2135_v60 = vld [vmem:[#allocation10 + $0x1dd0] sm:$0xff]  ;;  %v3784_v1 = vpack.c.bf16 %v2133_v56, %v2125_v2  ;;  %v2189_v45 = vld [vmem:[#allocation10 + $0x1f80] sm:$0xff]  ;;  %v1196_v2 = vld [vmem:[#allocation10 + $0x78] sm:$0xff] }
 0x3da   : > { %3749 = vmatpush1.bf16.msra.mxu1 %v3748_v6  ;;  %v2078_v6 = vld [vmem:[#allocation10 + $0x1c08] sm:$0xff]  ;;  %v4040_v3 = vpack.c.bf16 %v2135_v60, %v2127_v57  ;;  %v1185_v60 = vld [vmem:[#allocation10 + $0x20] sm:$0xff] }
 0x3db   : > { %4005 = vmatpush1.bf16.msra.mxu0 %v4004_v7  ;;  %3751 = vmatprep.subr.bf16.mxu1 %v3750_v8  ;;  %v2086_v7 = vld [vmem:[#allocation10 + $0x1c48] sm:$0xff]  ;;  %v2080_v8 = vld [vmem:[#allocation10 + $0x1c18] sm:$0xff] }
 0x3dc   : > { %4007 = vmatprep.subr.bf16.mxu0 %v4006_v13  ;;  %v3770_v13 = vpack.c.bf16 %v2086_v7, %v2078_v6  ;;  %v4026_v19 = vpack.c.bf16 %v2088_v10, %v2080_v8  ;;  %v2149_v6 = vld [vmem:[#allocation10 + $0x1e40] sm:$0xff]  ;;  %v2143_v7 = vld [vmem:[#allocation10 + $0x1e10] sm:$0xff] }
 0x3dd   : > { %v2151_v10 = vld [vmem:[#allocation10 + $0x1e50] sm:$0xff]  ;;  %v3788_v15 = vpack.c.bf16 %v2149_v6, %v2141_v5  ;;  %v1204_v5 = vld [vmem:[#allocation10 + $0xb8] sm:$0xff] }
 0x3de   : > { %3753 = vmatpush1.bf16.msra.mxu1 %v3752_v21  ;;  %v2094_v21 = vld [vmem:[#allocation10 + $0x1c88] sm:$0xff]  ;;  %v4044_v17 = vpack.c.bf16 %v2151_v10, %v2143_v7  ;;  %v1212_v6 = vld [vmem:[#allocation10 + $0xf8] sm:$0xff]  ;;  %v5326_v7 = vmax.f32 %v5300_v18, 0.0  ;;  %v1201_v10 = vld [vmem:[#allocation10 + $0xa0] sm:$0xff] }
 0x3df   : > { %4009 = vmatpush1.bf16.msra.mxu0 %v4008_v23  ;;  %3755 = vmatprep.subr.bf16.mxu1 %v3754_v24  ;;  %v2102_v23 = vld [vmem:[#allocation10 + $0x1cc8] sm:$0xff]  ;;  %v2096_v24 = vld [vmem:[#allocation10 + $0x1c98] sm:$0xff] }
 0x3e0   : > { %4011 = vmatprep.subr.bf16.mxu0 %v4010_v48  ;;  %v3774_v48 = vpack.c.bf16 %v2102_v23, %v2094_v21  ;;  %v4030_v32 = vpack.c.bf16 %v2104_v26, %v2096_v24  ;;  %v2165_v21 = vld [vmem:[#allocation10 + $0x1ec0] sm:$0xff]  ;;  %v2159_v23 = vld [vmem:[#allocation10 + $0x1e90] sm:$0xff] }
 0x3e1   : > { %v2167_v26 = vld [vmem:[#allocation10 + $0x1ed0] sm:$0xff]  ;;  %v3792_v31 = vpack.c.bf16 %v2165_v21, %v2157_v20  ;;  %v1220_v20 = vld [vmem:[#allocation10 + $0x138] sm:$0xff] }
 0x3e2   : > { %3757 = vmatpush1.bf16.msra.mxu1 %v3756_v34  ;;  %v2110_v34 = vld [vmem:[#allocation10 + $0x1d08] sm:$0xff]  ;;  %v4048_v9 = vpack.c.bf16 %v2167_v26, %v2159_v23  ;;  %v1228_v21 = vld [vmem:[#allocation10 + $0x178] sm:$0xff]  ;;  %v1217_v26 = vld [vmem:[#allocation10 + $0x120] sm:$0xff] }
 0x3e3   : > { %4013 = vmatpush1.bf16.msra.mxu0 %v4012_v35  ;;  %3759 = vmatprep.subr.bf16.mxu1 %v3758_v36  ;;  %v2118_v35 = vld [vmem:[#allocation10 + $0x1d48] sm:$0xff]  ;;  %v2112_v36 = vld [vmem:[#allocation10 + $0x1d18] sm:$0xff] }
 0x3e4   : > { %4015 = vmatprep.subr.bf16.mxu0 %v4014_v40  ;;  %v3778_v40 = vpack.c.bf16 %v2118_v35, %v2110_v34  ;;  %v4034_v44 = vpack.c.bf16 %v2120_v37, %v2112_v36  ;;  %v2181_v34 = vld [vmem:[#allocation10 + $0x1f40] sm:$0xff]  ;;  %v2175_v35 = vld [vmem:[#allocation10 + $0x1f10] sm:$0xff] }
 0x3e5   : > { %v2183_v37 = vld [vmem:[#allocation10 + $0x1f50] sm:$0xff]  ;;  %v3796_v0 = vpack.c.bf16 %v2181_v34, %v2173_v33  ;;  %v1244_v33 = vld [vmem:[#allocation10 + $0x1f8] sm:$0xff] }
 0x3e6   : > { %3761 = vmatpush1.bf16.msra.mxu1 %v3760_v46  ;;  %v2126_v46 = vld [vmem:[#allocation10 + $0x1d88] sm:$0xff]  ;;  %v4052_v43 = vpack.c.bf16 %v2183_v37, %v2175_v35  ;;  %v1233_v37 = vld [vmem:[#allocation10 + $0x1a0] sm:$0xff] }
 0x3e7   : > { %4017 = vmatpush1.bf16.msra.mxu0 %v4016_v49  ;;  %3763 = vmatprep.subr.bf16.mxu1 %v3762_v50  ;;  %v2134_v49 = vld [vmem:[#allocation10 + $0x1dc8] sm:$0xff]  ;;  %v2128_v50 = vld [vmem:[#allocation10 + $0x1d98] sm:$0xff] }
 0x3e8   : > { %4019 = vmatprep.subr.bf16.mxu0 %v4018_v55  ;;  %v3782_v55 = vpack.c.bf16 %v2134_v49, %v2126_v46  ;;  %v4038_v58 = vpack.c.bf16 %v2136_v51, %v2128_v50  ;;  %v2197_v46 = vld [vmem:[#allocation10 + $0x1fc0] sm:$0xff]  ;;  %v2191_v49 = vld [vmem:[#allocation10 + $0x1f90] sm:$0xff] }
 0x3e9   : > { %v2199_v51 = vld [vmem:[#allocation10 + $0x1fd0] sm:$0xff]  ;;  %v3800_v56 = vpack.c.bf16 %v2197_v46, %v2189_v45 }
 0x3ea   : > { %3765 = vmatpush1.bf16.msra.mxu1 %v3764_v61  ;;  %v2142_v61 = vld [vmem:[#allocation10 + $0x1e08] sm:$0xff]  ;;  %v4056_v57 = vpack.c.bf16 %v2199_v51, %v2191_v49  ;;  %v1257_v51 = vld [vmem:[#allocation10 + $0x260] sm:$0xff] }
 0x3eb   : > { %4021 = vmatpush1.bf16.msra.mxu0 %v4020_v62  ;;  %3767 = vmatprep.subr.bf16.mxu1 %v3766_v25  ;;  %v2150_v62 = vld [vmem:[#allocation10 + $0x1e48] sm:$0xff]  ;;  %v2144_v25 = vld [vmem:[#allocation10 + $0x1e18] sm:$0xff] }
 0x3ec   : > { %4023 = vmatprep.subr.bf16.mxu0 %v4022_v4  ;;  %v3786_v4 = vpack.c.bf16 %v2150_v62, %v2142_v61  ;;  %v4042_v8 = vpack.c.bf16 %v2152_v63, %v2144_v25  ;;  %v1193_v61 = vld [vmem:[#allocation10 + $0x60] sm:$0xff]  ;;  %v1187_v25 = vld [vmem:[#allocation10 + $0x30] sm:$0xff] }
 0x3ed   : > { %v1195_v63 = vld [vmem:[#allocation10 + $0x70] sm:$0xff] }
 0x3ee   : > { %3769 = vmatpush1.bf16.msra.mxu1 %v3768_v11  ;;  %v2158_v11 = vld [vmem:[#allocation10 + $0x1e88] sm:$0xff] }
 0x3ef   : > { %4025 = vmatpush1.bf16.msra.mxu0 %v4024_v12  ;;  %3771 = vmatprep.subr.bf16.mxu1 %v3770_v13  ;;  %v2166_v12 = vld [vmem:[#allocation10 + $0x1ec8] sm:$0xff]  ;;  %v2160_v13 = vld [vmem:[#allocation10 + $0x1e98] sm:$0xff] }
 0x3f0   : > { %4027 = vmatprep.subr.bf16.mxu0 %v4026_v19  ;;  %v3790_v19 = vpack.c.bf16 %v2166_v12, %v2158_v11  ;;  %v4046_v24 = vpack.c.bf16 %v2168_v14, %v2160_v13  ;;  %v1209_v11 = vld [vmem:[#allocation10 + $0xe0] sm:$0xff]  ;;  %v1203_v12 = vld [vmem:[#allocation10 + $0xb0] sm:$0xff] }
 0x3f1   : > { %v1211_v14 = vld [vmem:[#allocation10 + $0xf0] sm:$0xff]  ;;  %v4064_v18 = vpack.c.bf16 %v1209_v11, %v1201_v10  ;;  %v1292_v10 = vld [vmem:[#allocation10 + $0x378] sm:$0xff] }
 0x3f2   : > { %3773 = vmatpush1.bf16.msra.mxu1 %v3772_v27  ;;  %v2174_v27 = vld [vmem:[#allocation10 + $0x1f08] sm:$0xff]  ;;  %v4320_v23 = vpack.c.bf16 %v1211_v14, %v1203_v12  ;;  %v1281_v14 = vld [vmem:[#allocation10 + $0x320] sm:$0xff] }
 0x3f3   : > { %4029 = vmatpush1.bf16.msra.mxu0 %v4028_v28  ;;  %3775 = vmatprep.subr.bf16.mxu1 %v3774_v48  ;;  %v2182_v28 = vld [vmem:[#allocation10 + $0x1f48] sm:$0xff]  ;;  %v2176_v48 = vld [vmem:[#allocation10 + $0x1f18] sm:$0xff] }
 0x3f4   : > { %4031 = vmatprep.subr.bf16.mxu0 %v4030_v32  ;;  %v3794_v32 = vpack.c.bf16 %v2182_v28, %v2174_v27  ;;  %v4050_v36 = vpack.c.bf16 %v2184_v30, %v2176_v48  ;;  %v1225_v27 = vld [vmem:[#allocation10 + $0x160] sm:$0xff]  ;;  %v1219_v28 = vld [vmem:[#allocation10 + $0x130] sm:$0xff]  ;;  %v4322_v48 = vpack.c.bf16 %v1228_v21, %v1220_v20  ;;  %v1298_v21 = vld [vmem:[#allocation10 + $0x3a8] sm:$0xff] }
 0x3f5   : > { %v1227_v30 = vld [vmem:[#allocation10 + $0x170] sm:$0xff]  ;;  %v4068_v34 = vpack.c.bf16 %v1225_v27, %v1217_v26 }
 0x3f6   : > { %3777 = vmatpush1.bf16.msra.mxu1 %v3776_v38  ;;  %v2190_v38 = vld [vmem:[#allocation10 + $0x1f88] sm:$0xff]  ;;  %v4324_v35 = vpack.c.bf16 %v1227_v30, %v1219_v28  ;;  %v1291_v20 = vld [vmem:[#allocation10 + $0x370] sm:$0xff]  ;;  %v1305_v30 = vld [vmem:[#allocation10 + $0x3e0] sm:$0xff] }
 0x3f7   : > { %4033 = vmatpush1.bf16.msra.mxu0 %v4032_v39  ;;  %3779 = vmatprep.subr.bf16.mxu1 %v3778_v40  ;;  %v2198_v39 = vld [vmem:[#allocation10 + $0x1fc8] sm:$0xff]  ;;  %v2192_v40 = vld [vmem:[#allocation10 + $0x1f98] sm:$0xff] }
 0x3f8   : > { %4035 = vmatprep.subr.bf16.mxu0 %v4034_v44  ;;  %v3798_v44 = vpack.c.bf16 %v2198_v39, %v2190_v38  ;;  %v4054_v50 = vpack.c.bf16 %v2200_v29, %v2192_v40  ;;  %v1241_v38 = vld [vmem:[#allocation10 + $0x1e0] sm:$0xff]  ;;  %v1235_v39 = vld [vmem:[#allocation10 + $0x1b0] sm:$0xff]  ;;  %v1250_v29 = vld [vmem:[#allocation10 + $0x228] sm:$0xff] }
 0x3f9   : > { %v4072_v45 = vpack.c.bf16 %v1241_v38, %v1233_v37 }
 0x3fa   : > { %3781 = vmatpush1.bf16.msra.mxu1 %v3780_v52  ;;  %v1186_v52 = vld [vmem:[#allocation10 + $0x28] sm:$0xff] }
 0x3fb   : > { %4037 = vmatpush1.bf16.msra.mxu0 %v4036_v54  ;;  %3783 = vmatprep.subr.bf16.mxu1 %v3782_v55  ;;  %v1194_v54 = vld [vmem:[#allocation10 + $0x68] sm:$0xff]  ;;  %v1188_v55 = vld [vmem:[#allocation10 + $0x38] sm:$0xff] }
 0x3fc   : > { %4039 = vmatprep.subr.bf16.mxu0 %v4038_v58  ;;  %v4058_v58 = vpack.c.bf16 %v1194_v54, %v1186_v52  ;;  %v4314_v62 = vpack.c.bf16 %v1196_v2, %v1188_v55  ;;  %v1251_v52 = vld [vmem:[#allocation10 + $0x230] sm:$0xff]  ;;  %v1266_v2 = vld [vmem:[#allocation10 + $0x2a8] sm:$0xff] }
 0x3fd   : > { %v1259_v55 = vld [vmem:[#allocation10 + $0x270] sm:$0xff] }
 0x3fe   : > { %3785 = vmatpush1.bf16.msra.mxu1 %v3784_v1  ;;  %v1202_v1 = vld [vmem:[#allocation10 + $0xa8] sm:$0xff] }
 0x3ff   : > { %4041 = vmatpush1.bf16.msra.mxu0 %v4040_v3  ;;  %3787 = vmatprep.subr.bf16.mxu1 %v3786_v4  ;;  %v1210_v3 = vld [vmem:[#allocation10 + $0xe8] sm:$0xff]  ;;  %v4060_v4 = vpack.c.bf16 %v1193_v61, %v1185_v60  ;;  %v4332_v61 = vpack.c.bf16 %v1259_v55, %v1251_v52  ;;  %v1337_v55 = vld [vmem:[#allocation10 + $0x4e0] sm:$0xff] }
 0x400   : > { %4043 = vmatprep.subr.bf16.mxu0 %v4042_v8  ;;  %v4316_v8 = vpack.c.bf16 %v1195_v63, %v1187_v25  ;;  %v4062_v13 = vpack.c.bf16 %v1210_v3, %v1202_v1  ;;  %v1265_v25 = vld [vmem:[#allocation10 + $0x2a0] sm:$0xff]  ;;  %v1267_v1 = vld [vmem:[#allocation10 + $0x2b0] sm:$0xff] }
 0x401   : > { %v1273_v63 = vld [vmem:[#allocation10 + $0x2e0] sm:$0xff] }
 0x402   : > { %3789 = vmatpush1.bf16.msra.mxu1 %v3788_v15  ;;  %v1218_v15 = vld [vmem:[#allocation10 + $0x128] sm:$0xff]  ;;  %v4080_v11 = vpack.c.bf16 %v1273_v63, %v1265_v25 }
 0x403   : > { %4045 = vmatpush1.bf16.msra.mxu0 %v4044_v17  ;;  %3791 = vmatprep.subr.bf16.mxu1 %v3790_v19  ;;  %v1226_v17 = vld [vmem:[#allocation10 + $0x168] sm:$0xff]  ;;  %v4318_v19 = vpack.c.bf16 %v1212_v6, %v1204_v5 }
 0x404   : > { %4047 = vmatprep.subr.bf16.mxu0 %v4046_v24  ;;  %v4066_v24 = vpack.c.bf16 %v1226_v17, %v1218_v15  ;;  %v1282_v5 = vld [vmem:[#allocation10 + $0x328] sm:$0xff]  ;;  %v1289_v15 = vld [vmem:[#allocation10 + $0x360] sm:$0xff]  ;;  %v1283_v17 = vld [vmem:[#allocation10 + $0x330] sm:$0xff] }
 0x405   : > { %v1290_v6 = vld [vmem:[#allocation10 + $0x368] sm:$0xff]  ;;  %v4084_v26 = vpack.c.bf16 %v1289_v15, %v1281_v14  ;;  %v4340_v27 = vpack.c.bf16 %v1291_v20, %v1283_v17  ;;  %v1369_v20 = vld [vmem:[#allocation10 + $0x5e0] sm:$0xff] }
 0x406   : > { %3793 = vmatpush1.bf16.msra.mxu1 %v3792_v31  ;;  %v1234_v31 = vld [vmem:[#allocation10 + $0x1a8] sm:$0xff] }
 0x407   : > { %4049 = vmatpush1.bf16.msra.mxu0 %v4048_v9  ;;  %3795 = vmatprep.subr.bf16.mxu1 %v3794_v32  ;;  %v1242_v9 = vld [vmem:[#allocation10 + $0x1e8] sm:$0xff]  ;;  %v1236_v32 = vld [vmem:[#allocation10 + $0x1b8] sm:$0xff] }
 0x408   : > { %4051 = vmatprep.subr.bf16.mxu0 %v4050_v36  ;;  %v4070_v36 = vpack.c.bf16 %v1242_v9, %v1234_v31  ;;  %v4326_v40 = vpack.c.bf16 %v1244_v33, %v1236_v32  ;;  %v1299_v31 = vld [vmem:[#allocation10 + $0x3b0] sm:$0xff]  ;;  %v1314_v33 = vld [vmem:[#allocation10 + $0x428] sm:$0xff] }
 0x409   : > { %v1307_v32 = vld [vmem:[#allocation10 + $0x3f0] sm:$0xff] }
 0x40a   : > { %3797 = vmatpush1.bf16.msra.mxu1 %v3796_v0  ;;  %v1258_v0 = vld [vmem:[#allocation10 + $0x268] sm:$0xff]  ;;  %v4344_v38 = vpack.c.bf16 %v1307_v32, %v1299_v31  ;;  %v1385_v32 = vld [vmem:[#allocation10 + $0x660] sm:$0xff] }
 0x40b   : > { %4053 = vmatpush1.bf16.msra.mxu0 %v4052_v43  ;;  %3799 = vmatprep.subr.bf16.mxu1 %v3798_v44  ;;  %v1252_v43 = vld [vmem:[#allocation10 + $0x238] sm:$0xff]  ;;  %v4074_v49 = vpack.c.bf16 %v1258_v0, %v1250_v29  ;;  %v1315_v29 = vld [vmem:[#allocation10 + $0x430] sm:$0xff] }
 0x40c   : > { %4055 = vmatprep.subr.bf16.mxu0 %v4054_v50  ;;  %v1260_v44 = vld [vmem:[#allocation10 + $0x278] sm:$0xff]  ;;  %v1249_v50 = vld [vmem:[#allocation10 + $0x220] sm:$0xff] }
 0x40d   : > { %v4330_v54 = vpack.c.bf16 %v1260_v44, %v1252_v43  ;;  %v4076_v60 = vpack.c.bf16 %v1257_v51, %v1249_v50  ;;  %v1323_v43 = vld [vmem:[#allocation10 + $0x470] sm:$0xff]  ;;  %v1330_v44 = vld [vmem:[#allocation10 + $0x4a8] sm:$0xff] }
 0x40e   : > { %3801 = vmatpush1.bf16.msra.mxu1 %v3800_v56  ;;  %v1274_v56 = vld [vmem:[#allocation10 + $0x2e8] sm:$0xff]  ;;  %v4348_v51 = vpack.c.bf16 %v1323_v43, %v1315_v29  ;;  %v1401_v43 = vld [vmem:[#allocation10 + $0x6e0] sm:$0xff] }
 0x40f   : > { %4057 = vmatpush1.bf16.msra.mxu0 %v4056_v57  ;;  %4059 = vmatprep.subr.bf16.mxu1 %v4058_v58  ;;  %v1268_v57 = vld [vmem:[#allocation10 + $0x2b8] sm:$0xff] }
 0x410   : > { %4315 = vmatprep.subr.bf16.mxu0 %v4314_v62  ;;  %v1276_v58 = vld [vmem:[#allocation10 + $0x2f8] sm:$0xff]  ;;  %v4078_v62 = vpack.c.bf16 %v1274_v56, %v1266_v2  ;;  %v1331_v2 = vld [vmem:[#allocation10 + $0x4b0] sm:$0xff] }
 0x411   : > { %2483 = vmatmul.mubr.f32.vlgmr.msra.gmra.mrb[12].mxu1 %v5326_v7  ;;  %v4334_v3 = vpack.c.bf16 %v1276_v58, %v1268_v57  ;;  %v1339_v57 = vld [vmem:[#allocation10 + $0x4f0] sm:$0xff]  ;;  %v1346_v58 = vld [vmem:[#allocation10 + $0x528] sm:$0xff] }
 0x412   : > { %2767 = vmatmul.mubr.f32.vlgmr.msra.gmra.mrb[8].mxu0 %v5326_v7  ;;  %4061 = vmatpush1.bf16.msra.mxu1 %v4060_v4  ;;  %v1275_v4 = vld [vmem:[#allocation10 + $0x2f0] sm:$0xff]  ;;  %v4352_v63 = vpack.c.bf16 %v1339_v57, %v1331_v2  ;;  %v1417_v57 = vld [vmem:[#allocation10 + $0x760] sm:$0xff] }
 0x413   : > { %2837 = vmatprep.mubr.f32.mxu1 %v5277_v41  ;;  %4317 = vmatpush1.bf16.msra.mxu0 %v4316_v8  ;;  %v1284_v8 = vld [vmem:[#allocation10 + $0x338] sm:$0xff]  ;;  %v4336_v12 = vpack.c.bf16 %v1275_v4, %v1267_v1  ;;  %v1353_v4 = vld [vmem:[#allocation10 + $0x560] sm:$0xff] }
 0x414   : > { %3121 = vmatprep.mubr.f32.mxu0 %v5277_v41  ;;  %4063 = vmatprep.subr.bf16.mxu1 %v4062_v13  ;;  %v1243_v41 = vld [vmem:[#allocation10 + $0x1f0] sm:$0xff]  ;;  %v4082_v13 = vpack.c.bf16 %v1290_v6, %v1282_v5 }
 0x415   : > { %4319 = vmatprep.subr.bf16.mxu0 %v4318_v19  ;;  %v4328_v46 = vpack.c.bf16 %v1243_v41, %v1235_v39  ;;  %v4338_v19 = vpack.c.bf16 %v1292_v10, %v1284_v8  ;;  %v1321_v41 = vld [vmem:[#allocation10 + $0x460] sm:$0xff]  ;;  %v1347_v5 = vld [vmem:[#allocation10 + $0x530] sm:$0xff]  ;;  %v1362_v10 = vld [vmem:[#allocation10 + $0x5a8] sm:$0xff] }
 0x416   : > { %4065 = vmatpush1.bf16.msra.mxu1 %v4064_v18  ;;  %v1306_v18 = vld [vmem:[#allocation10 + $0x3e8] sm:$0xff]  ;;  %v1355_v8 = vld [vmem:[#allocation10 + $0x570] sm:$0xff] }
 0x417   : > { %4321 = vmatpush1.bf16.msra.mxu0 %v4320_v23  ;;  %4067 = vmatprep.subr.bf16.mxu1 %v4066_v24  ;;  %v1300_v23 = vld [vmem:[#allocation10 + $0x3b8] sm:$0xff]  ;;  %v4086_v28 = vpack.c.bf16 %v1306_v18, %v1298_v21  ;;  %v4356_v15 = vpack.c.bf16 %v1355_v8, %v1347_v5  ;;  %v1363_v21 = vld [vmem:[#allocation10 + $0x5b0] sm:$0xff]  ;;  %v1433_v8 = vld [vmem:[#allocation10 + $0x7e0] sm:$0xff] }
 0x418   : > { %4323 = vmatprep.subr.bf16.mxu0 %v4322_v48  ;;  %v1308_v24 = vld [vmem:[#allocation10 + $0x3f8] sm:$0xff]  ;;  %v1297_v48 = vld [vmem:[#allocation10 + $0x3a0] sm:$0xff] }
 0x419   : > { %v4342_v9 = vpack.c.bf16 %v1308_v24, %v1300_v23  ;;  %v4088_v37 = vpack.c.bf16 %v1305_v30, %v1297_v48  ;;  %v1371_v23 = vld [vmem:[#allocation10 + $0x5f0] sm:$0xff]  ;;  %v1378_v24 = vld [vmem:[#allocation10 + $0x628] sm:$0xff] }
 0x41a   : > { %4069 = vmatpush1.bf16.msra.mxu1 %v4068_v34  ;;  %v1322_v34 = vld [vmem:[#allocation10 + $0x468] sm:$0xff]  ;;  %v4360_v30 = vpack.c.bf16 %v1371_v23, %v1363_v21  ;;  %v1449_v23 = vld [vmem:[#allocation10 + $0x860] sm:$0xff] }
 0x41b   : > { %4325 = vmatpush1.bf16.msra.mxu0 %v4324_v35  ;;  %4071 = vmatprep.subr.bf16.mxu1 %v4070_v36  ;;  %v1316_v35 = vld [vmem:[#allocation10 + $0x438] sm:$0xff]  ;;  %v4090_v39 = vpack.c.bf16 %v1322_v34, %v1314_v33  ;;  %v1379_v33 = vld [vmem:[#allocation10 + $0x630] sm:$0xff] }
 0x41c   : > { %4327 = vmatprep.subr.bf16.mxu0 %v4326_v40  ;;  %v1324_v36 = vld [vmem:[#allocation10 + $0x478] sm:$0xff]  ;;  %v1313_v40 = vld [vmem:[#allocation10 + $0x420] sm:$0xff] }
 0x41d   : > { %v4346_v0 = vpack.c.bf16 %v1324_v36, %v1316_v35  ;;  %v4092_v50 = vpack.c.bf16 %v1321_v41, %v1313_v40  ;;  %v1387_v35 = vld [vmem:[#allocation10 + $0x670] sm:$0xff]  ;;  %v1394_v36 = vld [vmem:[#allocation10 + $0x6a8] sm:$0xff] }
 0x41e   : > { %4073 = vmatpush1.bf16.msra.mxu1 %v4072_v45  ;;  %v1338_v45 = vld [vmem:[#allocation10 + $0x4e8] sm:$0xff]  ;;  %v4364_v41 = vpack.c.bf16 %v1387_v35, %v1379_v33  ;;  %v1457_v33 = vld [vmem:[#allocation10 + $0x8a0] sm:$0xff]  ;;  %v1459_v35 = vld [vmem:[#allocation10 + $0x8b0] sm:$0xff] }
 0x41f   : > { %4329 = vmatpush1.bf16.msra.mxu0 %v4328_v46  ;;  %4075 = vmatprep.subr.bf16.mxu1 %v4074_v49  ;;  %v1332_v46 = vld [vmem:[#allocation10 + $0x4b8] sm:$0xff]  ;;  %v4094_v52 = vpack.c.bf16 %v1338_v45, %v1330_v44  ;;  %v1395_v44 = vld [vmem:[#allocation10 + $0x6b0] sm:$0xff] }
 0x420   : > { %4331 = vmatprep.subr.bf16.mxu0 %v4330_v54  ;;  %v1340_v49 = vld [vmem:[#allocation10 + $0x4f8] sm:$0xff]  ;;  %v1329_v54 = vld [vmem:[#allocation10 + $0x4a0] sm:$0xff] }
 0x421   : > { %v4350_v56 = vpack.c.bf16 %v1340_v49, %v1332_v46  ;;  %v4096_v25 = vpack.c.bf16 %v1337_v55, %v1329_v54  ;;  %v1403_v46 = vld [vmem:[#allocation10 + $0x6f0] sm:$0xff]  ;;  %v1410_v49 = vld [vmem:[#allocation10 + $0x728] sm:$0xff] }
 0x422   : > { %4077 = vmatpush1.bf16.msra.mxu1 %v4076_v60  ;;  %v1354_v60 = vld [vmem:[#allocation10 + $0x568] sm:$0xff]  ;;  %v4368_v55 = vpack.c.bf16 %v1403_v46, %v1395_v44  ;;  %v1481_v46 = vld [vmem:[#allocation10 + $0x960] sm:$0xff] }
 0x423   : > { %4333 = vmatpush1.bf16.msra.mxu0 %v4332_v61  ;;  %4079 = vmatprep.subr.bf16.mxu1 %v4078_v62  ;;  %v1348_v61 = vld [vmem:[#allocation10 + $0x538] sm:$0xff]  ;;  %v4098_v1 = vpack.c.bf16 %v1354_v60, %v1346_v58  ;;  %v1411_v58 = vld [vmem:[#allocation10 + $0x730] sm:$0xff] }
 0x424   : > { %4335 = vmatprep.subr.bf16.mxu0 %v4334_v3  ;;  %v1356_v62 = vld [vmem:[#allocation10 + $0x578] sm:$0xff]  ;;  %v1345_v3 = vld [vmem:[#allocation10 + $0x520] sm:$0xff] }
 0x425   : > { %v4354_v6 = vpack.c.bf16 %v1356_v62, %v1348_v61  ;;  %v4100_v14 = vpack.c.bf16 %v1353_v4, %v1345_v3  ;;  %v1419_v61 = vld [vmem:[#allocation10 + $0x770] sm:$0xff]  ;;  %v1426_v62 = vld [vmem:[#allocation10 + $0x7a8] sm:$0xff] }
 0x426   : > { %4081 = vmatpush1.bf16.msra.mxu1 %v4080_v11  ;;  %v1370_v11 = vld [vmem:[#allocation10 + $0x5e8] sm:$0xff]  ;;  %v4372_v4 = vpack.c.bf16 %v1419_v61, %v1411_v58  ;;  %v1489_v58 = vld [vmem:[#allocation10 + $0x9a0] sm:$0xff]  ;;  %v1491_v61 = vld [vmem:[#allocation10 + $0x9b0] sm:$0xff] }
 0x427   : > { %4337 = vmatpush1.bf16.msra.mxu0 %v4336_v12  ;;  %4083 = vmatprep.subr.bf16.mxu1 %v4082_v13  ;;  %v1364_v12 = vld [vmem:[#allocation10 + $0x5b8] sm:$0xff]  ;;  %v4102_v17 = vpack.c.bf16 %v1370_v11, %v1362_v10  ;;  %v1427_v10 = vld [vmem:[#allocation10 + $0x7b0] sm:$0xff] }
 0x428   : > { %4339 = vmatprep.subr.bf16.mxu0 %v4338_v19  ;;  %v1372_v13 = vld [vmem:[#allocation10 + $0x5f8] sm:$0xff]  ;;  %v1361_v19 = vld [vmem:[#allocation10 + $0x5a0] sm:$0xff] }
 0x429   : > { %v4358_v18 = vpack.c.bf16 %v1372_v13, %v1364_v12  ;;  %v4104_v48 = vpack.c.bf16 %v1369_v20, %v1361_v19  ;;  %v1435_v12 = vld [vmem:[#allocation10 + $0x7f0] sm:$0xff]  ;;  %v1442_v13 = vld [vmem:[#allocation10 + $0x828] sm:$0xff] }
 0x42a   : > { %4085 = vmatpush1.bf16.msra.mxu1 %v4084_v26  ;;  %v1386_v26 = vld [vmem:[#allocation10 + $0x668] sm:$0xff]  ;;  %v4376_v20 = vpack.c.bf16 %v1435_v12, %v1427_v10  ;;  %v1513_v10 = vld [vmem:[#allocation10 + $0xa60] sm:$0xff] }
 0x42b   : > { %4341 = vmatpush1.bf16.msra.mxu0 %v4340_v27  ;;  %4087 = vmatprep.subr.bf16.mxu1 %v4086_v28  ;;  %v1380_v27 = vld [vmem:[#allocation10 + $0x638] sm:$0xff]  ;;  %v4106_v31 = vpack.c.bf16 %v1386_v26, %v1378_v24  ;;  %v1443_v26 = vld [vmem:[#allocation10 + $0x830] sm:$0xff] }
 0x42c   : > { %4343 = vmatprep.subr.bf16.mxu0 %v4342_v9  ;;  %v1388_v28 = vld [vmem:[#allocation10 + $0x678] sm:$0xff]  ;;  %v1377_v9 = vld [vmem:[#allocation10 + $0x620] sm:$0xff] }
 0x42d   : > { %v4362_v34 = vpack.c.bf16 %v1388_v28, %v1380_v27  ;;  %v4108_v40 = vpack.c.bf16 %v1385_v32, %v1377_v9  ;;  %v1451_v27 = vld [vmem:[#allocation10 + $0x870] sm:$0xff]  ;;  %v1458_v28 = vld [vmem:[#allocation10 + $0x8a8] sm:$0xff]  ;;  %v1468_v9 = vld [vmem:[#allocation10 + $0x8f8] sm:$0xff] }
 0x42e   : > { %4089 = vmatpush1.bf16.msra.mxu1 %v4088_v37  ;;  %v1402_v37 = vld [vmem:[#allocation10 + $0x6e8] sm:$0xff]  ;;  %v4380_v32 = vpack.c.bf16 %v1451_v27, %v1443_v26  ;;  %v1523_v26 = vld [vmem:[#allocation10 + $0xab0] sm:$0xff] }
 0x42f   : > { %4345 = vmatpush1.bf16.msra.mxu0 %v4344_v38  ;;  %4091 = vmatprep.subr.bf16.mxu1 %v4090_v39  ;;  %v1396_v38 = vld [vmem:[#allocation10 + $0x6b8] sm:$0xff]  ;;  %v4110_v29 = vpack.c.bf16 %v1402_v37, %v1394_v36  ;;  %v1467_v37 = vld [vmem:[#allocation10 + $0x8f0] sm:$0xff] }
 0x430   : > { %4347 = vmatprep.subr.bf16.mxu0 %v4346_v0  ;;  %v1404_v39 = vld [vmem:[#allocation10 + $0x6f8] sm:$0xff]  ;;  %v1393_v0 = vld [vmem:[#allocation10 + $0x6a0] sm:$0xff] }
 0x431   : > { %v4366_v45 = vpack.c.bf16 %v1404_v39, %v1396_v38  ;;  %v4112_v54 = vpack.c.bf16 %v1401_v43, %v1393_v0  ;;  %v1474_v38 = vld [vmem:[#allocation10 + $0x928] sm:$0xff]  ;;  %v4384_v43 = vpack.c.bf16 %v1467_v37, %v1459_v35  ;;  %v1537_v35 = vld [vmem:[#allocation10 + $0xb20] sm:$0xff]  ;;  %v1539_v37 = vld [vmem:[#allocation10 + $0xb30] sm:$0xff] }
 0x432   : > { %4093 = vmatpush1.bf16.msra.mxu1 %v4092_v50  ;;  %v1418_v50 = vld [vmem:[#allocation10 + $0x768] sm:$0xff] }
 0x433   : > { %4349 = vmatpush1.bf16.msra.mxu0 %v4348_v51  ;;  %4095 = vmatprep.subr.bf16.mxu1 %v4094_v52  ;;  %v1412_v51 = vld [vmem:[#allocation10 + $0x738] sm:$0xff]  ;;  %v4114_v2 = vpack.c.bf16 %v1418_v50, %v1410_v49  ;;  %v1482_v39 = vld [vmem:[#allocation10 + $0x968] sm:$0xff]  ;;  %v1475_v49 = vld [vmem:[#allocation10 + $0x930] sm:$0xff] }
 0x434   : > { %4351 = vmatprep.subr.bf16.mxu0 %v4350_v56  ;;  %v1420_v52 = vld [vmem:[#allocation10 + $0x778] sm:$0xff]  ;;  %v1409_v56 = vld [vmem:[#allocation10 + $0x720] sm:$0xff]  ;;  %v4130_v44 = vpack.c.bf16 %v1482_v39, %v1474_v38  ;;  %v1547_v39 = vld [vmem:[#allocation10 + $0xb70] sm:$0xff] }
 0x435   : > { %v4370_v60 = vpack.c.bf16 %v1420_v52, %v1412_v51  ;;  %v4116_v3 = vpack.c.bf16 %v1417_v57, %v1409_v56  ;;  %v1483_v51 = vld [vmem:[#allocation10 + $0x970] sm:$0xff]  ;;  %v1490_v52 = vld [vmem:[#allocation10 + $0x9a8] sm:$0xff] }
 0x436   : > { %4097 = vmatpush1.bf16.msra.mxu1 %v4096_v25  ;;  %v1434_v25 = vld [vmem:[#allocation10 + $0x7e8] sm:$0xff]  ;;  %v4388_v56 = vpack.c.bf16 %v1483_v51, %v1475_v49  ;;  %v1561_v49 = vld [vmem:[#allocation10 + $0xbe0] sm:$0xff] }
 0x437   : > { %4353 = vmatpush1.bf16.msra.mxu0 %v4352_v63  ;;  %4099 = vmatprep.subr.bf16.mxu1 %v4098_v1  ;;  %v1428_v63 = vld [vmem:[#allocation10 + $0x7b8] sm:$0xff]  ;;  %v4118_v5 = vpack.c.bf16 %v1434_v25, %v1426_v62  ;;  %v1506_v25 = vld [vmem:[#allocation10 + $0xa28] sm:$0xff] }
 0x438   : > { %4355 = vmatprep.subr.bf16.mxu0 %v4354_v6  ;;  %v1436_v1 = vld [vmem:[#allocation10 + $0x7f8] sm:$0xff]  ;;  %v1425_v6 = vld [vmem:[#allocation10 + $0x7a0] sm:$0xff] }
 0x439   : > { %v4374_v11 = vpack.c.bf16 %v1436_v1, %v1428_v63  ;;  %v4120_v19 = vpack.c.bf16 %v1433_v8, %v1425_v6  ;;  %v1514_v63 = vld [vmem:[#allocation10 + $0xa68] sm:$0xff]  ;;  %v1508_v1 = vld [vmem:[#allocation10 + $0xa38] sm:$0xff]  ;;  %v1505_v8 = vld [vmem:[#allocation10 + $0xa20] sm:$0xff] }
 0x43a   : > { %4101 = vmatpush1.bf16.msra.mxu1 %v4100_v14  ;;  %v1450_v14 = vld [vmem:[#allocation10 + $0x868] sm:$0xff]  ;;  %v4138_v6 = vpack.c.bf16 %v1514_v63, %v1506_v25  ;;  %v1579_v25 = vld [vmem:[#allocation10 + $0xc70] sm:$0xff] }
 0x43b   : > { %4357 = vmatpush1.bf16.msra.mxu0 %v4356_v15  ;;  %4103 = vmatprep.subr.bf16.mxu1 %v4102_v17  ;;  %v1444_v15 = vld [vmem:[#allocation10 + $0x838] sm:$0xff]  ;;  %v4122_v21 = vpack.c.bf16 %v1450_v14, %v1442_v13  ;;  %v1515_v13 = vld [vmem:[#allocation10 + $0xa70] sm:$0xff]  ;;  %v1522_v14 = vld [vmem:[#allocation10 + $0xaa8] sm:$0xff] }
 0x43c   : > { %4359 = vmatprep.subr.bf16.mxu0 %v4358_v18  ;;  %v1452_v17 = vld [vmem:[#allocation10 + $0x878] sm:$0xff]  ;;  %v1441_v18 = vld [vmem:[#allocation10 + $0x820] sm:$0xff]  ;;  %v1586_v63 = vld [vmem:[#allocation10 + $0xca8] sm:$0xff] }
 0x43d   : > { %v4378_v24 = vpack.c.bf16 %v1452_v17, %v1444_v15  ;;  %v1530_v15 = vld [vmem:[#allocation10 + $0xae8] sm:$0xff]  ;;  %v1524_v17 = vld [vmem:[#allocation10 + $0xab8] sm:$0xff] }
 0x43e   : > { %4105 = vmatpush1.bf16.msra.mxu1 %v4104_v48  ;;  %v1466_v48 = vld [vmem:[#allocation10 + $0x8e8] sm:$0xff] }
 0x43f   : > { %4361 = vmatpush1.bf16.msra.mxu0 %v4360_v30  ;;  %4107 = vmatprep.subr.bf16.mxu1 %v4106_v31  ;;  %v4124_v30 = vpack.c.bf16 %v1449_v23, %v1441_v18  ;;  %v1460_v31 = vld [vmem:[#allocation10 + $0x8b8] sm:$0xff]  ;;  %v4126_v36 = vpack.c.bf16 %v1466_v48, %v1458_v28  ;;  %v4142_v18 = vpack.c.bf16 %v1530_v15, %v1522_v14  ;;  %v1521_v23 = vld [vmem:[#allocation10 + $0xaa0] sm:$0xff]  ;;  %v1531_v28 = vld [vmem:[#allocation10 + $0xaf0] sm:$0xff] }
 0x440   : > { %4363 = vmatprep.subr.bf16.mxu0 %v4362_v34  ;;  %v1465_v34 = vld [vmem:[#allocation10 + $0x8e0] sm:$0xff]  ;;  %v1538_v48 = vld [vmem:[#allocation10 + $0xb28] sm:$0xff]  ;;  %v1595_v14 = vld [vmem:[#allocation10 + $0xcf0] sm:$0xff] }
 0x441   : > { %v4128_v0 = vpack.c.bf16 %v1465_v34, %v1457_v33  ;;  %v4400_v33 = vpack.c.bf16 %v1531_v28, %v1523_v26  ;;  %v1602_v15 = vld [vmem:[#allocation10 + $0xd28] sm:$0xff]  ;;  %v1609_v26 = vld [vmem:[#allocation10 + $0xd60] sm:$0xff] }
 0x442   : > { %4109 = vmatpush1.bf16.msra.mxu1 %v4108_v40  ;;  %v4382_v40 = vpack.c.bf16 %v1468_v9, %v1460_v31  ;;  %v1540_v31 = vld [vmem:[#allocation10 + $0xb38] sm:$0xff] }
 0x443   : > { %4365 = vmatpush1.bf16.msra.mxu0 %v4364_v41  ;;  %4111 = vmatprep.subr.bf16.mxu1 %v4110_v29  ;;  %v1476_v41 = vld [vmem:[#allocation10 + $0x938] sm:$0xff] }
 0x444   : > { %4367 = vmatprep.subr.bf16.mxu0 %v4366_v45  ;;  %v1484_v29 = vld [vmem:[#allocation10 + $0x978] sm:$0xff]  ;;  %v1473_v45 = vld [vmem:[#allocation10 + $0x920] sm:$0xff] }
 0x445   : > { %v4386_v50 = vpack.c.bf16 %v1484_v29, %v1476_v41  ;;  %v1548_v9 = vld [vmem:[#allocation10 + $0xb78] sm:$0xff]  ;;  %v1562_v41 = vld [vmem:[#allocation10 + $0xbe8] sm:$0xff] }
 0x446   : > { %4113 = vmatpush1.bf16.msra.mxu1 %v4112_v54  ;;  %v1498_v54 = vld [vmem:[#allocation10 + $0x9e8] sm:$0xff]  ;;  %v4402_v38 = vpack.c.bf16 %v1548_v9, %v1540_v31  ;;  %v1556_v29 = vld [vmem:[#allocation10 + $0xbb8] sm:$0xff] }
 0x447   : > { %4369 = vmatpush1.bf16.msra.mxu0 %v4368_v55  ;;  %4115 = vmatprep.subr.bf16.mxu1 %v4114_v2  ;;  %v1492_v55 = vld [vmem:[#allocation10 + $0x9b8] sm:$0xff]  ;;  %v4132_v2 = vpack.c.bf16 %v1481_v46, %v1473_v45  ;;  %v4134_v57 = vpack.c.bf16 %v1498_v54, %v1490_v52  ;;  %v1553_v46 = vld [vmem:[#allocation10 + $0xba0] sm:$0xff]  ;;  %v1563_v52 = vld [vmem:[#allocation10 + $0xbf0] sm:$0xff] }
 0x448   : > { %4371 = vmatprep.subr.bf16.mxu0 %v4370_v60  ;;  %v1497_v60 = vld [vmem:[#allocation10 + $0x9e0] sm:$0xff]  ;;  %v1570_v54 = vld [vmem:[#allocation10 + $0xc28] sm:$0xff]  ;;  %v1620_v9 = vld [vmem:[#allocation10 + $0xdb8] sm:$0xff] }
 0x449   : > { %v1626_v31 = vld [vmem:[#allocation10 + $0xde8] sm:$0xff] }
 0x44a   : > { %4117 = vmatpush1.bf16.msra.mxu1 %v4116_v3  ;;  %v1516_v3 = vld [vmem:[#allocation10 + $0xa78] sm:$0xff] }
 0x44b   : > { %4373 = vmatpush1.bf16.msra.mxu0 %v4372_v4  ;;  %4119 = vmatprep.subr.bf16.mxu1 %v4118_v5  ;;  %v4136_v4 = vpack.c.bf16 %v1497_v60, %v1489_v58  ;;  %v4394_v12 = vpack.c.bf16 %v1516_v3, %v1508_v1  ;;  %v1569_v60 = vld [vmem:[#allocation10 + $0xc20] sm:$0xff]  ;;  %v1594_v1 = vld [vmem:[#allocation10 + $0xce8] sm:$0xff]  ;;  %v1588_v3 = vld [vmem:[#allocation10 + $0xcb8] sm:$0xff] }
 0x44c   : > { %4375 = vmatprep.subr.bf16.mxu0 %v4374_v11  ;;  %v1507_v11 = vld [vmem:[#allocation10 + $0xa30] sm:$0xff] }
 0x44e   : > { %4121 = vmatpush1.bf16.msra.mxu1 %v4120_v19  ;;  %v1532_v19 = vld [vmem:[#allocation10 + $0xaf8] sm:$0xff] }
 0x44f   : > { %4377 = vmatpush1.bf16.msra.mxu0 %v4376_v20  ;;  %4123 = vmatprep.subr.bf16.mxu1 %v4122_v21  ;;  %v4140_v20 = vpack.c.bf16 %v1513_v10, %v1505_v8  ;;  %v4396_v21 = vpack.c.bf16 %v1515_v13, %v1507_v11  ;;  %v4398_v27 = vpack.c.bf16 %v1532_v19, %v1524_v17  ;;  %v1585_v10 = vld [vmem:[#allocation10 + $0xca0] sm:$0xff]  ;;  %v1610_v17 = vld [vmem:[#allocation10 + $0xd68] sm:$0xff]  ;;  %v1604_v19 = vld [vmem:[#allocation10 + $0xd38] sm:$0xff] }
 0x450   : > { %4379 = vmatprep.subr.bf16.mxu0 %v4378_v24  ;;  %v1529_v24 = vld [vmem:[#allocation10 + $0xae0] sm:$0xff]  ;;  %v4158_v8 = vpack.c.bf16 %v1594_v1, %v1586_v63  ;;  %v1659_v63 = vld [vmem:[#allocation10 + $0xef0] sm:$0xff]  ;;  %v1666_v1 = vld [vmem:[#allocation10 + $0xf28] sm:$0xff] }
 0x451   : > { %2838 = vmatmul.mubr.f32.vlgmr.msra.gmra.mrb[14].mxu1 %v5279_v47  ;;  %v1593_v11 = vld [vmem:[#allocation10 + $0xce0] sm:$0xff] }
 0x452   : > { %3122 = vmatmul.mubr.f32.vlgmr.msra.gmra.mrb[10].mxu0 %v5279_v47  ;;  %4125 = vmatpush1.bf16.msra.mxu1 %v4124_v30  ;;  %v1500_v47 = vld [vmem:[#allocation10 + $0x9f8] sm:$0xff]  ;;  %v1546_v30 = vld [vmem:[#allocation10 + $0xb68] sm:$0xff] }
 0x453   : > { %2908 = vmatprep.mubr.f32.mxu1 %v5289_v59  ;;  %4381 = vmatpush1.bf16.msra.mxu0 %v4380_v32  ;;  %v4390_v62 = vpack.c.bf16 %v1500_v47, %v1492_v55  ;;  %v4144_v32 = vpack.c.bf16 %v1529_v24, %v1521_v23  ;;  %v4146_v34 = vpack.c.bf16 %v1546_v30, %v1538_v48  ;;  %v1578_v55 = vld [vmem:[#allocation10 + $0xc68] sm:$0xff]  ;;  %v1572_v47 = vld [vmem:[#allocation10 + $0xc38] sm:$0xff]  ;;  %v1601_v24 = vld [vmem:[#allocation10 + $0xd20] sm:$0xff] }
 0x454   : > { %3192 = vmatprep.mubr.f32.mxu0 %v5289_v59  ;;  %4127 = vmatprep.subr.bf16.mxu1 %v4126_v36  ;;  %v1499_v59 = vld [vmem:[#allocation10 + $0x9f0] sm:$0xff]  ;;  %v1545_v36 = vld [vmem:[#allocation10 + $0xb60] sm:$0xff]  ;;  %v4154_v58 = vpack.c.bf16 %v1578_v55, %v1570_v54  ;;  %v4162_v23 = vpack.c.bf16 %v1610_v17, %v1602_v15  ;;  %v1618_v30 = vld [vmem:[#allocation10 + $0xda8] sm:$0xff] }
 0x455   : > { %4383 = vmatprep.subr.bf16.mxu0 %v4382_v40  ;;  %v4392_v5 = vpack.c.bf16 %v1499_v59, %v1491_v61  ;;  %v1554_v40 = vld [vmem:[#allocation10 + $0xba8] sm:$0xff]  ;;  %v1577_v61 = vld [vmem:[#allocation10 + $0xc60] sm:$0xff]  ;;  %v1611_v48 = vld [vmem:[#allocation10 + $0xd70] sm:$0xff] }
 0x456   : > { %4129 = vmatpush1.bf16.msra.mxu1 %v4128_v0  ;;  %v1564_v0 = vld [vmem:[#allocation10 + $0xbf8] sm:$0xff]  ;;  %v4150_v45 = vpack.c.bf16 %v1562_v41, %v1554_v40  ;;  %v1627_v40 = vld [vmem:[#allocation10 + $0xdf0] sm:$0xff]  ;;  %v1634_v41 = vld [vmem:[#allocation10 + $0xe28] sm:$0xff] }
 0x457   : > { %4385 = vmatpush1.bf16.msra.mxu0 %v4384_v43  ;;  %4131 = vmatprep.subr.bf16.mxu1 %v4130_v44  ;;  %v4148_v43 = vpack.c.bf16 %v1545_v36, %v1537_v35  ;;  %v4404_v44 = vpack.c.bf16 %v1547_v39, %v1539_v37  ;;  %v4406_v51 = vpack.c.bf16 %v1564_v0, %v1556_v29  ;;  %v1617_v36 = vld [vmem:[#allocation10 + $0xda0] sm:$0xff]  ;;  %v1642_v29 = vld [vmem:[#allocation10 + $0xe68] sm:$0xff]  ;;  %v1636_v0 = vld [vmem:[#allocation10 + $0xe38] sm:$0xff] }
 0x458   : > { %4387 = vmatprep.subr.bf16.mxu0 %v4386_v50  ;;  %v1555_v50 = vld [vmem:[#allocation10 + $0xbb0] sm:$0xff]  ;;  %v4166_v35 = vpack.c.bf16 %v1626_v31, %v1618_v30  ;;  %v1625_v37 = vld [vmem:[#allocation10 + $0xde0] sm:$0xff]  ;;  %v1650_v55 = vld [vmem:[#allocation10 + $0xea8] sm:$0xff] }
 0x459   : > { %v1643_v54 = vld [vmem:[#allocation10 + $0xe70] sm:$0xff]  ;;  %v1682_v17 = vld [vmem:[#allocation10 + $0xfa8] sm:$0xff] }
 0x45a   : > { %4133 = vmatpush1.bf16.msra.mxu1 %v4132_v2  ;;  %v1580_v2 = vld [vmem:[#allocation10 + $0xc78] sm:$0xff]  ;;  %v1675_v15 = vld [vmem:[#allocation10 + $0xf70] sm:$0xff]  ;;  %v1698_v31 = vld [vmem:[#allocation10 + $0x1028] sm:$0xff] }
 0x45b   : > { %4389 = vmatpush1.bf16.msra.mxu0 %v4388_v56  ;;  %4135 = vmatprep.subr.bf16.mxu1 %v4134_v57  ;;  %v4152_v56 = vpack.c.bf16 %v1561_v49, %v1553_v46  ;;  %v4408_v57 = vpack.c.bf16 %v1563_v52, %v1555_v50  ;;  %v4410_v59 = vpack.c.bf16 %v1580_v2, %v1572_v47  ;;  %v1633_v49 = vld [vmem:[#allocation10 + $0xe20] sm:$0xff]  ;;  %v1658_v47 = vld [vmem:[#allocation10 + $0xee8] sm:$0xff]  ;;  %v1652_v2 = vld [vmem:[#allocation10 + $0xeb8] sm:$0xff] }
 0x45c   : > { %4391 = vmatprep.subr.bf16.mxu0 %v4390_v62  ;;  %v1571_v62 = vld [vmem:[#allocation10 + $0xc30] sm:$0xff]  ;;  %v4170_v46 = vpack.c.bf16 %v1642_v29, %v1634_v41  ;;  %v1641_v50 = vld [vmem:[#allocation10 + $0xe60] sm:$0xff]  ;;  %v1714_v29 = vld [vmem:[#allocation10 + $0x10a8] sm:$0xff] }
 0x45d   : > { %v1691_v30 = vld [vmem:[#allocation10 + $0xff0] sm:$0xff] }
 0x45e   : > { %4137 = vmatpush1.bf16.msra.mxu1 %v4136_v4  ;;  %v1596_v4 = vld [vmem:[#allocation10 + $0xcf8] sm:$0xff]  ;;  %v1707_v41 = vld [vmem:[#allocation10 + $0x1070] sm:$0xff] }
 0x45f   : > { %4393 = vmatpush1.bf16.msra.mxu0 %v4392_v5  ;;  %4139 = vmatprep.subr.bf16.mxu1 %v4138_v6  ;;  %v4156_v5 = vpack.c.bf16 %v1577_v61, %v1569_v60  ;;  %v4412_v6 = vpack.c.bf16 %v1579_v25, %v1571_v62  ;;  %v4414_v13 = vpack.c.bf16 %v1596_v4, %v1588_v3  ;;  %v1649_v61 = vld [vmem:[#allocation10 + $0xea0] sm:$0xff]  ;;  %v1674_v3 = vld [vmem:[#allocation10 + $0xf68] sm:$0xff]  ;;  %v1668_v4 = vld [vmem:[#allocation10 + $0xf38] sm:$0xff] }
 0x460   : > { %4395 = vmatprep.subr.bf16.mxu0 %v4394_v12  ;;  %v1587_v12 = vld [vmem:[#allocation10 + $0xcb0] sm:$0xff]  ;;  %v4174_v60 = vpack.c.bf16 %v1658_v47, %v1650_v55  ;;  %v1657_v62 = vld [vmem:[#allocation10 + $0xee0] sm:$0xff]  ;;  %v1730_v55 = vld [vmem:[#allocation10 + $0x1128] sm:$0xff] }
 0x461   : > { %v1738_v47 = vld [vmem:[#allocation10 + $0x1168] sm:$0xff] }
 0x462   : > { %4141 = vmatpush1.bf16.msra.mxu1 %v4140_v20  ;;  %v1612_v20 = vld [vmem:[#allocation10 + $0xd78] sm:$0xff] }
 0x463   : > { %4397 = vmatpush1.bf16.msra.mxu0 %v4396_v21  ;;  %4143 = vmatprep.subr.bf16.mxu1 %v4142_v18  ;;  %v4160_v21 = vpack.c.bf16 %v1593_v11, %v1585_v10  ;;  %v4416_v18 = vpack.c.bf16 %v1595_v14, %v1587_v12  ;;  %v4418_v28 = vpack.c.bf16 %v1612_v20, %v1604_v19  ;;  %v1665_v11 = vld [vmem:[#allocation10 + $0xf20] sm:$0xff]  ;;  %v1690_v19 = vld [vmem:[#allocation10 + $0xfe8] sm:$0xff]  ;;  %v1684_v20 = vld [vmem:[#allocation10 + $0xfb8] sm:$0xff] }
 0x464   : > { %4399 = vmatprep.subr.bf16.mxu0 %v4398_v27  ;;  %v1603_v27 = vld [vmem:[#allocation10 + $0xd30] sm:$0xff]  ;;  %v4178_v10 = vpack.c.bf16 %v1674_v3, %v1666_v1  ;;  %v1673_v12 = vld [vmem:[#allocation10 + $0xf60] sm:$0xff]  ;;  %v1746_v3 = vld [vmem:[#allocation10 + $0x11a8] sm:$0xff] }
 0x465   : > { %v1739_v1 = vld [vmem:[#allocation10 + $0x1170] sm:$0xff] }
 0x466   : > { %4145 = vmatpush1.bf16.msra.mxu1 %v4144_v32  ;;  %v1628_v32 = vld [vmem:[#allocation10 + $0xdf8] sm:$0xff] }
 0x467   : > { %4401 = vmatpush1.bf16.msra.mxu0 %v4400_v33  ;;  %4147 = vmatprep.subr.bf16.mxu1 %v4146_v34  ;;  %v4164_v33 = vpack.c.bf16 %v1609_v26, %v1601_v24  ;;  %v4420_v34 = vpack.c.bf16 %v1611_v48, %v1603_v27  ;;  %v4422_v39 = vpack.c.bf16 %v1628_v32, %v1620_v9  ;;  %v1681_v26 = vld [vmem:[#allocation10 + $0xfa0] sm:$0xff]  ;;  %v1706_v9 = vld [vmem:[#allocation10 + $0x1068] sm:$0xff]  ;;  %v1700_v32 = vld [vmem:[#allocation10 + $0x1038] sm:$0xff] }
 0x468   : > { %4403 = vmatprep.subr.bf16.mxu0 %v4402_v38  ;;  %v1619_v38 = vld [vmem:[#allocation10 + $0xdb0] sm:$0xff]  ;;  %v4182_v24 = vpack.c.bf16 %v1690_v19, %v1682_v17  ;;  %v1689_v27 = vld [vmem:[#allocation10 + $0xfe0] sm:$0xff]  ;;  %v1770_v17 = vld [vmem:[#allocation10 + $0x1268] sm:$0xff] }
 0x469   : > { %v1764_v19 = vld [vmem:[#allocation10 + $0x1238] sm:$0xff] }
 0x46a   : > { %4149 = vmatpush1.bf16.msra.mxu1 %v4148_v43  ;;  %v1644_v43 = vld [vmem:[#allocation10 + $0xe78] sm:$0xff] }
 0x46b   : > { %4405 = vmatpush1.bf16.msra.mxu0 %v4404_v44  ;;  %4151 = vmatprep.subr.bf16.mxu1 %v4150_v45  ;;  %v4168_v44 = vpack.c.bf16 %v1625_v37, %v1617_v36  ;;  %v4424_v45 = vpack.c.bf16 %v1627_v40, %v1619_v38  ;;  %v4426_v52 = vpack.c.bf16 %v1644_v43, %v1636_v0  ;;  %v1697_v37 = vld [vmem:[#allocation10 + $0x1020] sm:$0xff]  ;;  %v1699_v40 = vld [vmem:[#allocation10 + $0x1030] sm:$0xff]  ;;  %v1722_v0 = vld [vmem:[#allocation10 + $0x10e8] sm:$0xff] }
 0x46c   : > { %4407 = vmatprep.subr.bf16.mxu0 %v4406_v51  ;;  %v1635_v51 = vld [vmem:[#allocation10 + $0xe30] sm:$0xff]  ;;  %v4186_v36 = vpack.c.bf16 %v1706_v9, %v1698_v31  ;;  %v1705_v38 = vld [vmem:[#allocation10 + $0x1060] sm:$0xff]  ;;  %v1786_v31 = vld [vmem:[#allocation10 + $0x12e8] sm:$0xff] }
 0x46d   : > { %v4188_v43 = vpack.c.bf16 %v1705_v38, %v1697_v37  ;;  %v1780_v9 = vld [vmem:[#allocation10 + $0x12b8] sm:$0xff]  ;;  %v1785_v37 = vld [vmem:[#allocation10 + $0x12e0] sm:$0xff]  ;;  %v1779_v38 = vld [vmem:[#allocation10 + $0x12b0] sm:$0xff] }
 0x46e   : > { %4153 = vmatpush1.bf16.msra.mxu1 %v4152_v56  ;;  %v1660_v56 = vld [vmem:[#allocation10 + $0xef8] sm:$0xff] }
 0x46f   : > { %4409 = vmatpush1.bf16.msra.mxu0 %v4408_v57  ;;  %4155 = vmatprep.subr.bf16.mxu1 %v4154_v58  ;;  %v4172_v57 = vpack.c.bf16 %v1641_v50, %v1633_v49  ;;  %v4428_v58 = vpack.c.bf16 %v1643_v54, %v1635_v51  ;;  %v4430_v25 = vpack.c.bf16 %v1660_v56, %v1652_v2  ;;  %v1713_v49 = vld [vmem:[#allocation10 + $0x10a0] sm:$0xff]  ;;  %v1715_v51 = vld [vmem:[#allocation10 + $0x10b0] sm:$0xff]  ;;  %v1732_v56 = vld [vmem:[#allocation10 + $0x1138] sm:$0xff] }
 0x470   : > { %4411 = vmatprep.subr.bf16.mxu0 %v4410_v59  ;;  %v1651_v59 = vld [vmem:[#allocation10 + $0xeb0] sm:$0xff]  ;;  %v1721_v50 = vld [vmem:[#allocation10 + $0x10e0] sm:$0xff] }
 0x471   : > { %v1723_v54 = vld [vmem:[#allocation10 + $0x10f0] sm:$0xff] }
 0x472   : > { %4157 = vmatpush1.bf16.msra.mxu1 %v4156_v5  ;;  %v1676_v5 = vld [vmem:[#allocation10 + $0xf78] sm:$0xff] }
 0x473   : > { %4413 = vmatpush1.bf16.msra.mxu0 %v4412_v6  ;;  %4159 = vmatprep.subr.bf16.mxu1 %v4158_v8  ;;  %v4176_v6 = vpack.c.bf16 %v1657_v62, %v1649_v61  ;;  %v4432_v8 = vpack.c.bf16 %v1659_v63, %v1651_v59  ;;  %v4434_v14 = vpack.c.bf16 %v1676_v5, %v1668_v4  ;;  %v1729_v62 = vld [vmem:[#allocation10 + $0x1120] sm:$0xff]  ;;  %v1754_v4 = vld [vmem:[#allocation10 + $0x11e8] sm:$0xff]  ;;  %v1748_v5 = vld [vmem:[#allocation10 + $0x11b8] sm:$0xff] }
 0x474   : > { %4415 = vmatprep.subr.bf16.mxu0 %v4414_v13  ;;  %v1667_v13 = vld [vmem:[#allocation10 + $0xf30] sm:$0xff]  ;;  %v4194_v61 = vpack.c.bf16 %v1738_v47, %v1730_v55  ;;  %v1737_v59 = vld [vmem:[#allocation10 + $0x1160] sm:$0xff]  ;;  %v1810_v55 = vld [vmem:[#allocation10 + $0x13a8] sm:$0xff] }
 0x475   : > { %v1818_v47 = vld [vmem:[#allocation10 + $0x13e8] sm:$0xff] }
 0x476   : > { %4161 = vmatpush1.bf16.msra.mxu1 %v4160_v21  ;;  %v1692_v21 = vld [vmem:[#allocation10 + $0xff8] sm:$0xff] }
 0x477   : > { %4417 = vmatpush1.bf16.msra.mxu0 %v4416_v18  ;;  %4163 = vmatprep.subr.bf16.mxu1 %v4162_v23  ;;  %v4180_v18 = vpack.c.bf16 %v1673_v12, %v1665_v11  ;;  %v4436_v23 = vpack.c.bf16 %v1675_v15, %v1667_v13  ;;  %v4438_v48 = vpack.c.bf16 %v1692_v21, %v1684_v20  ;;  %v1745_v11 = vld [vmem:[#allocation10 + $0x11a0] sm:$0xff]  ;;  %v1747_v13 = vld [vmem:[#allocation10 + $0x11b0] sm:$0xff]  ;;  %v1762_v15 = vld [vmem:[#allocation10 + $0x1228] sm:$0xff] }
 0x478   : > { %4419 = vmatprep.subr.bf16.mxu0 %v4418_v28  ;;  %v1683_v28 = vld [vmem:[#allocation10 + $0xfb0] sm:$0xff]  ;;  %v1753_v12 = vld [vmem:[#allocation10 + $0x11e0] sm:$0xff]  ;;  %v1772_v20 = vld [vmem:[#allocation10 + $0x1278] sm:$0xff] }
 0x479   : > { %v4200_v21 = vpack.c.bf16 %v1753_v12, %v1745_v11  ;;  %v1833_v11 = vld [vmem:[#allocation10 + $0x1460] sm:$0xff]  ;;  %v1827_v12 = vld [vmem:[#allocation10 + $0x1430] sm:$0xff] }
 0x47a   : > { %4165 = vmatpush1.bf16.msra.mxu1 %v4164_v33  ;;  %v1708_v33 = vld [vmem:[#allocation10 + $0x1078] sm:$0xff] }
 0x47b   : > { %4421 = vmatpush1.bf16.msra.mxu0 %v4420_v34  ;;  %4167 = vmatprep.subr.bf16.mxu1 %v4166_v35  ;;  %v4184_v34 = vpack.c.bf16 %v1689_v27, %v1681_v26  ;;  %v4440_v35 = vpack.c.bf16 %v1691_v30, %v1683_v28  ;;  %v1769_v26 = vld [vmem:[#allocation10 + $0x1260] sm:$0xff]  ;;  %v1763_v27 = vld [vmem:[#allocation10 + $0x1230] sm:$0xff]  ;;  %v4458_v28 = vpack.c.bf16 %v1772_v20, %v1764_v19  ;;  %v1778_v30 = vld [vmem:[#allocation10 + $0x12a8] sm:$0xff] }
 0x47c   : > { %4423 = vmatprep.subr.bf16.mxu0 %v4422_v39  ;;  %v4442_v39 = vpack.c.bf16 %v1708_v33, %v1700_v32  ;;  %v1788_v32 = vld [vmem:[#allocation10 + $0x12f8] sm:$0xff] }
 0x47d   : > { %v1852_v19 = vld [vmem:[#allocation10 + $0x14f8] sm:$0xff] }
 0x47e   : > { %4169 = vmatpush1.bf16.msra.mxu1 %v4168_v44  ;;  %v1716_v44 = vld [vmem:[#allocation10 + $0x10b8] sm:$0xff] }
 0x47f   : > { %4425 = vmatpush1.bf16.msra.mxu0 %v4424_v45  ;;  %4171 = vmatprep.subr.bf16.mxu1 %v4170_v46  ;;  %v1724_v45 = vld [vmem:[#allocation10 + $0x10f8] sm:$0xff]  ;;  %v4444_v46 = vpack.c.bf16 %v1707_v41, %v1699_v40  ;;  %v1787_v40 = vld [vmem:[#allocation10 + $0x12f0] sm:$0xff]  ;;  %v1794_v41 = vld [vmem:[#allocation10 + $0x1328] sm:$0xff] }
 0x480   : > { %4427 = vmatprep.subr.bf16.mxu0 %v4426_v52  ;;  %v4190_v52 = vpack.c.bf16 %v1722_v0, %v1714_v29  ;;  %v4446_v2 = vpack.c.bf16 %v1724_v45, %v1716_v44  ;;  %v1802_v29 = vld [vmem:[#allocation10 + $0x1368] sm:$0xff]  ;;  %v1796_v0 = vld [vmem:[#allocation10 + $0x1338] sm:$0xff]  ;;  %v4464_v45 = vpack.c.bf16 %v1787_v40, %v1779_v38 }
 0x481   : > { %v1874_v40 = vld [vmem:[#allocation10 + $0x15a8] sm:$0xff] }
 0x482   : > { %4173 = vmatpush1.bf16.msra.mxu1 %v4172_v57  ;;  %v1740_v57 = vld [vmem:[#allocation10 + $0x1178] sm:$0xff] }
 0x483   : > { %4429 = vmatpush1.bf16.msra.mxu0 %v4428_v58  ;;  %4175 = vmatprep.subr.bf16.mxu1 %v4174_v60  ;;  %v4192_v58 = vpack.c.bf16 %v1721_v50, %v1713_v49  ;;  %v4448_v60 = vpack.c.bf16 %v1723_v54, %v1715_v51  ;;  %v4450_v63 = vpack.c.bf16 %v1740_v57, %v1732_v56  ;;  %v1793_v49 = vld [vmem:[#allocation10 + $0x1320] sm:$0xff]  ;;  %v1795_v51 = vld [vmem:[#allocation10 + $0x1330] sm:$0xff]  ;;  %v1820_v56 = vld [vmem:[#allocation10 + $0x13f8] sm:$0xff] }
 0x484   : > { %4431 = vmatprep.subr.bf16.mxu0 %v4430_v25  ;;  %v1731_v25 = vld [vmem:[#allocation10 + $0x1130] sm:$0xff]  ;;  %v1801_v50 = vld [vmem:[#allocation10 + $0x1360] sm:$0xff] }
 0x485   : > { %v1803_v54 = vld [vmem:[#allocation10 + $0x1370] sm:$0xff]  ;;  %v4212_v57 = vpack.c.bf16 %v1801_v50, %v1793_v49  ;;  %v1881_v49 = vld [vmem:[#allocation10 + $0x15e0] sm:$0xff] }
 0x486   : > { %4177 = vmatpush1.bf16.msra.mxu1 %v4176_v6  ;;  %v4196_v6 = vpack.c.bf16 %v1737_v59, %v1729_v62  ;;  %v1817_v62 = vld [vmem:[#allocation10 + $0x13e0] sm:$0xff]  ;;  %v1811_v59 = vld [vmem:[#allocation10 + $0x13b0] sm:$0xff] }
 0x487   : > { %4433 = vmatpush1.bf16.msra.mxu0 %v4432_v8  ;;  %4179 = vmatprep.subr.bf16.mxu1 %v4178_v10  ;;  %v4452_v8 = vpack.c.bf16 %v1739_v1, %v1731_v25  ;;  %v4198_v10 = vpack.c.bf16 %v1754_v4, %v1746_v3  ;;  %v1826_v1 = vld [vmem:[#allocation10 + $0x1428] sm:$0xff]  ;;  %v1828_v4 = vld [vmem:[#allocation10 + $0x1438] sm:$0xff]  ;;  %v1875_v50 = vld [vmem:[#allocation10 + $0x15b0] sm:$0xff] }
 0x488   : > { %4435 = vmatprep.subr.bf16.mxu0 %v4434_v14  ;;  %v1834_v3 = vld [vmem:[#allocation10 + $0x1468] sm:$0xff] }
 0x48a   : > { %4181 = vmatpush1.bf16.msra.mxu1 %v4180_v18 }
 0x48b   : > { %4437 = vmatpush1.bf16.msra.mxu0 %v4436_v23  ;;  %4183 = vmatprep.subr.bf16.mxu1 %v4182_v24  ;;  %v4202_v23 = vpack.c.bf16 %v1770_v17, %v1762_v15  ;;  %v1761_v24 = vld [vmem:[#allocation10 + $0x1220] sm:$0xff]  ;;  %v1850_v15 = vld [vmem:[#allocation10 + $0x14e8] sm:$0xff]  ;;  %v1844_v17 = vld [vmem:[#allocation10 + $0x14b8] sm:$0xff] }
 0x48c   : > { %4439 = vmatprep.subr.bf16.mxu0 %v4438_v48  ;;  %v1771_v48 = vld [vmem:[#allocation10 + $0x1270] sm:$0xff]  ;;  %v4204_v33 = vpack.c.bf16 %v1769_v26, %v1761_v24  ;;  %v1849_v24 = vld [vmem:[#allocation10 + $0x14e0] sm:$0xff] }
 0x48d   : > { %v1843_v26 = vld [vmem:[#allocation10 + $0x14b0] sm:$0xff] }
 0x48e   : > { %4185 = vmatpush1.bf16.msra.mxu1 %v4184_v34  ;;  %v4460_v34 = vpack.c.bf16 %v1771_v48, %v1763_v27  ;;  %v4478_v27 = vpack.c.bf16 %v1852_v19, %v1844_v17  ;;  %v1858_v48 = vld [vmem:[#allocation10 + $0x1528] sm:$0xff]  ;;  %v1932_v17 = vld [vmem:[#allocation10 + $0x1778] sm:$0xff] }
 0x48f   : > { %4441 = vmatpush1.bf16.msra.mxu0 %v4440_v35  ;;  %4187 = vmatprep.subr.bf16.mxu1 %v4186_v36  ;;  %v4206_v35 = vpack.c.bf16 %v1786_v31, %v1778_v30  ;;  %v1777_v36 = vld [vmem:[#allocation10 + $0x12a0] sm:$0xff]  ;;  %v1866_v30 = vld [vmem:[#allocation10 + $0x1568] sm:$0xff]  ;;  %v1860_v31 = vld [vmem:[#allocation10 + $0x1538] sm:$0xff] }
 0x490   : > { %4443 = vmatprep.subr.bf16.mxu0 %v4442_v39  ;;  %v4462_v39 = vpack.c.bf16 %v1788_v32, %v1780_v9  ;;  %v4208_v44 = vpack.c.bf16 %v1785_v37, %v1777_v36  ;;  %v1868_v9 = vld [vmem:[#allocation10 + $0x1578] sm:$0xff]  ;;  %v1865_v36 = vld [vmem:[#allocation10 + $0x1560] sm:$0xff]  ;;  %v1859_v37 = vld [vmem:[#allocation10 + $0x1530] sm:$0xff] }
 0x491   : > { %2909 = vmatmul.mubr.f32.vlgmr.msra.gmra.mrb[14].mxu1 %v5306_v16  ;;  %v4482_v38 = vpack.c.bf16 %v1868_v9, %v1860_v31  ;;  %v1948_v31 = vld [vmem:[#allocation10 + $0x17f8] sm:$0xff] }
 0x492   : > { %3193 = vmatmul.mubr.f32.vlgmr.msra.gmra.mrb[10].mxu0 %v5306_v16  ;;  %4189 = vmatpush1.bf16.msra.mxu1 %v4188_v43  ;;  %v1756_v16 = vld [vmem:[#allocation10 + $0x11f8] sm:$0xff] }
 0x493   : > { %2979 = vmatprep.mubr.f32.mxu1 %v5309_v22  ;;  %4445 = vmatpush1.bf16.msra.mxu0 %v4444_v46  ;;  %v4454_v14 = vpack.c.bf16 %v1756_v16, %v1748_v5  ;;  %v1804_v43 = vld [vmem:[#allocation10 + $0x1378] sm:$0xff]  ;;  %v4210_v46 = vpack.c.bf16 %v1802_v29, %v1794_v41  ;;  %v1882_v41 = vld [vmem:[#allocation10 + $0x15e8] sm:$0xff] }
 0x494   : > { %3263 = vmatprep.mubr.f32.mxu0 %v5309_v22  ;;  %4191 = vmatprep.subr.bf16.mxu1 %v4190_v52  ;;  %v1755_v22 = vld [vmem:[#allocation10 + $0x11f0] sm:$0xff]  ;;  %v4466_v52 = vpack.c.bf16 %v1804_v43, %v1796_v0  ;;  %v1836_v5 = vld [vmem:[#allocation10 + $0x1478] sm:$0xff] }
 0x495   : > { %4447 = vmatprep.subr.bf16.mxu0 %v4446_v2  ;;  %v4456_v18 = vpack.c.bf16 %v1755_v22, %v1747_v13  ;;  %v1812_v2 = vld [vmem:[#allocation10 + $0x13b8] sm:$0xff]  ;;  %v4474_v13 = vpack.c.bf16 %v1836_v5, %v1828_v4  ;;  %v1842_v22 = vld [vmem:[#allocation10 + $0x14a8] sm:$0xff] }
 0x496   : > { %4193 = vmatpush1.bf16.msra.mxu1 %v4192_v58  ;;  %v4468_v58 = vpack.c.bf16 %v1803_v54, %v1795_v51  ;;  %v4470_v25 = vpack.c.bf16 %v1820_v56, %v1812_v2  ;;  %v1876_v29 = vld [vmem:[#allocation10 + $0x15b8] sm:$0xff]  ;;  %v1890_v54 = vld [vmem:[#allocation10 + $0x1628] sm:$0xff] }
 0x497   : > { %4449 = vmatpush1.bf16.msra.mxu0 %v4448_v60  ;;  %4195 = vmatprep.subr.bf16.mxu1 %v4194_v61  ;;  %v4214_v60 = vpack.c.bf16 %v1818_v47, %v1810_v55  ;;  %v1809_v61 = vld [vmem:[#allocation10 + $0x13a0] sm:$0xff]  ;;  %v1884_v0 = vld [vmem:[#allocation10 + $0x15f8] sm:$0xff]  ;;  %v1898_v55 = vld [vmem:[#allocation10 + $0x1668] sm:$0xff] }
 0x498   : > { %4451 = vmatprep.subr.bf16.mxu0 %v4450_v63  ;;  %v1819_v63 = vld [vmem:[#allocation10 + $0x13f0] sm:$0xff]  ;;  %v4216_v16 = vpack.c.bf16 %v1817_v62, %v1809_v61  ;;  %v4486_v51 = vpack.c.bf16 %v1884_v0, %v1876_v29  ;;  %v1892_v47 = vld [vmem:[#allocation10 + $0x1638] sm:$0xff]  ;;  %v1897_v61 = vld [vmem:[#allocation10 + $0x1660] sm:$0xff] }
 0x499   : > { %v1900_v2 = vld [vmem:[#allocation10 + $0x1678] sm:$0xff]  ;;  %v1891_v62 = vld [vmem:[#allocation10 + $0x1630] sm:$0xff] }
 0x49a   : > { %4197 = vmatpush1.bf16.msra.mxu1 %v4196_v6  ;;  %v4472_v6 = vpack.c.bf16 %v1819_v63, %v1811_v59  ;;  %v4490_v59 = vpack.c.bf16 %v1900_v2, %v1892_v47  ;;  %v1906_v63 = vld [vmem:[#allocation10 + $0x16a8] sm:$0xff]  ;;  %v1916_v4 = vld [vmem:[#allocation10 + $0x16f8] sm:$0xff] }
 0x49b   : > { %4453 = vmatpush1.bf16.msra.mxu0 %v4452_v8  ;;  %4199 = vmatprep.subr.bf16.mxu1 %v4198_v10  ;;  %v4218_v8 = vpack.c.bf16 %v1834_v3, %v1826_v1  ;;  %v1825_v10 = vld [vmem:[#allocation10 + $0x1420] sm:$0xff]  ;;  %v1914_v1 = vld [vmem:[#allocation10 + $0x16e8] sm:$0xff]  ;;  %v1908_v3 = vld [vmem:[#allocation10 + $0x16b8] sm:$0xff] }
 0x49c   : > { %4455 = vmatprep.subr.bf16.mxu0 %v4454_v14  ;;  %v1835_v14 = vld [vmem:[#allocation10 + $0x1470] sm:$0xff]  ;;  %v4220_v20 = vpack.c.bf16 %v1833_v11, %v1825_v10  ;;  %v1913_v10 = vld [vmem:[#allocation10 + $0x16e0] sm:$0xff]  ;;  %v1964_v29 = vld [vmem:[#allocation10 + $0x1878] sm:$0xff] }
 0x49d   : > { %v1907_v11 = vld [vmem:[#allocation10 + $0x16b0] sm:$0xff]  ;;  %v1972_v47 = vld [vmem:[#allocation10 + $0x18b8] sm:$0xff] }
 0x49e   : > { %4201 = vmatpush1.bf16.msra.mxu1 %v4200_v21  ;;  %v4476_v21 = vpack.c.bf16 %v1835_v14, %v1827_v12  ;;  %v4494_v12 = vpack.c.bf16 %v1916_v4, %v1908_v3  ;;  %v1922_v14 = vld [vmem:[#allocation10 + $0x1728] sm:$0xff]  ;;  %v1980_v2 = vld [vmem:[#allocation10 + $0x18f8] sm:$0xff] }
 0x49f   : > { %4457 = vmatpush1.bf16.msra.mxu0 %v4456_v18  ;;  %4203 = vmatprep.subr.bf16.mxu1 %v4202_v23  ;;  %v4222_v18 = vpack.c.bf16 %v1850_v15, %v1842_v22  ;;  %v1841_v23 = vld [vmem:[#allocation10 + $0x14a0] sm:$0xff]  ;;  %v1930_v22 = vld [vmem:[#allocation10 + $0x1768] sm:$0xff]  ;;  %v1924_v15 = vld [vmem:[#allocation10 + $0x1738] sm:$0xff] }
 0x4a0   : > { %4459 = vmatprep.subr.bf16.mxu0 %v4458_v28  ;;  %v1851_v28 = vld [vmem:[#allocation10 + $0x14f0] sm:$0xff]  ;;  %v4224_v32 = vpack.c.bf16 %v1849_v24, %v1841_v23  ;;  %v1929_v23 = vld [vmem:[#allocation10 + $0x1760] sm:$0xff]  ;;  %v1996_v3 = vld [vmem:[#allocation10 + $0x1978] sm:$0xff] }
 0x4a1   : > { %v1923_v24 = vld [vmem:[#allocation10 + $0x1730] sm:$0xff] }
 0x4a2   : > { %4205 = vmatpush1.bf16.msra.mxu1 %v4204_v33  ;;  %v4480_v33 = vpack.c.bf16 %v1851_v28, %v1843_v26  ;;  %v4498_v26 = vpack.c.bf16 %v1932_v17, %v1924_v15  ;;  %v1938_v28 = vld [vmem:[#allocation10 + $0x17a8] sm:$0xff] }
 0x4a3   : > { %4461 = vmatpush1.bf16.msra.mxu0 %v4460_v34  ;;  %4207 = vmatprep.subr.bf16.mxu1 %v4206_v35  ;;  %v4226_v34 = vpack.c.bf16 %v1866_v30, %v1858_v48  ;;  %v1857_v35 = vld [vmem:[#allocation10 + $0x1520] sm:$0xff]  ;;  %v1946_v48 = vld [vmem:[#allocation10 + $0x17e8] sm:$0xff]  ;;  %v1940_v30 = vld [vmem:[#allocation10 + $0x17b8] sm:$0xff] }
 0x4a4   : > { %4463 = vmatprep.subr.bf16.mxu0 %v4462_v39  ;;  %v1867_v39 = vld [vmem:[#allocation10 + $0x1570] sm:$0xff]  ;;  %v4228_v43 = vpack.c.bf16 %v1865_v36, %v1857_v35  ;;  %v1945_v35 = vld [vmem:[#allocation10 + $0x17e0] sm:$0xff] }
 0x4a5   : > { %v1939_v36 = vld [vmem:[#allocation10 + $0x17b0] sm:$0xff] }
 0x4a6   : > { %4209 = vmatpush1.bf16.msra.mxu1 %v4208_v44  ;;  %v4484_v44 = vpack.c.bf16 %v1867_v39, %v1859_v37  ;;  %v4502_v37 = vpack.c.bf16 %v1948_v31, %v1940_v30  ;;  %v1954_v39 = vld [vmem:[#allocation10 + $0x1828] sm:$0xff] }
 0x4a7   : > { %4465 = vmatpush1.bf16.msra.mxu0 %v4464_v45  ;;  %4211 = vmatprep.subr.bf16.mxu1 %v4210_v46  ;;  %v4230_v45 = vpack.c.bf16 %v1882_v41, %v1874_v40  ;;  %v1873_v46 = vld [vmem:[#allocation10 + $0x15a0] sm:$0xff]  ;;  %v1962_v40 = vld [vmem:[#allocation10 + $0x1868] sm:$0xff]  ;;  %v1956_v41 = vld [vmem:[#allocation10 + $0x1838] sm:$0xff] }
 0x4a8   : > { %4467 = vmatprep.subr.bf16.mxu0 %v4466_v52  ;;  %v1883_v52 = vld [vmem:[#allocation10 + $0x15f0] sm:$0xff]  ;;  %v4232_v56 = vpack.c.bf16 %v1881_v49, %v1873_v46  ;;  %v1961_v46 = vld [vmem:[#allocation10 + $0x1860] sm:$0xff]  ;;  %v4506_v49 = vpack.c.bf16 %v1964_v29, %v1956_v41 }
 0x4aa   : > { %4213 = vmatpush1.bf16.msra.mxu1 %v4212_v57  ;;  %v4488_v57 = vpack.c.bf16 %v1883_v52, %v1875_v50  ;;  %v1955_v50 = vld [vmem:[#allocation10 + $0x1830] sm:$0xff]  ;;  %v1970_v52 = vld [vmem:[#allocation10 + $0x18a8] sm:$0xff] }
 0x4ab   : > { %4469 = vmatpush1.bf16.msra.mxu0 %v4468_v58  ;;  %4215 = vmatprep.subr.bf16.mxu1 %v4214_v60  ;;  %v4234_v58 = vpack.c.bf16 %v1898_v55, %v1890_v54  ;;  %v1889_v60 = vld [vmem:[#allocation10 + $0x1620] sm:$0xff]  ;;  %v1978_v54 = vld [vmem:[#allocation10 + $0x18e8] sm:$0xff] }
 0x4ac   : > { %4471 = vmatprep.subr.bf16.mxu0 %v4470_v25  ;;  %v1899_v25 = vld [vmem:[#allocation10 + $0x1670] sm:$0xff]  ;;  %v4236_v5 = vpack.c.bf16 %v1897_v61, %v1889_v60  ;;  %v4254_v61 = vpack.c.bf16 %v1978_v54, %v1970_v52  ;;  %v2060_v52 = vld [vmem:[#allocation10 + $0x1b78] sm:$0xff] }
 0x4ad   : > { %v1971_v60 = vld [vmem:[#allocation10 + $0x18b0] sm:$0xff] }
 0x4ae   : > { %4217 = vmatpush1.bf16.msra.mxu1 %v4216_v16  ;;  %v4492_v16 = vpack.c.bf16 %v1899_v25, %v1891_v62  ;;  %v1979_v62 = vld [vmem:[#allocation10 + $0x18f0] sm:$0xff]  ;;  %v1994_v25 = vld [vmem:[#allocation10 + $0x1968] sm:$0xff] }
 0x4af   : > { %4473 = vmatpush1.bf16.msra.mxu0 %v4472_v6  ;;  %4219 = vmatprep.subr.bf16.mxu1 %v4218_v8  ;;  %v4238_v6 = vpack.c.bf16 %v1914_v1, %v1906_v63  ;;  %v1905_v8 = vld [vmem:[#allocation10 + $0x16a0] sm:$0xff]  ;;  %v4510_v63 = vpack.c.bf16 %v1980_v2, %v1972_v47  ;;  %v1988_v1 = vld [vmem:[#allocation10 + $0x1938] sm:$0xff] }
 0x4b0   : > { %4475 = vmatprep.subr.bf16.mxu0 %v4474_v13  ;;  %v1915_v13 = vld [vmem:[#allocation10 + $0x16f0] sm:$0xff]  ;;  %v4240_v19 = vpack.c.bf16 %v1913_v10, %v1905_v8  ;;  %v1993_v8 = vld [vmem:[#allocation10 + $0x1960] sm:$0xff] }
 0x4b1   : > { %v1987_v10 = vld [vmem:[#allocation10 + $0x1930] sm:$0xff]  ;;  %v2049_v2 = vld [vmem:[#allocation10 + $0x1b20] sm:$0xff] }
 0x4b2   : > { %4221 = vmatpush1.bf16.msra.mxu1 %v4220_v20  ;;  %v4496_v20 = vpack.c.bf16 %v1915_v13, %v1907_v11  ;;  %v4514_v11 = vpack.c.bf16 %v1996_v3, %v1988_v1  ;;  %v2002_v13 = vld [vmem:[#allocation10 + $0x19a8] sm:$0xff]  ;;  %v2068_v1 = vld [vmem:[#allocation10 + $0x1bb8] sm:$0xff] }
 0x4b3   : > { %4477 = vmatpush1.bf16.msra.mxu0 %v4476_v21  ;;  %4223 = vmatprep.subr.bf16.mxu1 %v4222_v18  ;;  %v4242_v21 = vpack.c.bf16 %v1930_v22, %v1922_v14  ;;  %v1921_v18 = vld [vmem:[#allocation10 + $0x1720] sm:$0xff]  ;;  %v2010_v14 = vld [vmem:[#allocation10 + $0x19e8] sm:$0xff]  ;;  %v2004_v22 = vld [vmem:[#allocation10 + $0x19b8] sm:$0xff] }
 0x4b4   : > { %4479 = vmatprep.subr.bf16.mxu0 %v4478_v27  ;;  %v1931_v27 = vld [vmem:[#allocation10 + $0x1770] sm:$0xff]  ;;  %v4244_v9 = vpack.c.bf16 %v1929_v23, %v1921_v18  ;;  %v2076_v3 = vld [vmem:[#allocation10 + $0x1bf8] sm:$0xff] }
 0x4b5   : > { %v2003_v18 = vld [vmem:[#allocation10 + $0x19b0] sm:$0xff] }
 0x4b6   : > { %4225 = vmatpush1.bf16.msra.mxu1 %v4224_v32  ;;  %v4500_v32 = vpack.c.bf16 %v1931_v27, %v1923_v24  ;;  %v2018_v24 = vld [vmem:[#allocation10 + $0x1a28] sm:$0xff]  ;;  %v2020_v27 = vld [vmem:[#allocation10 + $0x1a38] sm:$0xff] }
 0x4b7   : > { %4481 = vmatpush1.bf16.msra.mxu0 %v4480_v33  ;;  %4227 = vmatprep.subr.bf16.mxu1 %v4226_v34  ;;  %v4246_v33 = vpack.c.bf16 %v1946_v48, %v1938_v28  ;;  %v1937_v34 = vld [vmem:[#allocation10 + $0x17a0] sm:$0xff]  ;;  %v2028_v28 = vld [vmem:[#allocation10 + $0x1a78] sm:$0xff] }
 0x4b8   : > { %4483 = vmatprep.subr.bf16.mxu0 %v4482_v38  ;;  %v1947_v38 = vld [vmem:[#allocation10 + $0x17f0] sm:$0xff]  ;;  %v4248_v0 = vpack.c.bf16 %v1945_v35, %v1937_v34  ;;  %v4522_v34 = vpack.c.bf16 %v2028_v28, %v2020_v27  ;;  %v2106_v27 = vld [vmem:[#allocation10 + $0x1ce8] sm:$0xff]  ;;  %v2100_v28 = vld [vmem:[#allocation10 + $0x1cb8] sm:$0xff] }
 0x4b9   : > { %v2027_v35 = vld [vmem:[#allocation10 + $0x1a70] sm:$0xff] }
 0x4ba   : > { %4229 = vmatpush1.bf16.msra.mxu1 %v4228_v43  ;;  %v4504_v43 = vpack.c.bf16 %v1947_v38, %v1939_v36  ;;  %v2034_v36 = vld [vmem:[#allocation10 + $0x1aa8] sm:$0xff]  ;;  %v2036_v38 = vld [vmem:[#allocation10 + $0x1ab8] sm:$0xff] }
 0x4bb   : > { %4485 = vmatpush1.bf16.msra.mxu0 %v4484_v44  ;;  %4231 = vmatprep.subr.bf16.mxu1 %v4230_v45  ;;  %v4250_v44 = vpack.c.bf16 %v1962_v40, %v1954_v39  ;;  %v1953_v45 = vld [vmem:[#allocation10 + $0x1820] sm:$0xff]  ;;  %v2044_v39 = vld [vmem:[#allocation10 + $0x1af8] sm:$0xff] }
 0x4bc   : > { %4487 = vmatprep.subr.bf16.mxu0 %v4486_v51  ;;  %v1963_v51 = vld [vmem:[#allocation10 + $0x1870] sm:$0xff]  ;;  %v4252_v55 = vpack.c.bf16 %v1961_v46, %v1953_v45  ;;  %v4526_v45 = vpack.c.bf16 %v2044_v39, %v2036_v38  ;;  %v2122_v38 = vld [vmem:[#allocation10 + $0x1d68] sm:$0xff]  ;;  %v2116_v39 = vld [vmem:[#allocation10 + $0x1d38] sm:$0xff] }
 0x4bd   : > { %v2043_v46 = vld [vmem:[#allocation10 + $0x1af0] sm:$0xff] }
 0x4be   : > { %4233 = vmatpush1.bf16.msra.mxu1 %v4232_v56  ;;  %v4508_v56 = vpack.c.bf16 %v1963_v51, %v1955_v50  ;;  %v2058_v50 = vld [vmem:[#allocation10 + $0x1b68] sm:$0xff]  ;;  %v2052_v51 = vld [vmem:[#allocation10 + $0x1b38] sm:$0xff] }
 0x4bf   : > { %4489 = vmatpush1.bf16.msra.mxu0 %v4488_v57  ;;  %4235 = vmatprep.subr.bf16.mxu1 %v4234_v58  ;;  %v1969_v57 = vld [vmem:[#allocation10 + $0x18a0] sm:$0xff] }
 0x4c0   : > { %4491 = vmatprep.subr.bf16.mxu0 %v4490_v59  ;;  %v1977_v58 = vld [vmem:[#allocation10 + $0x18e0] sm:$0xff]  ;;  %v1986_v59 = vld [vmem:[#allocation10 + $0x1928] sm:$0xff] }
 0x4c1   : > { %v4256_v4 = vpack.c.bf16 %v1977_v58, %v1969_v57  ;;  %v2051_v57 = vld [vmem:[#allocation10 + $0x1b30] sm:$0xff] }
 0x4c2   : > { %4237 = vmatpush1.bf16.msra.mxu1 %v4236_v5  ;;  %v4512_v5 = vpack.c.bf16 %v1979_v62, %v1971_v60  ;;  %v4530_v60 = vpack.c.bf16 %v2060_v52, %v2052_v51  ;;  %v2066_v62 = vld [vmem:[#allocation10 + $0x1ba8] sm:$0xff]  ;;  %v2132_v52 = vld [vmem:[#allocation10 + $0x1db8] sm:$0xff] }
 0x4c3   : > { %4493 = vmatpush1.bf16.msra.mxu0 %v4492_v16  ;;  %4239 = vmatprep.subr.bf16.mxu1 %v4238_v6  ;;  %v4258_v16 = vpack.c.bf16 %v1994_v25, %v1986_v59  ;;  %v1985_v6 = vld [vmem:[#allocation10 + $0x1920] sm:$0xff]  ;;  %v2074_v59 = vld [vmem:[#allocation10 + $0x1be8] sm:$0xff] }
 0x4c4   : > { %4495 = vmatprep.subr.bf16.mxu0 %v4494_v12  ;;  %v1995_v12 = vld [vmem:[#allocation10 + $0x1970] sm:$0xff]  ;;  %v4260_v15 = vpack.c.bf16 %v1993_v8, %v1985_v6  ;;  %v4278_v6 = vpack.c.bf16 %v2074_v59, %v2066_v62  ;;  %v2065_v8 = vld [vmem:[#allocation10 + $0x1ba0] sm:$0xff]  ;;  %v2138_v51 = vld [vmem:[#allocation10 + $0x1de8] sm:$0xff] }
 0x4c5   : > { %v4516_v17 = vpack.c.bf16 %v1995_v12, %v1987_v10  ;;  %v2073_v10 = vld [vmem:[#allocation10 + $0x1be0] sm:$0xff]  ;;  %v4534_v12 = vpack.c.bf16 %v2076_v3, %v2068_v1  ;;  %v2146_v62 = vld [vmem:[#allocation10 + $0x1e28] sm:$0xff] }
 0x4c6   : > { %4241 = vmatpush1.bf16.msra.mxu1 %v4240_v19  ;;  %v4262_v19 = vpack.c.bf16 %v2010_v14, %v2002_v13  ;;  %v2075_v13 = vld [vmem:[#allocation10 + $0x1bf0] sm:$0xff]  ;;  %v2082_v14 = vld [vmem:[#allocation10 + $0x1c28] sm:$0xff] }
 0x4c7   : > { %4497 = vmatpush1.bf16.msra.mxu0 %v4496_v20  ;;  %4243 = vmatprep.subr.bf16.mxu1 %v4242_v21  ;;  %v2001_v20 = vld [vmem:[#allocation10 + $0x19a0] sm:$0xff]  ;;  %v2154_v59 = vld [vmem:[#allocation10 + $0x1e68] sm:$0xff] }
 0x4c8   : > { %4499 = vmatprep.subr.bf16.mxu0 %v4498_v26  ;;  %v2009_v21 = vld [vmem:[#allocation10 + $0x19e0] sm:$0xff]  ;;  %v2026_v26 = vld [vmem:[#allocation10 + $0x1a68] sm:$0xff] }
 0x4c9   : > { %v4264_v48 = vpack.c.bf16 %v2009_v21, %v2001_v20  ;;  %v4266_v31 = vpack.c.bf16 %v2026_v26, %v2018_v24  ;;  %v2081_v21 = vld [vmem:[#allocation10 + $0x1c20] sm:$0xff]  ;;  %v2091_v24 = vld [vmem:[#allocation10 + $0x1c70] sm:$0xff]  ;;  %v2098_v26 = vld [vmem:[#allocation10 + $0x1ca8] sm:$0xff] }
 0x4ca   : > { %4245 = vmatpush1.bf16.msra.mxu1 %v4244_v9  ;;  %v2017_v9 = vld [vmem:[#allocation10 + $0x1a20] sm:$0xff] }
 0x4cb   : > { %4501 = vmatpush1.bf16.msra.mxu0 %v4500_v32  ;;  %4247 = vmatprep.subr.bf16.mxu1 %v4246_v33  ;;  %v2025_v32 = vld [vmem:[#allocation10 + $0x1a60] sm:$0xff]  ;;  %v2019_v33 = vld [vmem:[#allocation10 + $0x1a30] sm:$0xff] }
 0x4cc   : > { %4503 = vmatprep.subr.bf16.mxu0 %v4502_v37  ;;  %v2042_v37 = vld [vmem:[#allocation10 + $0x1ae8] sm:$0xff]  ;;  %v4268_v40 = vpack.c.bf16 %v2025_v32, %v2017_v9  ;;  %v4524_v41 = vpack.c.bf16 %v2027_v35, %v2019_v33  ;;  %v4286_v9 = vpack.c.bf16 %v2106_v27, %v2098_v26  ;;  %v2097_v32 = vld [vmem:[#allocation10 + $0x1ca0] sm:$0xff]  ;;  %v2188_v26 = vld [vmem:[#allocation10 + $0x1f78] sm:$0xff] }
 0x4cd   : > { %v4270_v29 = vpack.c.bf16 %v2042_v37, %v2034_v36  ;;  %v2105_v33 = vld [vmem:[#allocation10 + $0x1ce0] sm:$0xff]  ;;  %v2107_v36 = vld [vmem:[#allocation10 + $0x1cf0] sm:$0xff]  ;;  %v2114_v37 = vld [vmem:[#allocation10 + $0x1d28] sm:$0xff] }
 0x4ce   : > { %4249 = vmatpush1.bf16.msra.mxu1 %v4248_v0  ;;  %v2033_v0 = vld [vmem:[#allocation10 + $0x1aa0] sm:$0xff] }
 0x4cf   : > { %4505 = vmatpush1.bf16.msra.mxu0 %v4504_v43  ;;  %4251 = vmatprep.subr.bf16.mxu1 %v4250_v44  ;;  %v2041_v43 = vld [vmem:[#allocation10 + $0x1ae0] sm:$0xff]  ;;  %v2035_v44 = vld [vmem:[#allocation10 + $0x1ab0] sm:$0xff] }
 0x4d0   : > { %4507 = vmatprep.subr.bf16.mxu0 %v4506_v49  ;;  %v2050_v49 = vld [vmem:[#allocation10 + $0x1b28] sm:$0xff]  ;;  %v4272_v54 = vpack.c.bf16 %v2041_v43, %v2033_v0  ;;  %v4290_v0 = vpack.c.bf16 %v2122_v38, %v2114_v37  ;;  %v2113_v43 = vld [vmem:[#allocation10 + $0x1d20] sm:$0xff]  ;;  %v2204_v37 = vld [vmem:[#allocation10 + $0x1ff8] sm:$0xff] }
 0x4d1   : > { %2980 = vmatmul.mubr.f32.vlgmr.msra.gmra.mrb[14].mxu1 %v5316_v42  ;;  %v4274_v47 = vpack.c.bf16 %v2058_v50, %v2050_v49  ;;  %v2123_v49 = vld [vmem:[#allocation10 + $0x1d70] sm:$0xff]  ;;  %v2130_v50 = vld [vmem:[#allocation10 + $0x1da8] sm:$0xff] }
 0x4d2   : > { %3264 = vmatmul.mubr.f32.vlgmr.msra.gmra.mrb[10].mxu0 %v5316_v42  ;;  %4253 = vmatpush1.bf16.msra.mxu1 %v4252_v55  ;;  %v2012_v42 = vld [vmem:[#allocation10 + $0x19f8] sm:$0xff]  ;;  %v4528_v55 = vpack.c.bf16 %v2043_v46, %v2035_v44  ;;  %v2121_v44 = vld [vmem:[#allocation10 + $0x1d60] sm:$0xff] }
 0x4d3   : > { %3050 = vmatprep.mubr.f32.mxu1 %v5319_v53  ;;  %4509 = vmatpush1.bf16.msra.mxu0 %v4508_v56  ;;  %v4518_v23 = vpack.c.bf16 %v2012_v42, %v2004_v22  ;;  %v2057_v56 = vld [vmem:[#allocation10 + $0x1b60] sm:$0xff]  ;;  %v2090_v22 = vld [vmem:[#allocation10 + $0x1c68] sm:$0xff]  ;;  %v2084_v42 = vld [vmem:[#allocation10 + $0x1c38] sm:$0xff] }
 0x4d4   : > { %3334 = vmatprep.mubr.f32.mxu0 %v5319_v53  ;;  %4255 = vmatprep.subr.bf16.mxu1 %v4254_v61  ;;  %v2011_v53 = vld [vmem:[#allocation10 + $0x19f0] sm:$0xff]  ;;  %v4282_v20 = vpack.c.bf16 %v2090_v22, %v2082_v14  ;;  %v2172_v14 = vld [vmem:[#allocation10 + $0x1ef8] sm:$0xff] }
 0x4d5   : > { %4511 = vmatprep.subr.bf16.mxu0 %v4510_v63  ;;  %v4520_v30 = vpack.c.bf16 %v2011_v53, %v2003_v18  ;;  %v2059_v61 = vld [vmem:[#allocation10 + $0x1b70] sm:$0xff]  ;;  %v2089_v18 = vld [vmem:[#allocation10 + $0x1c60] sm:$0xff] }
 0x4d6   : > { %4257 = vmatpush1.bf16.msra.mxu1 %v4256_v4 }
 0x4d7   : > { %4513 = vmatpush1.bf16.msra.mxu0 %v4512_v5  ;;  %4259 = vmatprep.subr.bf16.mxu1 %v4258_v16  ;;  %v4276_v5 = vpack.c.bf16 %v2057_v56, %v2049_v2  ;;  %v4532_v16 = vpack.c.bf16 %v2059_v61, %v2051_v57  ;;  %v4294_v2 = vpack.c.bf16 %v2138_v51, %v2130_v50  ;;  %v2129_v56 = vld [vmem:[#allocation10 + $0x1da0] sm:$0xff]  ;;  %v2139_v61 = vld [vmem:[#allocation10 + $0x1df0] sm:$0xff] }
 0x4d8   : > { %4515 = vmatprep.subr.bf16.mxu0 %v4514_v11  ;;  %v2067_v11 = vld [vmem:[#allocation10 + $0x1bb0] sm:$0xff]  ;;  %v2137_v57 = vld [vmem:[#allocation10 + $0x1de0] sm:$0xff] }
 0x4d9   : > { %v4296_v1 = vpack.c.bf16 %v2137_v57, %v2129_v56 }
 0x4da   : > { %4261 = vmatpush1.bf16.msra.mxu1 %v4260_v15  ;;  %v2092_v15 = vld [vmem:[#allocation10 + $0x1c78] sm:$0xff] }
 0x4db   : > { %4517 = vmatpush1.bf16.msra.mxu0 %v4516_v17  ;;  %4263 = vmatprep.subr.bf16.mxu1 %v4262_v19  ;;  %v4280_v17 = vpack.c.bf16 %v2073_v10, %v2065_v8  ;;  %v4536_v19 = vpack.c.bf16 %v2075_v13, %v2067_v11  ;;  %v4538_v53 = vpack.c.bf16 %v2092_v15, %v2084_v42  ;;  %v2155_v10 = vld [vmem:[#allocation10 + $0x1e70] sm:$0xff]  ;;  %v2162_v11 = vld [vmem:[#allocation10 + $0x1ea8] sm:$0xff]  ;;  %v2164_v13 = vld [vmem:[#allocation10 + $0x1eb8] sm:$0xff] }
 0x4dc   : > { %4519 = vmatprep.subr.bf16.mxu0 %v4518_v23  ;;  %v2083_v23 = vld [vmem:[#allocation10 + $0x1c30] sm:$0xff] }
 0x4de   : > { %4265 = vmatpush1.bf16.msra.mxu1 %v4264_v48  ;;  %v2108_v48 = vld [vmem:[#allocation10 + $0x1cf8] sm:$0xff] }
 0x4df   : > { %4521 = vmatpush1.bf16.msra.mxu0 %v4520_v30  ;;  %4267 = vmatprep.subr.bf16.mxu1 %v4266_v31  ;;  %v4284_v30 = vpack.c.bf16 %v2089_v18, %v2081_v21  ;;  %v4540_v31 = vpack.c.bf16 %v2091_v24, %v2083_v23  ;;  %v4542_v35 = vpack.c.bf16 %v2108_v48, %v2100_v28  ;;  %v2171_v18 = vld [vmem:[#allocation10 + $0x1ef0] sm:$0xff]  ;;  %v2178_v23 = vld [vmem:[#allocation10 + $0x1f28] sm:$0xff]  ;;  %v2180_v24 = vld [vmem:[#allocation10 + $0x1f38] sm:$0xff] }
 0x4e0   : > { %4523 = vmatprep.subr.bf16.mxu0 %v4522_v34  ;;  %v2099_v34 = vld [vmem:[#allocation10 + $0x1cb0] sm:$0xff]  ;;  %v4558_v21 = vpack.c.bf16 %v2172_v14, %v2164_v13 }
 0x4e2   : > { %4269 = vmatpush1.bf16.msra.mxu1 %v4268_v40  ;;  %v2124_v40 = vld [vmem:[#allocation10 + $0x1d78] sm:$0xff] }
 0x4e3   : > { %4525 = vmatpush1.bf16.msra.mxu0 %v4524_v41  ;;  %4271 = vmatprep.subr.bf16.mxu1 %v4270_v29  ;;  %v4288_v41 = vpack.c.bf16 %v2105_v33, %v2097_v32  ;;  %v4544_v29 = vpack.c.bf16 %v2107_v36, %v2099_v34  ;;  %v4546_v46 = vpack.c.bf16 %v2124_v40, %v2116_v39  ;;  %v2187_v33 = vld [vmem:[#allocation10 + $0x1f70] sm:$0xff]  ;;  %v2194_v34 = vld [vmem:[#allocation10 + $0x1fa8] sm:$0xff]  ;;  %v2196_v36 = vld [vmem:[#allocation10 + $0x1fb8] sm:$0xff] }
 0x4e4   : > { %v2484_v58 = vpop.f32.mrb[12].mxu1  ;;  %4527 = vmatprep.subr.bf16.mxu0 %v4526_v45  ;;  %v2115_v45 = vld [vmem:[#allocation10 + $0x1d30] sm:$0xff]  ;;  %v4562_v32 = vpack.c.bf16 %v2188_v26, %v2180_v24 }
 0x4e5   : > { %3341 = vst [vmem:[%s5345_s25] sm:$0xff] %v2484_v58  ;;  %v2768_v25 = vpop.f32.mrb[8].mxu0  ;;  %v2486_v63 = vpop.f32.mrb[13].mxu1  ;;  %v2131_v58 = vld [vmem:[#allocation10 + $0x1db0] sm:$0xff] }
 0x4e6   : > { %3343 = vst [vmem:[%s5345_s25 + $0x10] sm:$0xff] %v2768_v25  ;;  %3342 = vst [vmem:[%s5345_s25 + $0x8] sm:$0xff] %v2486_v63  ;;  %v2770_v4 = vpop.f32.mrb[9].mxu0  ;;  %4273 = vmatpush1.bf16.msra.mxu1 %v4272_v54  ;;  %v2140_v54 = vld [vmem:[#allocation10 + $0x1df8] sm:$0xff]  ;;  %v4552_v3 = vpack.c.bf16 %v2139_v61, %v2131_v58 }
 0x4e7   : > { %3344 = vst [vmem:[%s5345_s25 + $0x18] sm:$0xff] %v2770_v4  ;;  %4529 = vmatpush1.bf16.msra.mxu0 %v4528_v55  ;;  %4275 = vmatprep.subr.bf16.mxu1 %v4274_v47  ;;  %v4292_v55 = vpack.c.bf16 %v2121_v44, %v2113_v43  ;;  %v4548_v47 = vpack.c.bf16 %v2123_v49, %v2115_v45  ;;  %v2148_v25 = vld [vmem:[#allocation10 + $0x1e38] sm:$0xff]  ;;  %v2195_v43 = vld [vmem:[#allocation10 + $0x1fb0] sm:$0xff] }
 0x4e8   : > { %4531 = vmatprep.subr.bf16.mxu0 %v4530_v60  ;;  %v4550_v60 = vpack.c.bf16 %v2140_v54, %v2132_v52  ;;  %v2156_v63 = vld [vmem:[#allocation10 + $0x1e78] sm:$0xff]  ;;  %v4298_v4 = vpack.c.bf16 %v2154_v59, %v2146_v62  ;;  %v2203_v44 = vld [vmem:[#allocation10 + $0x1ff0] sm:$0xff] }
 0x4e9   : > { %v4554_v8 = vpack.c.bf16 %v2156_v63, %v2148_v25 }
 0x4ea   : > { %4277 = vmatpush1.bf16.msra.mxu1 %v4276_v5  ;;  %v2145_v5 = vld [vmem:[#allocation10 + $0x1e20] sm:$0xff] }
 0x4eb   : > { %4533 = vmatpush1.bf16.msra.mxu0 %v4532_v16  ;;  %4279 = vmatprep.subr.bf16.mxu1 %v4278_v6  ;;  %v2153_v16 = vld [vmem:[#allocation10 + $0x1e60] sm:$0xff]  ;;  %v2147_v6 = vld [vmem:[#allocation10 + $0x1e30] sm:$0xff] }
 0x4ec   : > { %4535 = vmatprep.subr.bf16.mxu0 %v4534_v12  ;;  %v2170_v12 = vld [vmem:[#allocation10 + $0x1ee8] sm:$0xff]  ;;  %v4300_v22 = vpack.c.bf16 %v2153_v16, %v2145_v5  ;;  %v4556_v42 = vpack.c.bf16 %v2155_v10, %v2147_v6 }
 0x4ed   : > { %v4302_v15 = vpack.c.bf16 %v2170_v12, %v2162_v11 }
 0x4ee   : > { %4281 = vmatpush1.bf16.msra.mxu1 %v4280_v17  ;;  %v2161_v17 = vld [vmem:[#allocation10 + $0x1ea0] sm:$0xff] }
 0x4ef   : > { %4537 = vmatpush1.bf16.msra.mxu0 %v4536_v19  ;;  %4283 = vmatprep.subr.bf16.mxu1 %v4282_v20  ;;  %v2169_v19 = vld [vmem:[#allocation10 + $0x1ee0] sm:$0xff]  ;;  %v2163_v20 = vld [vmem:[#allocation10 + $0x1eb0] sm:$0xff] }
 0x4f0   : > { %4539 = vmatprep.subr.bf16.mxu0 %v4538_v53  ;;  %v2186_v53 = vld [vmem:[#allocation10 + $0x1f68] sm:$0xff]  ;;  %v4304_v27 = vpack.c.bf16 %v2169_v19, %v2161_v17  ;;  %v4560_v28 = vpack.c.bf16 %v2171_v18, %v2163_v20 }
 0x4f1   : > { %v4306_v48 = vpack.c.bf16 %v2186_v53, %v2178_v23 }
 0x4f2   : > { %4285 = vmatpush1.bf16.msra.mxu1 %v4284_v30  ;;  %v2177_v30 = vld [vmem:[#allocation10 + $0x1f20] sm:$0xff] }
 0x4f3   : > { %4541 = vmatpush1.bf16.msra.mxu0 %v4540_v31  ;;  %4287 = vmatprep.subr.bf16.mxu1 %v4286_v9  ;;  %v2185_v31 = vld [vmem:[#allocation10 + $0x1f60] sm:$0xff]  ;;  %v2179_v9 = vld [vmem:[#allocation10 + $0x1f30] sm:$0xff] }
 0x4f4   : > { %4543 = vmatprep.subr.bf16.mxu0 %v4542_v35  ;;  %v2202_v35 = vld [vmem:[#allocation10 + $0x1fe8] sm:$0xff]  ;;  %v4308_v38 = vpack.c.bf16 %v2185_v31, %v2177_v30  ;;  %v4564_v39 = vpack.c.bf16 %v2187_v33, %v2179_v9 }
 0x4f5   : > { %v4310_v40 = vpack.c.bf16 %v2202_v35, %v2194_v34 }
 0x4f6   : > { %4289 = vmatpush1.bf16.msra.mxu1 %v4288_v41  ;;  %v2193_v41 = vld [vmem:[#allocation10 + $0x1fa0] sm:$0xff] }
 0x4f7   : > { %4545 = vmatpush1.bf16.msra.mxu0 %v4544_v29  ;;  %4291 = vmatprep.subr.bf16.mxu1 %v4290_v0  ;;  %v2201_v29 = vld [vmem:[#allocation10 + $0x1fe0] sm:$0xff]  ;;  %v4566_v0 = vpack.c.bf16 %v2204_v37, %v2196_v36 }
 0x4f8   : > { %4547 = vmatprep.subr.bf16.mxu0 %v4546_v46  ;;  %v4312_v45 = vpack.c.bf16 %v2201_v29, %v2193_v41  ;;  %v4568_v46 = vpack.c.bf16 %v2203_v44, %v2195_v43 }
 0x4fa   : > { %4293 = vmatpush1.bf16.msra.mxu1 %v4292_v55 }
 0x4fb   : > { %4549 = vmatpush1.bf16.msra.mxu0 %v4548_v47  ;;  %4295 = vmatprep.subr.bf16.mxu1 %v4294_v2 }
 0x4fc   : > { %4551 = vmatprep.subr.bf16.mxu0 %v4550_v60 }
 0x4fe   : > { %4297 = vmatpush1.bf16.msra.mxu1 %v4296_v1 }
 0x4ff   : > { %4553 = vmatpush1.bf16.msra.mxu0 %v4552_v3  ;;  %4299 = vmatprep.subr.bf16.mxu1 %v4298_v4 }
 0x500   : > { %4555 = vmatprep.subr.bf16.mxu0 %v4554_v8 }
 0x502   : > { %4301 = vmatpush1.bf16.msra.mxu1 %v4300_v22 }
 0x503   : > { %4557 = vmatpush1.bf16.msra.mxu0 %v4556_v42  ;;  %4303 = vmatprep.subr.bf16.mxu1 %v4302_v15 }
 0x504   : > { %4559 = vmatprep.subr.bf16.mxu0 %v4558_v21 }
 0x506   : > { %4305 = vmatpush1.bf16.msra.mxu1 %v4304_v27 }
 0x507   : > { %4561 = vmatpush1.bf16.msra.mxu0 %v4560_v28  ;;  %4307 = vmatprep.subr.bf16.mxu1 %v4306_v48 }
 0x508   : > { %4563 = vmatprep.subr.bf16.mxu0 %v4562_v32 }
 0x50a   : > { %4309 = vmatpush1.bf16.msra.mxu1 %v4308_v38 }
 0x50b   : > { %4565 = vmatpush1.bf16.msra.mxu0 %v4564_v39  ;;  %4311 = vmatprep.subr.bf16.mxu1 %v4310_v40 }
 0x50c   : > { %4567 = vmatprep.subr.bf16.mxu0 %v4566_v0 }
 0x50e   : > { %4313 = vmatpush1.bf16.msra.mxu1 %v4312_v45 }
 0x50f   : > { %4569 = vmatpush1.bf16.msra.mxu0 %v4568_v46 }
 0x511   : > { %3051 = vmatmul.mubr.f32.vlgmr.msra.gmra.mrb[14].mxu1 %v5326_v7 }
 0x512   : > { %3335 = vmatmul.mubr.f32.vlgmr.msra.gmra.mrb[10].mxu0 %v5326_v7 }
 0x5e4   : > { %v3052_v49 = vpop.f32.mrb[14].mxu1 }
 0x5e5   : > { %3345 = vst [vmem:[%s5345_s25 + $0x20] sm:$0xff] %v3052_v49  ;;  %v3336_v50 = vpop.f32.mrb[10].mxu0  ;;  %v3054_v51 = vpop.f32.mrb[15].mxu1 }
 0x5e6   : > { %3347 = vst [vmem:[%s5345_s25 + $0x30] sm:$0xff] %v3336_v50  ;;  %3346 = vst [vmem:[%s5345_s25 + $0x28] sm:$0xff] %v3054_v51  ;;  %v3338_v7 = vpop.f32.mrb[11].mxu0 }
 0x5e7   : > { %3348 = vst [vmem:[%s5345_s25 + $0x38] sm:$0xff] %v3338_v7 }
 0x5e8   : > { %4847 = shalt.err (!%p4844_p13)
}
 0x5e9   : > { %s4848_s14 = scalar_lea.hbm %s5359_s22, 1024  ;;  %s4852_s24 = scalar_lea.hbm %s5415_s9, 2048 }
 0x5ea   : > { %p4849_p9 = scmp.ne.s32.totalorder %s5359_s22, %s4848_s14  ;;  %p4853_p4 = scmp.lt.u32.totalorder %s5359_s22, %s5415_s9 }
 0x5eb   : > { %p4854_p8 = scmp.lt.u32.totalorder %s4852_s24, %s4848_s14  ;;  %p4856_p10 = scmp.lt.u32.totalorder %s4848_s14, %s5359_s22 }
 0x5ec   : > { %p4850_p0 = pnand %p4849_p9, %p5141_p5 }
 0x5ed   : > { %p4855_p6 = por %p4854_p8, %p4853_p4 }
 0x5ee   : > { %p4851_p11 = pneg %p4850_p0 }
 0x5ef   : > { %p4857_p3 = por %p4856_p10, %p4855_p6 }
 0x5f1   : > { %p4858_p7 = pnand %p4857_p3, %p4851_p11 }
 0x5f3   : > { %4861 = shalt.err (!%p4858_p7)
}
 0x5f4   : > { %4612 = dma.vmem_to_hbm [thread:$0]  (%p5141_p5), %s5361_s29, 1024, %s5359_s22, %s3350_s13  }
 0x5f5 PF: > { %s5445_s18 = sld [smem:[#allocation16_spill]]  ;;  %s5446_s15 = sld [smem:[#allocation17_spill]] }
 0x5f6   : > { %p5448_p1 = scmp.ge.s32.totalorder %s4908_s12, 2 }
 0x5fb   : > { %s3376_s17 = sand.u32 1, %s5445_s18   ;;  %p5447_p12 = scmp.ne.s32.totalorder %s5446_s15, 0 }
 0x5fc   : > { %s3377_s21 = scalar_lea.sflag [#allocation4], %s3376_s17 }
 0x5fd   : > { %p4632_p2 = pnand %p5448_p1, %p5447_p12 }
 0x5ff   : > { %4891 = dma.done.wait (!%p4632_p2), %s3377_s21, 1024  }
 0x600   : > { %4893 = vsyncadd (!%p4632_p2), %s3377_s21, 4294966272  ;;  %p24_p13 = scmp.ge.s32.totalorder %s5127_s28, 4   ;;  %s5449_s30 = smov %s4900_s10 }
 0x601   : > { %s5450_s10 = smov %s4904_s11  ;;  %s5451_s11 = smov %s5137_s16 }
 0x602   : > { %s5452_s12 = smov %s5127_s28  ;;  %26 = sbr.rel (!%p24_p13) target bundleno = 9 (0x9), region = 120 }
 0x609   :  { %3382 = vsyncpa [#allocation3], 1 }
 0x60a   :  { %3384 = vsyncpa [#allocation3 + $0x1], 1 }
 0x60b   :  { %3385 = vsyncpa [#allocation6], 1 }
 0x60c   :  { %3386 = vsyncpa [#allocation9], 1 }
 0x60d   :  { %3387 = vsyncpa [#allocation4], 1 }
 0x60e   :  { %3389 = vsyncpa [#allocation4 + $0x1], 1 }

</bundles_post_ra>
